<compile_context>
chip_gen: v7x
topology: tpu7x:2x2x1
jax: 0.10.0
libtpu: 0.0.40
codegen_flags: <defaults>
</compile_context>

<pallas_src>
import functools

import jax
import jax.numpy as jnp
from jax.experimental import pallas as pl
from jax.experimental.pallas import tpu as pltpu


# ---------------------------------------------------------------------------
# Device-dependent tuning knobs (resolved once at import time).
# ---------------------------------------------------------------------------
def _device_kind() -> str:
    try:
        return jax.devices()[0].device_kind.lower()
    except Exception:
        return ""


_KIND = _device_kind()
# Spectral block-diagonal group size: 8 -> 256-wide matmul (v6e/v7x native MXU
# tile); 4 -> 128-wide (v5e and older / unknown devices).
_SPECTRAL_GROUP = 8 if ("v6" in _KIND or "v7" in _KIND) else 4
# v7x has 2 TensorCores per chip: split the lane / group axis 2-way "parallel".
_NUM_TC = 2 if "v7" in _KIND else 1


# ---------------------------------------------------------------------------
# In-kernel exact-erf GELU (f32-accurate polynomial; exp runs on the EUP).
# ---------------------------------------------------------------------------
_SQRT_HALF = 0.7071067811865476


def _erf_f32(x):
    # Abramowitz & Stegun 7.1.26 (max abs error ~1.5e-7).
    ax = jnp.abs(x)
    t = 1.0 / (1.0 + 0.3275911 * ax)
    poly = t * (0.254829592
                + t * (-0.284496736
                       + t * (1.421413741
                              + t * (-1.453152027 + t * 1.061405429))))
    y = 1.0 - poly * jnp.exp(-ax * ax)
    return jnp.where(x < 0, -y, y)


def _gelu(x):
    return 0.5 * x * (1.0 + _erf_f32(x * _SQRT_HALF))


# ---------------------------------------------------------------------------
# Kernel 1: fc0 lift.  out = W[:, :2] @ h + W[:, 2:] @ x + b    (no XLA concat)
# ---------------------------------------------------------------------------
def _fc0_kernel(h_ref, x_ref, w_ref, b_ref, o_ref):
    w = w_ref[...]                                           # (Cout, 4)
    y = (jnp.dot(w[:, 0:2], h_ref[...], preferred_element_type=jnp.float32)
         + jnp.dot(w[:, 2:4], x_ref[...], preferred_element_type=jnp.float32)
         + b_ref[...])
    o_ref[...] = y.astype(o_ref.dtype)


def pallas_fc0(h_cn, x_cn, w, b):
    Ch, N = h_cn.shape
    Cout = w.shape[0]
    nb = N // _NUM_TC
    return pl.pallas_call(
        _fc0_kernel,
        out_shape=jax.ShapeDtypeStruct((Cout, N), jnp.float32),
        grid=(_NUM_TC,),
        in_specs=[
            pl.BlockSpec((Ch, nb), lambda i: (0, i)),
            pl.BlockSpec((Ch, nb), lambda i: (0, i)),
            pl.BlockSpec((Cout, 4), lambda i: (0, 0)),
            pl.BlockSpec((Cout, 1), lambda i: (0, 0)),
        ],
        out_specs=pl.BlockSpec((Cout, nb), lambda i: (0, i)),
        compiler_params=pltpu.CompilerParams(dimension_semantics=("parallel",)),
    )(h_cn, x_cn, w, b)


# ---------------------------------------------------------------------------
# Kernel 2: fused  out = GELU(Wt @ x + b + spectral_residual)   (w0 / w1 layers)
# ---------------------------------------------------------------------------
def _resid_linear_kernel(x_ref, w_ref, b_ref, add_ref, o_ref):
    y = jnp.dot(w_ref[...], x_ref[...], preferred_element_type=jnp.float32)
    y = _gelu(y + b_ref[...] + add_ref[...])
    o_ref[...] = y.astype(o_ref.dtype)


def pallas_resid_linear(x_cn, w, b, add_cn):
    Cin, N = x_cn.shape
    Cout = w.shape[0]
    nb = N // _NUM_TC
    return pl.pallas_call(
        _resid_linear_kernel,
        out_shape=jax.ShapeDtypeStruct((Cout, N), jnp.float32),
        grid=(_NUM_TC,),
        in_specs=[
            pl.BlockSpec((Cin, nb), lambda i: (0, i)),
            pl.BlockSpec((Cout, Cin), lambda i: (0, 0)),
            pl.BlockSpec((Cout, 1), lambda i: (0, 0)),
            pl.BlockSpec((Cout, nb), lambda i: (0, i)),
        ],
        out_specs=pl.BlockSpec((Cout, nb), lambda i: (0, i)),
        compiler_params=pltpu.CompilerParams(dimension_semantics=("parallel",)),
    )(x_cn, w, b, add_cn)


# ---------------------------------------------------------------------------
# Kernel 3: grouped block-complex spectral channel mix.
#   x: (Ng, B, G*2Cin), w: (Ng, G*2Cin, G*2Cout) block-diagonal (built at init)
#   One batched matmul, one lane-dense (>=128 wide) full-block store.
# ---------------------------------------------------------------------------
def _spectral_kernel(x_ref, w_ref, o_ref):
    o_ref[...] = jnp.einsum("gbc,gcd->gbd", x_ref[...], w_ref[...],
                            preferred_element_type=jnp.float32)


def pallas_spectral_mul(x_grp, w_grp):
    Ng, B, GC = x_grp.shape
    GCo = w_grp.shape[2]
    ngb = max(Ng // _NUM_TC, 1)
    gsteps = Ng // ngb
    return pl.pallas_call(
        _spectral_kernel,
        out_shape=jax.ShapeDtypeStruct((Ng, B, GCo), jnp.float32),
        grid=(gsteps,),
        in_specs=[
            pl.BlockSpec((ngb, B, GC), lambda i: (i, 0, 0)),
            pl.BlockSpec((ngb, GC, GCo), lambda i: (i, 0, 0)),
        ],
        out_specs=pl.BlockSpec((ngb, B, GCo), lambda i: (i, 0, 0)),
        compiler_params=pltpu.CompilerParams(dimension_semantics=("parallel",)),
    )(x_grp, w_grp)


# ---------------------------------------------------------------------------
# Kernel 4: fused head.
#   t = W3 @ z + b3 + conv3      (no GELU)
#   g = GELU(W1 @ t + b1)
#   y = W2 @ g + b2              (2, N)
#   out = sum_k kweights[0,k] * y[:, k*ss:(k+1)*ss]   -> (2, ss) lane-dense
# ---------------------------------------------------------------------------
def _head_kernel(z_ref, spec3_ref, w3_ref, b3_ref, w1_ref, b1_ref,
                 w2_ref, b2_ref, kw_ref, o_ref):
    t = jnp.dot(w3_ref[...], z_ref[...], preferred_element_type=jnp.float32)
    t = t + b3_ref[...] + spec3_ref[...]
    g = _gelu(jnp.dot(w1_ref[...], t, preferred_element_type=jnp.float32)
              + b1_ref[...])
    y = jnp.dot(w2_ref[...], g, preferred_element_type=jnp.float32) + b2_ref[...]
    ss = o_ref.shape[1]
    k = kw_ref.shape[1]
    acc = kw_ref[0, 0] * y[:, 0:ss]                 # SMEM scalar * lane slice (VPU)
    for kk in range(1, k):
        acc = acc + kw_ref[0, kk] * y[:, kk * ss:(kk + 1) * ss]
    o_ref[...] = acc.astype(o_ref.dtype)


def pallas_head(z_cn, spec3_cn, w3, b3, w1, b1, w2, b2, kweights, ss):
    Cw, N = z_cn.shape
    H1 = w1.shape[0]
    C2 = w2.shape[0]
    return pl.pallas_call(
        _head_kernel,
        out_shape=jax.ShapeDtypeStruct((C2, ss), jnp.float32),
        grid=(1,),
        in_specs=[
            pl.BlockSpec((Cw, N), lambda i: (0, 0)),
            pl.BlockSpec((Cw, N), lambda i: (0, 0)),
            pl.BlockSpec((Cw, Cw), lambda i: (0, 0)),
            pl.BlockSpec((Cw, 1), lambda i: (0, 0)),
            pl.BlockSpec((H1, Cw), lambda i: (0, 0)),
            pl.BlockSpec((H1, 1), lambda i: (0, 0)),
            pl.BlockSpec((C2, H1), lambda i: (0, 0)),
            pl.BlockSpec((C2, 1), lambda i: (0, 0)),
            pl.BlockSpec(memory_space=pltpu.MemorySpace.SMEM),
        ],
        out_specs=pl.BlockSpec((C2, ss), lambda i: (0, 0)),
        compiler_params=pltpu.CompilerParams(dimension_semantics=("arbitrary",)),
    )(z_cn, spec3_cn, w3, b3, w1, b1, w2, b2, kweights)


# ---------------------------------------------------------------------------
# SpectralConv2d (channels-first (C, B, H, W)); FFTs stay in XLA.
# ---------------------------------------------------------------------------
def spectral_conv2d(z4, w_grp, modes1, modes2, group):
    # TODO(synk): rfft2/irfft2 (and the complex mode gather / zero-padded
    # scatter around them) have no Pallas/Mosaic equivalent; they stay in XLA,
    # where the small layout ops fuse around the FFT custom calls.
    Cin, B, H, W = z4.shape
    Wf = W // 2 + 1
    M = 2 * modes1 * modes2
    Ng = M // group
    Cout = w_grp.shape[2] // (2 * group)

    z_ft = jnp.fft.rfft2(z4, axes=(2, 3))                      # (Cin, B, H, Wf) c64
    s1 = z_ft[:, :, :modes1, :modes2]
    s2 = z_ft[:, :, H - modes1:, :modes2]
    slab = jnp.concatenate([s1, s2], axis=2).reshape(Cin, B, M)
    slab = jnp.transpose(slab, (2, 1, 0))                      # (M, B, Cin)
    xb = jnp.concatenate([jnp.real(slab), jnp.imag(slab)], axis=-1)  # (M, B, 2Cin)
    # pack G modes onto the lane axis -> (Ng, B, G*2Cin)
    xg = (xb.reshape(Ng, group, B, 2 * Cin)
            .transpose(0, 2, 1, 3)
            .reshape(Ng, B, group * 2 * Cin))

    out = pallas_spectral_mul(xg.astype(jnp.float32), w_grp)   # (Ng, B, G*2Cout)
    out = (out.reshape(Ng, B, group, 2 * Cout)
              .transpose(0, 2, 1, 3)
              .reshape(M, B, 2 * Cout))
    y = (out[:, :, :Cout] + 1j * out[:, :, Cout:]).astype(jnp.complex64)  # (M,B,Cout)
    y = jnp.transpose(y.reshape(2 * modes1, modes2, B, Cout), (3, 2, 0, 1))
    out_ft = jnp.zeros((Cout, B, H, Wf), jnp.complex64)
    out_ft = out_ft.at[:, :, :modes1, :modes2].set(y[:, :, :modes1, :])
    out_ft = out_ft.at[:, :, H - modes1:, :modes2].set(y[:, :, modes1:, :])
    return jnp.fft.irfft2(out_ft, s=(H, W), axes=(2, 3))       # (Cout, B, H, W) f32


# ---------------------------------------------------------------------------
# RONNCell forward (glue in plain JAX; hot path in the Pallas kernels)
# ---------------------------------------------------------------------------
def ronn_cell_forward(params, h, x, modes, group=_SPECTRAL_GROUP):
    k_, s1_, s2_, _ = h.shape
    N = k_ * s1_ * s2_
    ss = s1_ * s2_

    h_cn = jnp.transpose(h, (3, 0, 1, 2)).reshape(2, N)        # channels-first
    x_cn = jnp.transpose(x, (3, 0, 1, 2)).reshape(2, N)
    z = pallas_fc0(h_cn, x_cn, *params["fc0"])                 # (width, N)
    width = z.shape[0]

    def spec(z_cn, w_grp):
        return spectral_conv2d(z_cn.reshape(width, k_, s1_, s2_), w_grp,
                               modes, modes, group).reshape(width, N)

    z = pallas_resid_linear(z, *params["w0"], spec(z, params["conv0"]))  # +GELU
    z = pallas_resid_linear(z, *params["w1"], spec(z, params["conv1"]))  # +GELU
    # w3 + conv3 (no GELU), fc1 + GELU, fc2 and the kweights combine: one call.
    comb = pallas_head(z, spec(z, params["conv3"]),
                       *params["w3"], *params["fc1"], *params["fc2"],
                       params["kweights"], ss)                           # (2, ss)
    return jnp.transpose(comb.reshape(2, s1_, s2_), (1, 2, 0))[None]     # (1,s,s,2)


# ---------------------------------------------------------------------------
# Deterministic parameter init (shapes/distributions from the PyTorch module).
# Spectral weights are pre-transformed ONCE into the grouped block-diagonal
# block-complex real form (M//G, G*2Cin, G*2Cout) used directly by the kernel.
# ---------------------------------------------------------------------------
def spectral_weight_block(w1, w2):
    # w*: (Cin, Cout, m1, m2) complex -> (2*m1*m2, 2Cin, 2Cout) float32
    def to_slabs(w):
        Cin, Cout = w.shape[0], w.shape[1]
        wr = jnp.real(w).transpose(2, 3, 0, 1).reshape(-1, Cin, Cout)
        wi = jnp.imag(w).transpose(2, 3, 0, 1).reshape(-1, Cin, Cout)
        return wr, wi

    w1r, w1i = to_slabs(w1)
    w2r, w2i = to_slabs(w2)
    wr = jnp.concatenate([w1r, w2r], axis=0)                   # (M, Cin, Cout)
    wi = jnp.concatenate([w1i, w2i], axis=0)
    top = jnp.concatenate([wr, wi], axis=-1)                   # [wr, wi]
    bot = jnp.concatenate([-wi, wr], axis=-1)                  # [-wi, wr]
    return jnp.concatenate([top, bot], axis=1).astype(jnp.float32)  # (M,2Cin,2Cout)


def group_block_diag(w_block, group):
    # (M, 2Cin, 2Cout) -> (M//G, G*2Cin, G*2Cout) block-diagonal.
    M, C2i, C2o = w_block.shape
    Ng = M // group
    w = w_block.reshape(Ng, group, C2i, C2o)
    bd = jnp.einsum("ngio,gh->ngiho", w, jnp.eye(group, dtype=w_block.dtype))
    return bd.reshape(Ng, group * C2i, group * C2o)


def init_params(key, modes, width, k, group):
    keys = jax.random.split(key, 13)
    scale = 1.0 / (width * width)

    def crand(kk):
        kr, ki = jax.random.split(kk)
        re = scale * jax.random.uniform(kr, (width, width, modes, modes))
        im = scale * jax.random.uniform(ki, (width, width, modes, modes))
        return (re + 1j * im).astype(jnp.complex64)

    def lin(kk, fan_in, fan_out):
        kw, kb = jax.random.split(kk)
        bound = 1.0 / (fan_in ** 0.5)
        W = jax.random.uniform(kw, (fan_out, fan_in), minval=-bound, maxval=bound)
        b = jax.random.uniform(kb, (fan_out, 1), minval=-bound, maxval=bound)
        return W.astype(jnp.float32), b.astype(jnp.float32)

    def conv(k1, k2):
        return group_block_diag(spectral_weight_block(crand(k1), crand(k2)), group)

    params = {
        "fc0": lin(keys[0], 4, width),
        "conv0": conv(keys[1], keys[2]),
        "conv1": conv(keys[3], keys[4]),
        "conv3": conv(keys[5], keys[6]),
        "w0": lin(keys[7], width, width),
        "w1": lin(keys[8], width, width),
        "w3": lin(keys[9], width, width),
        "fc1": lin(keys[10], width, 64),
        "fc2": lin(keys[11], 64, 2),
    }
    bound_k = (6.0 / (1 + k)) ** 0.5  # xavier_uniform_ on (1, k)
    params["kweights"] = jax.random.uniform(
        keys[12], (1, k), minval=-bound_k, maxval=bound_k
    ).astype(jnp.float32)
    return params


if __name__ == "__main__":
    modes, width, k, s = 4, 16, 4, 16
    dt = 0.01  # stored on RONNCell but unused in the forward pass

    key = jax.random.PRNGKey(0)
    kp, kh, kx = jax.random.split(key, 3)
    params = init_params(kp, modes, width, k, _SPECTRAL_GROUP)

    # h: previous k states (u, v) ; x: grid coords (x, y) -> cat gives 4 channels.
    h = jax.random.normal(kh, (k, s, s, 2), dtype=jnp.float32)
    x = jax.random.normal(kx, (k, s, s, 2), dtype=jnp.float32)

    fwd = jax.jit(functools.partial(ronn_cell_forward, modes=modes))
    out = fwd(params, h, x)
    jax.block_until_ready(out)
    assert out.shape == (1, s, s, 2) and out.dtype == jnp.float32
    assert bool(jnp.isfinite(out).all())
    print("KERNEL_OK")
</pallas_src>

<mosaic_0001>
module attributes {stable_mosaic.version = 11 : i64} {
  func.func @_fc0_kernel(%arg0: i32, %arg1: memref<2x1024xf32, #tpu.memory_space<vmem>>, %arg2: memref<2x1024xf32, #tpu.memory_space<vmem>>, %arg3: memref<16x4xf32, #tpu.memory_space<vmem>>, %arg4: memref<16x1xf32, #tpu.memory_space<vmem>>, %arg5: memref<16x1024xf32, #tpu.memory_space<vmem>>) attributes {dimension_semantics = [#tpu.dimension_semantics<parallel>], iteration_bounds = array<i64: 1>, scalar_prefetch = 0 : i64, scratch_operands = 0 : i64, tpu.core_type = #tpu.core_type<tc>, window_params = [{transform_indices = @transform_0, window_bounds = array<i64: 2, 1024>}, {transform_indices = @transform_1, window_bounds = array<i64: 2, 1024>}, {pipeline_mode = #tpu.pipeline_mode<synchronous>, transform_indices = @transform_2, window_bounds = array<i64: 16, 4>}, {pipeline_mode = #tpu.pipeline_mode<synchronous>, transform_indices = @transform_3, window_bounds = array<i64: 16, 1>}, {transform_indices = @transform_4, window_bounds = array<i64: 16, 1024>}]} {
    %c0 = arith.constant 0 : index
    %c0_0 = arith.constant 0 : index
    %0 = vector.load %arg3[%c0, %c0_0] : memref<16x4xf32, #tpu.memory_space<vmem>>, vector<16x4xf32>
    %1 = vector.extract_strided_slice %0 {offsets = [0, 0], sizes = [16, 2], strides = [1, 1]} : vector<16x4xf32> to vector<16x2xf32>
    %c0_1 = arith.constant 0 : index
    %c0_2 = arith.constant 0 : index
    %2 = vector.load %arg1[%c0_1, %c0_2] : memref<2x1024xf32, #tpu.memory_space<vmem>>, vector<2x1024xf32>
    %cst = arith.constant dense<0.000000e+00> : vector<16x1024xf32>
    %3 = tpu.matmul %1, %2, %cst {dimension_numbers = #tpu.dot_dimension_numbers<[1], [0], [0], [1], [0, 0, 1, 1], [], []>} : vector<16x2xf32>, vector<2x1024xf32>, vector<16x1024xf32> -> vector<16x1024xf32>
    %4 = vector.extract_strided_slice %0 {offsets = [0, 2], sizes = [16, 2], strides = [1, 1]} : vector<16x4xf32> to vector<16x2xf32>
    %c0_3 = arith.constant 0 : index
    %c0_4 = arith.constant 0 : index
    %5 = vector.load %arg2[%c0_3, %c0_4] : memref<2x1024xf32, #tpu.memory_space<vmem>>, vector<2x1024xf32>
    %cst_5 = arith.constant dense<0.000000e+00> : vector<16x1024xf32>
    %6 = tpu.matmul %4, %5, %cst_5 {dimension_numbers = #tpu.dot_dimension_numbers<[1], [0], [0], [1], [0, 0, 1, 1], [], []>} : vector<16x2xf32>, vector<2x1024xf32>, vector<16x1024xf32> -> vector<16x1024xf32>
    %7 = arith.addf %3, %6 : vector<16x1024xf32>
    %c0_6 = arith.constant 0 : index
    %c0_7 = arith.constant 0 : index
    %8 = vector.load %arg4[%c0_6, %c0_7] : memref<16x1xf32, #tpu.memory_space<vmem>>, vector<16x1xf32>
    %9 = vector.broadcast %8 : vector<16x1xf32> to vector<16x1024xf32>
    %10 = arith.addf %7, %9 : vector<16x1024xf32>
    %c0_8 = arith.constant 0 : index
    %c0_9 = arith.constant 0 : index
    %11 = vector.load %arg5[%c0_8, %c0_9] : memref<16x1024xf32, #tpu.memory_space<vmem>>, vector<16x1024xf32>
    tpu.vector_store %arg5[%c0_8, %c0_9], %10 {strides = array<i32>} : memref<16x1024xf32, #tpu.memory_space<vmem>>, vector<16x1024xf32>,
    return
  }
  func.func @transform_0(%arg0: i32) -> (i32, i32) {
    %c0_i32 = arith.constant 0 : i32
    %c0_i32_0 = arith.constant 0 : i32
    return %c0_i32, %arg0 : i32, i32
  }
  func.func @transform_1(%arg0: i32) -> (i32, i32) {
    %c0_i32 = arith.constant 0 : i32
    %c0_i32_0 = arith.constant 0 : i32
    return %c0_i32, %arg0 : i32, i32
  }
  func.func @transform_2(%arg0: i32) -> (i32, i32) {
    %c0_i32 = arith.constant 0 : i32
    %c0_i32_0 = arith.constant 0 : i32
    %c0_i32_1 = arith.constant 0 : i32
    return %c0_i32, %c0_i32_0 : i32, i32
  }
  func.func @transform_3(%arg0: i32) -> (i32, i32) {
    %c0_i32 = arith.constant 0 : i32
    %c0_i32_0 = arith.constant 0 : i32
    %c0_i32_1 = arith.constant 0 : i32
    return %c0_i32, %c0_i32_0 : i32, i32
  }
  func.func @transform_4(%arg0: i32) -> (i32, i32) {
    %c0_i32 = arith.constant 0 : i32
    %c0_i32_0 = arith.constant 0 : i32
    return %c0_i32, %arg0 : i32, i32
  }
}

module attributes {stable_mosaic.version = 11 : i64} {
  func.func @_spectral_kernel(%arg0: i32, %arg1: memref<8x4x128xf32, #tpu.memory_space<vmem>>, %arg2: memref<8x128x128xf32, #tpu.memory_space<vmem>>, %arg3: memref<8x4x128xf32, #tpu.memory_space<vmem>>) attributes {dimension_semantics = [#tpu.dimension_semantics<parallel>], iteration_bounds = array<i64: 1>, scalar_prefetch = 0 : i64, scratch_operands = 0 : i64, tpu.core_type = #tpu.core_type<tc>, window_params = [{transform_indices = @transform_0, window_bounds = array<i64: 8, 4, 128>}, {transform_indices = @transform_1, window_bounds = array<i64: 8, 128, 128>}, {transform_indices = @transform_2, window_bounds = array<i64: 8, 4, 128>}]} {
    %c0 = arith.constant 0 : index
    %c0_0 = arith.constant 0 : index
    %c0_1 = arith.constant 0 : index
    %0 = vector.load %arg1[%c0, %c0_0, %c0_1] : memref<8x4x128xf32, #tpu.memory_space<vmem>>, vector<8x4x128xf32>
    %c0_2 = arith.constant 0 : index
    %c0_3 = arith.constant 0 : index
    %c0_4 = arith.constant 0 : index
    %1 = vector.load %arg2[%c0_2, %c0_3, %c0_4] : memref<8x128x128xf32, #tpu.memory_space<vmem>>, vector<8x128x128xf32>
    "tpu.trace_start"() <{level = 10 : i32, message = "gbc,gcd->gbd"}> : () -> ()
    %cst = arith.constant dense<0.000000e+00> : vector<8x4x128xf32>
    %2 = tpu.matmul %0, %1, %cst {dimension_numbers = #tpu.dot_dimension_numbers<[2], [1], [1], [2], [0, 0, 0, 1, 1, 2], [0], [0]>} : vector<8x4x128xf32>, vector<8x128x128xf32>, vector<8x4x128xf32> -> vector<8x4x128xf32>
    "tpu.trace_stop"() : () -> ()
    %c0_5 = arith.constant 0 : index
    %c0_6 = arith.constant 0 : index
    %c0_7 = arith.constant 0 : index
    %3 = vector.load %arg3[%c0_5, %c0_6, %c0_7] : memref<8x4x128xf32, #tpu.memory_space<vmem>>, vector<8x4x128xf32>
    tpu.vector_store %arg3[%c0_5, %c0_6, %c0_7], %2 {strides = array<i32>} : memref<8x4x128xf32, #tpu.memory_space<vmem>>, vector<8x4x128xf32>,
    return
  }
  func.func @transform_0(%arg0: i32) -> (i32, i32, i32) {
    %c0_i32 = arith.constant 0 : i32
    %c0_i32_0 = arith.constant 0 : i32
    %c0_i32_1 = arith.constant 0 : i32
    return %arg0, %c0_i32, %c0_i32_0 : i32, i32, i32
  }
  func.func @transform_1(%arg0: i32) -> (i32, i32, i32) {
    %c0_i32 = arith.constant 0 : i32
    %c0_i32_0 = arith.constant 0 : i32
    %c0_i32_1 = arith.constant 0 : i32
    return %arg0, %c0_i32, %c0_i32_0 : i32, i32, i32
  }
  func.func @transform_2(%arg0: i32) -> (i32, i32, i32) {
    %c0_i32 = arith.constant 0 : i32
    %c0_i32_0 = arith.constant 0 : i32
    %c0_i32_1 = arith.constant 0 : i32
    return %arg0, %c0_i32, %c0_i32_0 : i32, i32, i32
  }
}

module attributes {stable_mosaic.version = 11 : i64} {
  func.func @_resid_linear_kernel(%arg0: i32, %arg1: memref<16x1024xf32, #tpu.memory_space<vmem>>, %arg2: memref<16x16xf32, #tpu.memory_space<vmem>>, %arg3: memref<16x1xf32, #tpu.memory_space<vmem>>, %arg4: memref<16x1024xf32, #tpu.memory_space<vmem>>, %arg5: memref<16x1024xf32, #tpu.memory_space<vmem>>) attributes {dimension_semantics = [#tpu.dimension_semantics<parallel>], iteration_bounds = array<i64: 1>, scalar_prefetch = 0 : i64, scratch_operands = 0 : i64, tpu.core_type = #tpu.core_type<tc>, window_params = [{transform_indices = @transform_0, window_bounds = array<i64: 16, 1024>}, {pipeline_mode = #tpu.pipeline_mode<synchronous>, transform_indices = @transform_1, window_bounds = array<i64: 16, 16>}, {pipeline_mode = #tpu.pipeline_mode<synchronous>, transform_indices = @transform_2, window_bounds = array<i64: 16, 1>}, {transform_indices = @transform_3, window_bounds = array<i64: 16, 1024>}, {transform_indices = @transform_4, window_bounds = array<i64: 16, 1024>}]} {
    %c0 = arith.constant 0 : index
    %c0_0 = arith.constant 0 : index
    %0 = vector.load %arg2[%c0, %c0_0] : memref<16x16xf32, #tpu.memory_space<vmem>>, vector<16x16xf32>
    %c0_1 = arith.constant 0 : index
    %c0_2 = arith.constant 0 : index
    %1 = vector.load %arg1[%c0_1, %c0_2] : memref<16x1024xf32, #tpu.memory_space<vmem>>, vector<16x1024xf32>
    %cst = arith.constant dense<0.000000e+00> : vector<16x1024xf32>
    %2 = tpu.matmul %0, %1, %cst {dimension_numbers = #tpu.dot_dimension_numbers<[1], [0], [0], [1], [0, 0, 1, 1], [], []>} : vector<16x16xf32>, vector<16x1024xf32>, vector<16x1024xf32> -> vector<16x1024xf32>
    %c0_3 = arith.constant 0 : index
    %c0_4 = arith.constant 0 : index
    %3 = vector.load %arg3[%c0_3, %c0_4] : memref<16x1xf32, #tpu.memory_space<vmem>>, vector<16x1xf32>
    %4 = vector.broadcast %3 : vector<16x1xf32> to vector<16x1024xf32>
    %5 = arith.addf %2, %4 : vector<16x1024xf32>
    %c0_5 = arith.constant 0 : index
    %c0_6 = arith.constant 0 : index
    %6 = vector.load %arg4[%c0_5, %c0_6] : memref<16x1024xf32, #tpu.memory_space<vmem>>, vector<16x1024xf32>
    %7 = arith.addf %5, %6 : vector<16x1024xf32>
    %cst_7 = arith.constant 5.000000e-01 : f32
    %8 = vector.broadcast %cst_7 : f32 to vector<16x1024xf32>
    %9 = arith.mulf %8, %7 : vector<16x1024xf32>
    %cst_8 = arith.constant 0.707106769 : f32
    %10 = vector.broadcast %cst_8 : f32 to vector<16x1024xf32>
    %11 = arith.mulf %7, %10 : vector<16x1024xf32>
    %12 = math.absf %11 : vector<16x1024xf32>
    %cst_9 = arith.constant 0.327591091 : f32
    %13 = vector.broadcast %cst_9 : f32 to vector<16x1024xf32>
    %14 = arith.mulf %13, %12 : vector<16x1024xf32>
    %cst_10 = arith.constant 1.000000e+00 : f32
    %15 = vector.broadcast %cst_10 : f32 to vector<16x1024xf32>
    %16 = arith.addf %15, %14 : vector<16x1024xf32>
    %cst_11 = arith.constant 1.000000e+00 : f32
    %17 = vector.broadcast %cst_11 : f32 to vector<16x1024xf32>
    %18 = arith.divf %17, %16 : vector<16x1024xf32>
    %cst_12 = arith.constant 1.06140542 : f32
    %19 = vector.broadcast %cst_12 : f32 to vector<16x1024xf32>
    %20 = arith.mulf %18, %19 : vector<16x1024xf32>
    %cst_13 = arith.constant -1.45315206 : f32
    %21 = vector.broadcast %cst_13 : f32 to vector<16x1024xf32>
    %22 = arith.addf %21, %20 : vector<16x1024xf32>
    %23 = arith.mulf %18, %22 : vector<16x1024xf32>
    %cst_14 = arith.constant 1.42141378 : f32
    %24 = vector.broadcast %cst_14 : f32 to vector<16x1024xf32>
    %25 = arith.addf %24, %23 : vector<16x1024xf32>
    %26 = arith.mulf %18, %25 : vector<16x1024xf32>
    %cst_15 = arith.constant -0.284496725 : f32
    %27 = vector.broadcast %cst_15 : f32 to vector<16x1024xf32>
    %28 = arith.addf %27, %26 : vector<16x1024xf32>
    %29 = arith.mulf %18, %28 : vector<16x1024xf32>
    %cst_16 = arith.constant 0.254829586 : f32
    %30 = vector.broadcast %cst_16 : f32 to vector<16x1024xf32>
    %31 = arith.addf %30, %29 : vector<16x1024xf32>
    %32 = arith.mulf %18, %31 : vector<16x1024xf32>
    %cst_17 = arith.constant 0.000000e+00 : f32
    %33 = vector.broadcast %cst_17 : f32 to vector<16x1024xf32>
    %34 = arith.subf %33, %12 : vector<16x1024xf32>
    %35 = arith.mulf %34, %12 : vector<16x1024xf32>
    %36 = math.exp %35 : vector<16x1024xf32>
    %37 = arith.mulf %32, %36 : vector<16x1024xf32>
    %cst_18 = arith.constant 1.000000e+00 : f32
    %38 = vector.broadcast %cst_18 : f32 to vector<16x1024xf32>
    %39 = arith.subf %38, %37 : vector<16x1024xf32>
    %cst_19 = arith.constant 0.000000e+00 : f32
    %40 = vector.broadcast %cst_19 : f32 to vector<16x1024xf32>
    %41 = arith.cmpf olt, %11, %40 : vector<16x1024xf32>
    %cst_20 = arith.constant 0.000000e+00 : f32
    %42 = vector.broadcast %cst_20 : f32 to vector<16x1024xf32>
    %43 = arith.subf %42, %39 : vector<16x1024xf32>
    %44 = arith.select %41, %43, %39 : vector<16x1024xi1>, vector<16x1024xf32>
    %cst_21 = arith.constant 1.000000e+00 : f32
    %45 = vector.broadcast %cst_21 : f32 to vector<16x1024xf32>
    %46 = arith.addf %45, %44 : vector<16x1024xf32>
    %47 = arith.mulf %9, %46 : vector<16x1024xf32>
    %c0_22 = arith.constant 0 : index
    %c0_23 = arith.constant 0 : index
    %48 = vector.load %arg5[%c0_22, %c0_23] : memref<16x1024xf32, #tpu.memory_space<vmem>>, vector<16x1024xf32>
    tpu.vector_store %arg5[%c0_22, %c0_23], %47 {strides = array<i32>} : memref<16x1024xf32, #tpu.memory_space<vmem>>, vector<16x1024xf32>,
    return
  }
  func.func @transform_0(%arg0: i32) -> (i32, i32) {
    %c0_i32 = arith.constant 0 : i32
    %c0_i32_0 = arith.constant 0 : i32
    return %c0_i32, %arg0 : i32, i32
  }
  func.func @transform_1(%arg0: i32) -> (i32, i32) {
    %c0_i32 = arith.constant 0 : i32
    %c0_i32_0 = arith.constant 0 : i32
    %c0_i32_1 = arith.constant 0 : i32
    return %c0_i32, %c0_i32_0 : i32, i32
  }
  func.func @transform_2(%arg0: i32) -> (i32, i32) {
    %c0_i32 = arith.constant 0 : i32
    %c0_i32_0 = arith.constant 0 : i32
    %c0_i32_1 = arith.constant 0 : i32
    return %c0_i32, %c0_i32_0 : i32, i32
  }
  func.func @transform_3(%arg0: i32) -> (i32, i32) {
    %c0_i32 = arith.constant 0 : i32
    %c0_i32_0 = arith.constant 0 : i32
    return %c0_i32, %arg0 : i32, i32
  }
  func.func @transform_4(%arg0: i32) -> (i32, i32) {
    %c0_i32 = arith.constant 0 : i32
    %c0_i32_0 = arith.constant 0 : i32
    return %c0_i32, %arg0 : i32, i32
  }
}

module attributes {stable_mosaic.version = 11 : i64} {
  func.func @_head_kernel(%arg0: i32, %arg1: memref<16x1024xf32, #tpu.memory_space<vmem>>, %arg2: memref<16x1024xf32, #tpu.memory_space<vmem>>, %arg3: memref<16x16xf32, #tpu.memory_space<vmem>>, %arg4: memref<16x1xf32, #tpu.memory_space<vmem>>, %arg5: memref<64x16xf32, #tpu.memory_space<vmem>>, %arg6: memref<64x1xf32, #tpu.memory_space<vmem>>, %arg7: memref<2x64xf32, #tpu.memory_space<vmem>>, %arg8: memref<2x1xf32, #tpu.memory_space<vmem>>, %arg9: memref<1x4xf32, #tpu.memory_space<smem>>, %arg10: memref<2x256xf32, #tpu.memory_space<vmem>>) attributes {dimension_semantics = [#tpu.dimension_semantics<arbitrary>], iteration_bounds = array<i64: 1>, scalar_prefetch = 0 : i64, scratch_operands = 0 : i64, tpu.core_type = #tpu.core_type<tc>, window_params = [{pipeline_mode = #tpu.pipeline_mode<synchronous>, transform_indices = @transform_0, window_bounds = array<i64: 16, 1024>}, {pipeline_mode = #tpu.pipeline_mode<synchronous>, transform_indices = @transform_1, window_bounds = array<i64: 16, 1024>}, {pipeline_mode = #tpu.pipeline_mode<synchronous>, transform_indices = @transform_2, window_bounds = array<i64: 16, 16>}, {pipeline_mode = #tpu.pipeline_mode<synchronous>, transform_indices = @transform_3, window_bounds = array<i64: 16, 1>}, {pipeline_mode = #tpu.pipeline_mode<synchronous>, transform_indices = @transform_4, window_bounds = array<i64: 64, 16>}, {pipeline_mode = #tpu.pipeline_mode<synchronous>, transform_indices = @transform_5, window_bounds = array<i64: 64, 1>}, {pipeline_mode = #tpu.pipeline_mode<synchronous>, transform_indices = @transform_6, window_bounds = array<i64: 2, 64>}, {pipeline_mode = #tpu.pipeline_mode<synchronous>, transform_indices = @transform_7, window_bounds = array<i64: 2, 1>}, {transform_indices = @transform_8, window_bounds = array<i64: 1, 4>}, {pipeline_mode = #tpu.pipeline_mode<synchronous>, transform_indices = @transform_9, window_bounds = array<i64: 2, 256>}]} {
    %c0 = arith.constant 0 : index
    %c0_0 = arith.constant 0 : index
    %0 = vector.load %arg3[%c0, %c0_0] : memref<16x16xf32, #tpu.memory_space<vmem>>, vector<16x16xf32>
    %c0_1 = arith.constant 0 : index
    %c0_2 = arith.constant 0 : index
    %1 = vector.load %arg1[%c0_1, %c0_2] : memref<16x1024xf32, #tpu.memory_space<vmem>>, vector<16x1024xf32>
    %cst = arith.constant dense<0.000000e+00> : vector<16x1024xf32>
    %2 = tpu.matmul %0, %1, %cst {dimension_numbers = #tpu.dot_dimension_numbers<[1], [0], [0], [1], [0, 0, 1, 1], [], []>} : vector<16x16xf32>, vector<16x1024xf32>, vector<16x1024xf32> -> vector<16x1024xf32>
    %c0_3 = arith.constant 0 : index
    %c0_4 = arith.constant 0 : index
    %3 = vector.load %arg4[%c0_3, %c0_4] : memref<16x1xf32, #tpu.memory_space<vmem>>, vector<16x1xf32>
    %4 = vector.broadcast %3 : vector<16x1xf32> to vector<16x1024xf32>
    %5 = arith.addf %2, %4 : vector<16x1024xf32>
    %c0_5 = arith.constant 0 : index
    %c0_6 = arith.constant 0 : index
    %6 = vector.load %arg2[%c0_5, %c0_6] : memref<16x1024xf32, #tpu.memory_space<vmem>>, vector<16x1024xf32>
    %7 = arith.addf %5, %6 : vector<16x1024xf32>
    %c0_7 = arith.constant 0 : index
    %c0_8 = arith.constant 0 : index
    %8 = vector.load %arg5[%c0_7, %c0_8] : memref<64x16xf32, #tpu.memory_space<vmem>>, vector<64x16xf32>
    %cst_9 = arith.constant dense<0.000000e+00> : vector<64x1024xf32>
    %9 = tpu.matmul %8, %7, %cst_9 {dimension_numbers = #tpu.dot_dimension_numbers<[1], [0], [0], [1], [0, 0, 1, 1], [], []>} : vector<64x16xf32>, vector<16x1024xf32>, vector<64x1024xf32> -> vector<64x1024xf32>
    %c0_10 = arith.constant 0 : index
    %c0_11 = arith.constant 0 : index
    %10 = vector.load %arg6[%c0_10, %c0_11] : memref<64x1xf32, #tpu.memory_space<vmem>>, vector<64x1xf32>
    %11 = vector.broadcast %10 : vector<64x1xf32> to vector<64x1024xf32>
    %12 = arith.addf %9, %11 : vector<64x1024xf32>
    %cst_12 = arith.constant 5.000000e-01 : f32
    %13 = vector.broadcast %cst_12 : f32 to vector<64x1024xf32>
    %14 = arith.mulf %13, %12 : vector<64x1024xf32>
    %cst_13 = arith.constant 0.707106769 : f32
    %15 = vector.broadcast %cst_13 : f32 to vector<64x1024xf32>
    %16 = arith.mulf %12, %15 : vector<64x1024xf32>
    %17 = math.absf %16 : vector<64x1024xf32>
    %cst_14 = arith.constant 0.327591091 : f32
    %18 = vector.broadcast %cst_14 : f32 to vector<64x1024xf32>
    %19 = arith.mulf %18, %17 : vector<64x1024xf32>
    %cst_15 = arith.constant 1.000000e+00 : f32
    %20 = vector.broadcast %cst_15 : f32 to vector<64x1024xf32>
    %21 = arith.addf %20, %19 : vector<64x1024xf32>
    %cst_16 = arith.constant 1.000000e+00 : f32
    %22 = vector.broadcast %cst_16 : f32 to vector<64x1024xf32>
    %23 = arith.divf %22, %21 : vector<64x1024xf32>
    %cst_17 = arith.constant 1.06140542 : f32
    %24 = vector.broadcast %cst_17 : f32 to vector<64x1024xf32>
    %25 = arith.mulf %23, %24 : vector<64x1024xf32>
    %cst_18 = arith.constant -1.45315206 : f32
    %26 = vector.broadcast %cst_18 : f32 to vector<64x1024xf32>
    %27 = arith.addf %26, %25 : vector<64x1024xf32>
    %28 = arith.mulf %23, %27 : vector<64x1024xf32>
    %cst_19 = arith.constant 1.42141378 : f32
    %29 = vector.broadcast %cst_19 : f32 to vector<64x1024xf32>
    %30 = arith.addf %29, %28 : vector<64x1024xf32>
    %31 = arith.mulf %23, %30 : vector<64x1024xf32>
    %cst_20 = arith.constant -0.284496725 : f32
    %32 = vector.broadcast %cst_20 : f32 to vector<64x1024xf32>
    %33 = arith.addf %32, %31 : vector<64x1024xf32>
    %34 = arith.mulf %23, %33 : vector<64x1024xf32>
    %cst_21 = arith.constant 0.254829586 : f32
    %35 = vector.broadcast %cst_21 : f32 to vector<64x1024xf32>
    %36 = arith.addf %35, %34 : vector<64x1024xf32>
    %37 = arith.mulf %23, %36 : vector<64x1024xf32>
    %cst_22 = arith.constant 0.000000e+00 : f32
    %38 = vector.broadcast %cst_22 : f32 to vector<64x1024xf32>
    %39 = arith.subf %38, %17 : vector<64x1024xf32>
    %40 = arith.mulf %39, %17 : vector<64x1024xf32>
    %41 = math.exp %40 : vector<64x1024xf32>
    %42 = arith.mulf %37, %41 : vector<64x1024xf32>
    %cst_23 = arith.constant 1.000000e+00 : f32
    %43 = vector.broadcast %cst_23 : f32 to vector<64x1024xf32>
    %44 = arith.subf %43, %42 : vector<64x1024xf32>
    %cst_24 = arith.constant 0.000000e+00 : f32
    %45 = vector.broadcast %cst_24 : f32 to vector<64x1024xf32>
    %46 = arith.cmpf olt, %16, %45 : vector<64x1024xf32>
    %cst_25 = arith.constant 0.000000e+00 : f32
    %47 = vector.broadcast %cst_25 : f32 to vector<64x1024xf32>
    %48 = arith.subf %47, %44 : vector<64x1024xf32>
    %49 = arith.select %46, %48, %44 : vector<64x1024xi1>, vector<64x1024xf32>
    %cst_26 = arith.constant 1.000000e+00 : f32
    %50 = vector.broadcast %cst_26 : f32 to vector<64x1024xf32>
    %51 = arith.addf %50, %49 : vector<64x1024xf32>
    %52 = arith.mulf %14, %51 : vector<64x1024xf32>
    %c0_27 = arith.constant 0 : index
    %c0_28 = arith.constant 0 : index
    %53 = vector.load %arg7[%c0_27, %c0_28] : memref<2x64xf32, #tpu.memory_space<vmem>>, vector<2x64xf32>
    %cst_29 = arith.constant dense<0.000000e+00> : vector<2x1024xf32>
    %54 = tpu.matmul %53, %52, %cst_29 {dimension_numbers = #tpu.dot_dimension_numbers<[1], [0], [0], [1], [0, 0, 1, 1], [], []>} : vector<2x64xf32>, vector<64x1024xf32>, vector<2x1024xf32> -> vector<2x1024xf32>
    %c0_30 = arith.constant 0 : index
    %c0_31 = arith.constant 0 : index
    %55 = vector.load %arg8[%c0_30, %c0_31] : memref<2x1xf32, #tpu.memory_space<vmem>>, vector<2x1xf32>
    %56 = vector.broadcast %55 : vector<2x1xf32> to vector<2x1024xf32>
    %57 = arith.addf %54, %56 : vector<2x1024xf32>
    %c0_32 = arith.constant 0 : index
    %c0_33 = arith.constant 0 : index
    %58 = memref.load %arg9[%c0_32, %c0_33] : memref<1x4xf32, #tpu.memory_space<smem>>
    %59 = vector.extract_strided_slice %57 {offsets = [0, 0], sizes = [2, 256], strides = [1, 1]} : vector<2x1024xf32> to vector<2x256xf32>
    %60 = vector.broadcast %58 : f32 to vector<2x256xf32>
    %61 = arith.mulf %60, %59 : vector<2x256xf32>
    %c0_34 = arith.constant 0 : index
    %c1 = arith.constant 1 : index
    %62 = memref.load %arg9[%c0_34, %c1] : memref<1x4xf32, #tpu.memory_space<smem>>
    %63 = vector.extract_strided_slice %57 {offsets = [0, 256], sizes = [2, 256], strides = [1, 1]} : vector<2x1024xf32> to vector<2x256xf32>
    %64 = vector.broadcast %62 : f32 to vector<2x256xf32>
    %65 = arith.mulf %64, %63 : vector<2x256xf32>
    %66 = arith.addf %61, %65 : vector<2x256xf32>
    %c0_35 = arith.constant 0 : index
    %c2 = arith.constant 2 : index
    %67 = memref.load %arg9[%c0_35, %c2] : memref<1x4xf32, #tpu.memory_space<smem>>
    %68 = vector.extract_strided_slice %57 {offsets = [0, 512], sizes = [2, 256], strides = [1, 1]} : vector<2x1024xf32> to vector<2x256xf32>
    %69 = vector.broadcast %67 : f32 to vector<2x256xf32>
    %70 = arith.mulf %69, %68 : vector<2x256xf32>
    %71 = arith.addf %66, %70 : vector<2x256xf32>
    %c0_36 = arith.constant 0 : index
    %c3 = arith.constant 3 : index
    %72 = memref.load %arg9[%c0_36, %c3] : memref<1x4xf32, #tpu.memory_space<smem>>
    %73 = vector.extract_strided_slice %57 {offsets = [0, 768], sizes = [2, 256], strides = [1, 1]} : vector<2x1024xf32> to vector<2x256xf32>
    %74 = vector.broadcast %72 : f32 to vector<2x256xf32>
    %75 = arith.mulf %74, %73 : vector<2x256xf32>
    %76 = arith.addf %71, %75 : vector<2x256xf32>
    %c0_37 = arith.constant 0 : index
    %c0_38 = arith.constant 0 : index
    %77 = vector.load %arg10[%c0_37, %c0_38] : memref<2x256xf32, #tpu.memory_space<vmem>>, vector<2x256xf32>
    tpu.vector_store %arg10[%c0_37, %c0_38], %76 {strides = array<i32>} : memref<2x256xf32, #tpu.memory_space<vmem>>, vector<2x256xf32>,
    return
  }
  func.func @transform_0(%arg0: i32) -> (i32, i32) {
    %c0_i32 = arith.constant 0 : i32
    %c0_i32_0 = arith.constant 0 : i32
    %c0_i32_1 = arith.constant 0 : i32
    return %c0_i32, %c0_i32_0 : i32, i32
  }
  func.func @transform_1(%arg0: i32) -> (i32, i32) {
    %c0_i32 = arith.constant 0 : i32
    %c0_i32_0 = arith.constant 0 : i32
    %c0_i32_1 = arith.constant 0 : i32
    return %c0_i32, %c0_i32_0 : i32, i32
  }
  func.func @transform_2(%arg0: i32) -> (i32, i32) {
    %c0_i32 = arith.constant 0 : i32
    %c0_i32_0 = arith.constant 0 : i32
    %c0_i32_1 = arith.constant 0 : i32
    return %c0_i32, %c0_i32_0 : i32, i32
  }
  func.func @transform_3(%arg0: i32) -> (i32, i32) {
    %c0_i32 = arith.constant 0 : i32
    %c0_i32_0 = arith.constant 0 : i32
    %c0_i32_1 = arith.constant 0 : i32
    return %c0_i32, %c0_i32_0 : i32, i32
  }
  func.func @transform_4(%arg0: i32) -> (i32, i32) {
    %c0_i32 = arith.constant 0 : i32
    %c0_i32_0 = arith.constant 0 : i32
    %c0_i32_1 = arith.constant 0 : i32
    return %c0_i32, %c0_i32_0 : i32, i32
  }
  func.func @transform_5(%arg0: i32) -> (i32, i32) {
    %c0_i32 = arith.constant 0 : i32
    %c0_i32_0 = arith.constant 0 : i32
    %c0_i32_1 = arith.constant 0 : i32
    return %c0_i32, %c0_i32_0 : i32, i32
  }
  func.func @transform_6(%arg0: i32) -> (i32, i32) {
    %c0_i32 = arith.constant 0 : i32
    %c0_i32_0 = arith.constant 0 : i32
    %c0_i32_1 = arith.constant 0 : i32
    return %c0_i32, %c0_i32_0 : i32, i32
  }
  func.func @transform_7(%arg0: i32) -> (i32, i32) {
    %c0_i32 = arith.constant 0 : i32
    %c0_i32_0 = arith.constant 0 : i32
    %c0_i32_1 = arith.constant 0 : i32
    return %c0_i32, %c0_i32_0 : i32, i32
  }
  func.func @transform_8(%arg0: i32) -> (i32, i32) {
    %c0_i32 = arith.constant 0 : i32
    %c0_i32_0 = arith.constant 0 : i32
    %c0_i32_1 = arith.constant 0 : i32
    return %c0_i32, %c0_i32_0 : i32, i32
  }
  func.func @transform_9(%arg0: i32) -> (i32, i32) {
    %c0_i32 = arith.constant 0 : i32
    %c0_i32_0 = arith.constant 0 : i32
    %c0_i32_1 = arith.constant 0 : i32
    return %c0_i32, %c0_i32_0 : i32, i32
  }
}

</mosaic_0001>

<bundles_post_ra>
// kernel: ronn_cell_forward.7
= control target key start
LH: loop header
LB: loop body
LE: loop exit
PB: predicated region body
PF: predicated region fallthrough
CT: control target
= control target key end

     0   :  { %v35_v0 = vlaneseq  ;;  %v865_v3 = vmov 1983009808   ;;  %v866_v5 = vmov 0.0   ;;  %s867_s19 = smov 126   ;;  %vm70_vm0 = vcmask 1041408   ;;  %s1028_s2 = inlined_call_operand.vmem [shape: f32[16,4], index: 2, kind: input, shape index: {}]   ;;  %s1029_s1 = inlined_call_operand.vmem [shape: f32[2,1024], index: 1, kind: input, shape index: {}]   ;;  %s1030_s3 = inlined_call_operand.vmem [shape: f32[16,1], index: 3, kind: input, shape index: {}]   ;;  %s1031_s0 = inlined_call_operand.vmem [shape: f32[2,1024], index: 0, kind: input, shape index: {}]   ;;  %s1032_s4 = inlined_call_operand.vmem [shape: f32[16,1024], index: 4, kind: output, shape index: {}]  }
   0x1   :  { %v897_v1 = vld [vmem:[%s1028_s2] sm:$0xff]  ;;  %v33_v4 = vunpack.c.l.s4 %v865_v3  ;;  %151 = vmatprep.mubr.f32.mxu0 %v866_v5  ;;  %228 = vmatprep.mubr.f32.mxu1 %v866_v5  ;;  %v22_v6 = vld [vmem:[%s1029_s1 + $0x8] sm:$0xff]  ;;  %v868_v21 = vmov 0   ;;  %vm65_vm1 = vcmask 15360  }
   0x2   :  { %v21_v2 = vld [vmem:[%s1029_s1] sm:$0xff]  ;;  %25 = vrot.lane.b32.xlu0 %v897_v1, %s867_s19  ;;  %v36_v7 = vshrl.u32 %v35_v0, 7  ;;  %v911_v8 = vld [vmem:[%s1028_s2 + $0x8] sm:$0xff]  ;;  %v48_v10 = vcombine.high %v22_v6, %v22_v6  ;;  %859 = vset.pattern.permute.xlu1 %v868_v21 }
   0x3   :  { %v34_v9 = vunpack.c.0.s8 %v33_v4  ;;  %v31_v11 = vcombine.high %v21_v2, %v21_v2  ;;  %v759_v22 = vld [vmem:[%s1030_s3] sm:$0xff]  ;;  %860 = vset.pattern.permute.xlu0 %v868_v21  ;;  %v760_v23 = vld [vmem:[%s1030_s3 + $0x8] sm:$0xff] }
   0x4   :  { %763 = vperm.xlu1 %859, %v759_v22   ;;  %v19_v24 = vld [vmem:[%s1031_s0] sm:$0xff]  ;;  %v20_v28 = vld [vmem:[%s1031_s0 + $0x8] sm:$0xff] }
   0x5   :  { %v37_v12 = vsub.s32 %v34_v9, %v36_v7  ;;  %v397_v25 = vcombine.high %v19_v24, %v19_v24  ;;  %v414_v32 = vcombine.high %v20_v28, %v20_v28 }
   0x6   :  { %27 = vrot.lane.b32.xlu0 %v911_v8, %s867_s19 }
   0x7   :  { %v38_v13 = vrot.slane %v21_v2, %v37_v12  ;;  %v55_v14 = vrot.slane %v22_v6, %v37_v12  ;;  %v45_v15 = vrot.slane %v31_v11, %v37_v12  ;;  %v62_v16 = vrot.slane %v48_v10, %v37_v12 }
   0x8   :  { %768 = vperm.xlu1 %859, %v760_v23   ;;  %v404_v26 = vrot.slane %v19_v24, %v37_v12  ;;  %v411_v27 = vrot.slane %v397_v25, %v37_v12  ;;  %v421_v34 = vrot.slane %v20_v28, %v37_v12  ;;  %v428_v35 = vrot.slane %v414_v32, %v37_v12 }
   0x9   :  { %v46_v17 = vcombine.high %v38_v13, %v38_v13  ;;  %v47_v18 = vcombine.high %v45_v15, %v45_v15  ;;  %v63_v19 = vcombine.high %v55_v14, %v55_v14  ;;  %v64_v20 = vcombine.high %v62_v16, %v62_v16 }
   0xa   :  { %v412_v30 = vcombine.high %v404_v26, %v404_v26  ;;  %v413_v31 = vcombine.high %v411_v27, %v411_v27  ;;  %v429_v36 = vcombine.high %v421_v34, %v421_v34  ;;  %v430_v37 = vcombine.high %v428_v35, %v428_v35 }
   0xb   :  { %807 = vmatprep.subr.msk.mxu0 %vm70_vm0, %v46_v17  ;;  %811 = vmatprep.subr.msk.mxu1 %vm70_vm0, %v47_v18 }
   0xc   :  { %808 = vmatpush1.msk.msra.mxu0 %vm70_vm0, %v38_v13  ;;  %812 = vmatpush1.msk.msra.mxu1 %vm70_vm0, %v45_v15 }
   0xd   :  { %815 = vmatprep.subr.msk.mxu0 %vm70_vm0, %v63_v19  ;;  %819 = vmatprep.subr.msk.mxu1 %vm70_vm0, %v64_v20 }
  0x74   :  { %v26_v29 = vpop.permute.xlu0 %25 }
  0x75   :  { %809 = vmatmul.mubr.msk.f32.vlgmr.msra.gmra.mrb[0].mxu0 %vm65_vm1, %v26_v29  ;;  %813 = vmatmul.mubr.msk.f32.vlgmr.msra.gmra.mrb[0].mxu1 %vm65_vm1, %v26_v29 }
  0x76   :  { %816 = vmatpush1.msk.msra.mxu0 %vm70_vm0, %v55_v14  ;;  %820 = vmatpush1.msk.msra.mxu1 %vm70_vm0, %v62_v16 }
  0x77   :  { %157 = vmatprep.mubr.f32.mxu0 %v866_v5  ;;  %234 = vmatprep.mubr.f32.mxu1 %v866_v5 }
  0x78   :  { %v28_v33 = vpop.permute.xlu0 %27  ;;  %823 = vmatprep.subr.msk.mxu0 %vm70_vm0, %v412_v30  ;;  %827 = vmatprep.subr.msk.mxu1 %vm70_vm0, %v413_v31 }
  0x79   :  { %810 = vmatmul.mubr.msk.f32.gmra.mrb[2].mxu0 %vm65_vm1, %v28_v33  ;;  %814 = vmatmul.mubr.msk.f32.gmra.mrb[2].mxu1 %vm65_vm1, %v28_v33 }
  0x7a   :  { %305 = vmatprep.mubr.f32.mxu0 %v866_v5  ;;  %382 = vmatprep.mubr.f32.mxu1 %v866_v5 }
  0x7d   :  { %817 = vmatmul.mubr.msk.f32.vlgmr.msra.gmra.mrb[4].mxu0 %vm65_vm1, %v26_v29  ;;  %821 = vmatmul.mubr.msk.f32.vlgmr.msra.gmra.mrb[4].mxu1 %vm65_vm1, %v26_v29 }
  0x7e   :  { %824 = vmatpush1.msk.msra.mxu0 %vm70_vm0, %v404_v26  ;;  %828 = vmatpush1.msk.msra.mxu1 %vm70_vm0, %v411_v27 }
  0x7f   :  { %311 = vmatprep.mubr.f32.mxu0 %v866_v5  ;;  %388 = vmatprep.mubr.f32.mxu1 %v866_v5 }
  0x80   :  { %831 = vmatprep.subr.msk.mxu0 %vm70_vm0, %v429_v36  ;;  %835 = vmatprep.subr.msk.mxu1 %vm70_vm0, %v430_v37 }
  0x81   :  { %818 = vmatmul.mubr.msk.f32.gmra.mrb[6].mxu0 %vm65_vm1, %v28_v33  ;;  %822 = vmatmul.mubr.msk.f32.gmra.mrb[6].mxu1 %vm65_vm1, %v28_v33 }
  0x82   :  { %515 = vmatprep.mubr.f32.mxu0 %v866_v5  ;;  %592 = vmatprep.mubr.f32.mxu1 %v866_v5 }
  0x83   :  { %v764_v38 = vpop.permute.xlu1 %763 }
  0x85   :  { %825 = vmatmul.mubr.msk.f32.vlgmr.msra.gmra.mrb[0].mxu0 %vm65_vm1, %v897_v1  ;;  %829 = vmatmul.mubr.msk.f32.vlgmr.msra.gmra.mrb[0].mxu1 %vm65_vm1, %v897_v1 }
  0x86   :  { %832 = vmatpush1.msk.msra.mxu0 %vm70_vm0, %v421_v34  ;;  %836 = vmatpush1.msk.msra.mxu1 %vm70_vm0, %v428_v35 }
  0x87   :  { %521 = vmatprep.mubr.f32.mxu0 %v866_v5  ;;  %598 = vmatprep.mubr.f32.mxu1 %v866_v5  ;;  %v769_v47 = vpop.permute.xlu1 %768 }
  0x89   :  { %826 = vmatmul.mubr.msk.f32.gmra.mrb[2].mxu0 %vm65_vm1, %v911_v8  ;;  %830 = vmatmul.mubr.msk.f32.gmra.mrb[2].mxu1 %vm65_vm1, %v911_v8 }
  0x8a   :  { %669 = vmatprep.mubr.f32.mxu0 %v866_v5  ;;  %746 = vmatprep.mubr.f32.mxu1 %v866_v5 }
  0x8d   :  { %833 = vmatmul.mubr.msk.f32.vlgmr.msra.gmra.mrb[4].mxu0 %vm65_vm1, %v897_v1  ;;  %837 = vmatmul.mubr.msk.f32.vlgmr.msra.gmra.mrb[4].mxu1 %vm65_vm1, %v897_v1 }
  0x8e   :  { %675 = vmatprep.mubr.f32.mxu0 %v866_v5  ;;  %752 = vmatprep.mubr.f32.mxu1 %v866_v5 }
  0x91   :  { %834 = vmatmul.mubr.msk.f32.gmra.mrb[6].mxu0 %vm65_vm1, %v911_v8  ;;  %838 = vmatmul.mubr.msk.f32.gmra.mrb[6].mxu1 %vm65_vm1, %v911_v8 }
 0x158   :  { %v517_v39 = vpop.f32.mrb[0].mxu0  ;;  %v594_v40 = vpop.f32.mrb[0].mxu1 }
 0x159   :  { %v771_v41 = vadd.f32 %v764_v38, %v517_v39  ;;  %v773_v42 = vadd.f32 %v764_v38, %v594_v40  ;;  %v519_v43 = vpop.f32.mrb[1].mxu0  ;;  %v596_v44 = vpop.f32.mrb[1].mxu1 }
 0x15a   :  { %v772_v45 = vadd.f32 %v764_v38, %v519_v43  ;;  %v774_v46 = vadd.f32 %v764_v38, %v596_v44 }
 0x15b   :  { %787 = vst [vmem:[%s1032_s4] sm:$0xff] %v771_v41  ;;  %789 = vst [vmem:[%s1032_s4 + $0x10] sm:$0xff] %v773_v42 }
 0x15c   :  { %788 = vst [vmem:[%s1032_s4 + $0x8] sm:$0xff] %v772_v45  ;;  %790 = vst [vmem:[%s1032_s4 + $0x18] sm:$0xff] %v774_v46  ;;  %v523_v48 = vpop.f32.mrb[2].mxu0  ;;  %v600_v49 = vpop.f32.mrb[2].mxu1 }
 0x15d   :  { %v779_v50 = vadd.f32 %v769_v47, %v523_v48  ;;  %v781_v51 = vadd.f32 %v769_v47, %v600_v49  ;;  %v525_v52 = vpop.f32.mrb[3].mxu0  ;;  %v602_v53 = vpop.f32.mrb[3].mxu1 }
 0x15e   :  { %v780_v54 = vadd.f32 %v769_v47, %v525_v52  ;;  %v782_v55 = vadd.f32 %v769_v47, %v602_v53 }
 0x15f   :  { %795 = vst [vmem:[%s1032_s4 + $0x40] sm:$0xff] %v779_v50  ;;  %797 = vst [vmem:[%s1032_s4 + $0x50] sm:$0xff] %v781_v51 }
 0x160   :  { %796 = vst [vmem:[%s1032_s4 + $0x48] sm:$0xff] %v780_v54  ;;  %798 = vst [vmem:[%s1032_s4 + $0x58] sm:$0xff] %v782_v55  ;;  %v671_v56 = vpop.f32.mrb[4].mxu0  ;;  %v748_v57 = vpop.f32.mrb[4].mxu1 }
 0x161   :  { %v775_v58 = vadd.f32 %v764_v38, %v671_v56  ;;  %v777_v59 = vadd.f32 %v764_v38, %v748_v57  ;;  %v673_v60 = vpop.f32.mrb[5].mxu0  ;;  %v750_v61 = vpop.f32.mrb[5].mxu1 }
 0x162   :  { %v776_v62 = vadd.f32 %v764_v38, %v673_v60  ;;  %v778_v63 = vadd.f32 %v764_v38, %v750_v61 }
 0x163   :  { %791 = vst [vmem:[%s1032_s4 + $0x20] sm:$0xff] %v775_v58  ;;  %793 = vst [vmem:[%s1032_s4 + $0x30] sm:$0xff] %v777_v59 }
 0x164   :  { %792 = vst [vmem:[%s1032_s4 + $0x28] sm:$0xff] %v776_v62  ;;  %794 = vst [vmem:[%s1032_s4 + $0x38] sm:$0xff] %v778_v63  ;;  %v677_v0 = vpop.f32.mrb[6].mxu0  ;;  %v754_v1 = vpop.f32.mrb[6].mxu1 }
 0x165   :  { %v783_v2 = vadd.f32 %v769_v47, %v677_v0  ;;  %v785_v3 = vadd.f32 %v769_v47, %v754_v1  ;;  %v679_v4 = vpop.f32.mrb[7].mxu0  ;;  %v756_v5 = vpop.f32.mrb[7].mxu1 }
 0x166   :  { %v784_v6 = vadd.f32 %v769_v47, %v679_v4  ;;  %v786_v7 = vadd.f32 %v769_v47, %v756_v5 }
 0x167   :  { %799 = vst [vmem:[%s1032_s4 + $0x60] sm:$0xff] %v783_v2  ;;  %801 = vst [vmem:[%s1032_s4 + $0x70] sm:$0xff] %v785_v3 }
 0x168   :  { %800 = vst [vmem:[%s1032_s4 + $0x68] sm:$0xff] %v784_v6  ;;  %802 = vst [vmem:[%s1032_s4 + $0x78] sm:$0xff] %v786_v7 }

// kernel: ronn_cell_forward.8
= control target key start
LH: loop header
LB: loop body
LE: loop exit
PB: predicated region body
PF: predicated region fallthrough
CT: control target
= control target key end

     0   :  { %v1330_v0 = vmov 0.0|0.0   ;;  %vm1331_vm0 = vmmov 0   ;;  %v1332_v8 = vmov 0.0   ;;  %s1860_s1 = inlined_call_operand.vmem [shape: f32[8,128,128], index: 1, kind: input, shape index: {}]   ;;  %s1861_s0 = inlined_call_operand.vmem [shape: f32[8,4,128], index: 0, kind: input, shape index: {}]   ;;  %s1862_s2 = inlined_call_operand.vmem [shape: f32[8,4,128], index: 2, kind: output, shape index: {}]  }
   0x1   :  { %1135 = vmatprep.subr.bf16.mxu0 %v1330_v0  ;;  %1159 = vmatprep.subr.bf16.mxu1 %v1330_v0  ;;  %v19_v1 = vld [vmem:[%s1860_s1] sm:$0xff]  ;;  %v20_v2 = vld [vmem:[%s1860_s1 + $0x8] sm:$0xff]  ;;  %v21_v6 = vld [vmem:[%s1860_s1 + $0x10] sm:$0xff] }
   0x2   :  { %v35_v3 = vld [vmem:[%s1860_s1 + $0x80] sm:$0xff]  ;;  %v1136_v4 = vpack.c.bf16 %v20_v2, %v19_v1  ;;  %v36_v5 = vld [vmem:[%s1860_s1 + $0x88] sm:$0xff]  ;;  %v22_v7 = vld [vmem:[%s1860_s1 + $0x18] sm:$0xff]  ;;  %887 = vmatprep.mubr.msk.f32.mxu0 %vm1331_vm0, %v1332_v8  ;;  %922 = vmatprep.mubr.msk.f32.mxu1 %vm1331_vm0, %v1332_v8 }
   0x3   :  { %v1160_v9 = vpack.c.bf16 %v36_v5, %v35_v3  ;;  %v37_v10 = vld [vmem:[%s1860_s1 + $0x90] sm:$0xff]  ;;  %v38_v11 = vld [vmem:[%s1860_s1 + $0x98] sm:$0xff]  ;;  %v1139_v12 = vpack.c.bf16 %v22_v7, %v21_v6  ;;  %v23_v14 = vld [vmem:[%s1860_s1 + $0x20] sm:$0xff] }
   0x4   :  { %1137 = vmatpush3.bf16.msra.mxu0 %v1136_v4  ;;  %v1163_v13 = vpack.c.bf16 %v38_v11, %v37_v10  ;;  %v24_v15 = vld [vmem:[%s1860_s1 + $0x28] sm:$0xff]  ;;  %v39_v16 = vld [vmem:[%s1860_s1 + $0xa0] sm:$0xff]  ;;  %v25_v20 = vld [vmem:[%s1860_s1 + $0x30] sm:$0xff] }
   0x5   :  { %1161 = vmatpush3.bf16.msra.mxu1 %v1160_v9  ;;  %1138 = vmatprep.subr.bf16.mxu0 %v1330_v0  ;;  %v40_v17 = vld [vmem:[%s1860_s1 + $0xa8] sm:$0xff]  ;;  %v1142_v18 = vpack.c.bf16 %v24_v15, %v23_v14  ;;  %v26_v21 = vld [vmem:[%s1860_s1 + $0x38] sm:$0xff]  ;;  %v41_v22 = vld [vmem:[%s1860_s1 + $0xb0] sm:$0xff] }
   0x6   :  { %1162 = vmatprep.subr.bf16.mxu1 %v1330_v0  ;;  %v1166_v19 = vpack.c.bf16 %v40_v17, %v39_v16  ;;  %v42_v23 = vld [vmem:[%s1860_s1 + $0xb8] sm:$0xff]  ;;  %v1145_v24 = vpack.c.bf16 %v26_v21, %v25_v20  ;;  %v27_v26 = vld [vmem:[%s1860_s1 + $0x40] sm:$0xff]  ;;  %v28_v27 = vld [vmem:[%s1860_s1 + $0x48] sm:$0xff] }
   0x7   :  { %v1169_v25 = vpack.c.bf16 %v42_v23, %v41_v22  ;;  %v43_v28 = vld [vmem:[%s1860_s1 + $0xc0] sm:$0xff]  ;;  %v44_v29 = vld [vmem:[%s1860_s1 + $0xc8] sm:$0xff]  ;;  %v1148_v30 = vpack.c.bf16 %v28_v27, %v27_v26  ;;  %v29_v32 = vld [vmem:[%s1860_s1 + $0x50] sm:$0xff] }
   0x8   :  { %1140 = vmatpush3.bf16.msra.mxu0 %v1139_v12  ;;  %v1172_v31 = vpack.c.bf16 %v44_v29, %v43_v28  ;;  %v30_v33 = vld [vmem:[%s1860_s1 + $0x58] sm:$0xff]  ;;  %v45_v34 = vld [vmem:[%s1860_s1 + $0xd0] sm:$0xff]  ;;  %v31_v38 = vld [vmem:[%s1860_s1 + $0x60] sm:$0xff] }
   0x9   :  { %1164 = vmatpush3.bf16.msra.mxu1 %v1163_v13  ;;  %1141 = vmatprep.subr.bf16.mxu0 %v1330_v0  ;;  %v46_v35 = vld [vmem:[%s1860_s1 + $0xd8] sm:$0xff]  ;;  %v1151_v36 = vpack.c.bf16 %v30_v33, %v29_v32  ;;  %v32_v39 = vld [vmem:[%s1860_s1 + $0x68] sm:$0xff]  ;;  %v47_v40 = vld [vmem:[%s1860_s1 + $0xe0] sm:$0xff] }
   0xa   :  { %1165 = vmatprep.subr.bf16.mxu1 %v1330_v0  ;;  %v1175_v37 = vpack.c.bf16 %v46_v35, %v45_v34  ;;  %v48_v41 = vld [vmem:[%s1860_s1 + $0xe8] sm:$0xff]  ;;  %v1154_v42 = vpack.c.bf16 %v32_v39, %v31_v38  ;;  %v33_v44 = vld [vmem:[%s1860_s1 + $0x70] sm:$0xff]  ;;  %v34_v45 = vld [vmem:[%s1860_s1 + $0x78] sm:$0xff] }
   0xb   :  { %v1178_v43 = vpack.c.bf16 %v48_v41, %v47_v40  ;;  %v49_v46 = vld [vmem:[%s1860_s1 + $0xf0] sm:$0xff]  ;;  %v50_v47 = vld [vmem:[%s1860_s1 + $0xf8] sm:$0xff]  ;;  %v1157_v48 = vpack.c.bf16 %v34_v45, %v33_v44  ;;  %v51_v50 = vld [vmem:[%s1860_s1 + $0x100] sm:$0xff] }
   0xc   :  { %1143 = vmatpush3.bf16.msra.mxu0 %v1142_v18  ;;  %v1181_v49 = vpack.c.bf16 %v50_v47, %v49_v46  ;;  %v52_v51 = vld [vmem:[%s1860_s1 + $0x108] sm:$0xff]  ;;  %v67_v52 = vld [vmem:[%s1860_s1 + $0x180] sm:$0xff]  ;;  %v53_v58 = vld [vmem:[%s1860_s1 + $0x110] sm:$0xff] }
   0xd   :  { %1167 = vmatpush3.bf16.msra.mxu1 %v1166_v19  ;;  %1144 = vmatprep.subr.bf16.mxu0 %v1330_v0  ;;  %v68_v53 = vld [vmem:[%s1860_s1 + $0x188] sm:$0xff]  ;;  %v11_v54 = vld [vmem:[%s1861_s0] sm:$0xf]  ;;  %v1184_v55 = vpack.c.bf16 %v52_v51, %v51_v50  ;;  %v12_v56 = vld [vmem:[%s1861_s0 + $0x4] sm:$0xf] }
   0xe   :  { %1168 = vmatprep.subr.bf16.mxu1 %v1330_v0  ;;  %v1208_v57 = vpack.c.bf16 %v68_v53, %v67_v52  ;;  %v54_v59 = vld [vmem:[%s1860_s1 + $0x118] sm:$0xff]  ;;  %v69_v60 = vld [vmem:[%s1860_s1 + $0x190] sm:$0xff]  ;;  %v55_v1 = vld [vmem:[%s1860_s1 + $0x120] sm:$0xff] }
   0xf   :  { %v70_v61 = vld [vmem:[%s1860_s1 + $0x198] sm:$0xff]  ;;  %v1187_v62 = vpack.c.bf16 %v54_v59, %v53_v58  ;;  %v56_v2 = vld [vmem:[%s1860_s1 + $0x128] sm:$0xff]  ;;  %v71_v3 = vld [vmem:[%s1860_s1 + $0x1a0] sm:$0xff] }
  0x10   :  { %1146 = vmatpush3.bf16.msra.mxu0 %v1145_v24  ;;  %v1211_v63 = vpack.c.bf16 %v70_v61, %v69_v60  ;;  %v72_v4 = vld [vmem:[%s1860_s1 + $0x1a8] sm:$0xff]  ;;  %v1190_v5 = vpack.c.bf16 %v56_v2, %v55_v1  ;;  %v57_v7 = vld [vmem:[%s1860_s1 + $0x130] sm:$0xff]  ;;  %v58_v9 = vld [vmem:[%s1860_s1 + $0x138] sm:$0xff] }
  0x11   :  { %1170 = vmatpush3.bf16.msra.mxu1 %v1169_v25  ;;  %1147 = vmatprep.subr.bf16.mxu0 %v1330_v0  ;;  %v1214_v6 = vpack.c.bf16 %v72_v4, %v71_v3  ;;  %v73_v10 = vld [vmem:[%s1860_s1 + $0x1b0] sm:$0xff]  ;;  %v74_v11 = vld [vmem:[%s1860_s1 + $0x1b8] sm:$0xff]  ;;  %v1193_v12 = vpack.c.bf16 %v58_v9, %v57_v7  ;;  %v59_v14 = vld [vmem:[%s1860_s1 + $0x140] sm:$0xff] }
  0x12   :  { %1171 = vmatprep.subr.bf16.mxu1 %v1330_v0  ;;  %v1217_v13 = vpack.c.bf16 %v74_v11, %v73_v10  ;;  %v60_v15 = vld [vmem:[%s1860_s1 + $0x148] sm:$0xff]  ;;  %v75_v16 = vld [vmem:[%s1860_s1 + $0x1c0] sm:$0xff]  ;;  %v61_v20 = vld [vmem:[%s1860_s1 + $0x150] sm:$0xff] }
  0x13   :  { %v76_v17 = vld [vmem:[%s1860_s1 + $0x1c8] sm:$0xff]  ;;  %v1196_v18 = vpack.c.bf16 %v60_v15, %v59_v14  ;;  %v62_v21 = vld [vmem:[%s1860_s1 + $0x158] sm:$0xff]  ;;  %v77_v22 = vld [vmem:[%s1860_s1 + $0x1d0] sm:$0xff] }
  0x14   :  { %1149 = vmatpush3.bf16.msra.mxu0 %v1148_v30  ;;  %v1220_v19 = vpack.c.bf16 %v76_v17, %v75_v16  ;;  %v78_v23 = vld [vmem:[%s1860_s1 + $0x1d8] sm:$0xff]  ;;  %v1199_v24 = vpack.c.bf16 %v62_v21, %v61_v20  ;;  %v63_v26 = vld [vmem:[%s1860_s1 + $0x160] sm:$0xff]  ;;  %v64_v27 = vld [vmem:[%s1860_s1 + $0x168] sm:$0xff] }
  0x15   :  { %1173 = vmatpush3.bf16.msra.mxu1 %v1172_v31  ;;  %1150 = vmatprep.subr.bf16.mxu0 %v1330_v0  ;;  %v1223_v25 = vpack.c.bf16 %v78_v23, %v77_v22  ;;  %v79_v28 = vld [vmem:[%s1860_s1 + $0x1e0] sm:$0xff]  ;;  %v80_v29 = vld [vmem:[%s1860_s1 + $0x1e8] sm:$0xff]  ;;  %v1202_v30 = vpack.c.bf16 %v64_v27, %v63_v26  ;;  %v65_v32 = vld [vmem:[%s1860_s1 + $0x170] sm:$0xff] }
  0x16   :  { %1174 = vmatprep.subr.bf16.mxu1 %v1330_v0  ;;  %v1226_v31 = vpack.c.bf16 %v80_v29, %v79_v28  ;;  %v66_v33 = vld [vmem:[%s1860_s1 + $0x178] sm:$0xff]  ;;  %v81_v34 = vld [vmem:[%s1860_s1 + $0x1f0] sm:$0xff]  ;;  %v83_v38 = vld [vmem:[%s1860_s1 + $0x200] sm:$0xff] }
  0x17   :  { %v82_v35 = vld [vmem:[%s1860_s1 + $0x1f8] sm:$0xff]  ;;  %v84_v39 = vld [vmem:[%s1860_s1 + $0x208] sm:$0xff]  ;;  %v99_v40 = vld [vmem:[%s1860_s1 + $0x280] sm:$0xff] }
  0x18   :  { %1152 = vmatpush3.bf16.msra.mxu0 %v1151_v36  ;;  %v1205_v36 = vpack.c.bf16 %v66_v33, %v65_v32  ;;  %v100_v41 = vld [vmem:[%s1860_s1 + $0x288] sm:$0xff]  ;;  %v85_v46 = vld [vmem:[%s1860_s1 + $0x210] sm:$0xff]  ;;  %v86_v47 = vld [vmem:[%s1860_s1 + $0x218] sm:$0xff] }
  0x19   :  { %1176 = vmatpush3.bf16.msra.mxu1 %v1175_v37  ;;  %1153 = vmatprep.subr.bf16.mxu0 %v1330_v0  ;;  %v1229_v37 = vpack.c.bf16 %v82_v35, %v81_v34  ;;  %v14_v44 = vld [vmem:[%s1861_s0 + $0xc] sm:$0xf]  ;;  %v1256_v45 = vpack.c.bf16 %v100_v41, %v99_v40  ;;  %v1235_v50 = vpack.c.bf16 %v86_v47, %v85_v46  ;;  %v87_v52 = vld [vmem:[%s1860_s1 + $0x220] sm:$0xff]  ;;  %v89_v58 = vld [vmem:[%s1860_s1 + $0x230] sm:$0xff] }
  0x1a   :  { %1177 = vmatprep.subr.bf16.mxu1 %v1330_v0  ;;  %v88_v53 = vld [vmem:[%s1860_s1 + $0x228] sm:$0xff]  ;;  %v90_v59 = vld [vmem:[%s1860_s1 + $0x238] sm:$0xff]  ;;  %v105_v60 = vld [vmem:[%s1860_s1 + $0x2b0] sm:$0xff] }
  0x1b   :  { %v106_v61 = vld [vmem:[%s1860_s1 + $0x2b8] sm:$0xff]  ;;  %v91_v1 = vld [vmem:[%s1860_s1 + $0x240] sm:$0xff]  ;;  %v92_v2 = vld [vmem:[%s1860_s1 + $0x248] sm:$0xff] }
  0x1c   :  { %1155 = vmatpush3.bf16.msra.mxu0 %v1154_v42  ;;  %v13_v42 = vld [vmem:[%s1861_s0 + $0x8] sm:$0xf]  ;;  %v107_v3 = vld [vmem:[%s1860_s1 + $0x2c0] sm:$0xff]  ;;  %v93_v7 = vld [vmem:[%s1860_s1 + $0x250] sm:$0xff] }
  0x1d   :  { %1179 = vmatpush3.bf16.msra.mxu1 %v1178_v43  ;;  %1156 = vmatprep.subr.bf16.mxu0 %v1330_v0  ;;  %v1232_v43 = vpack.c.bf16 %v84_v39, %v83_v38  ;;  %v108_v4 = vld [vmem:[%s1860_s1 + $0x2c8] sm:$0xff]  ;;  %v94_v9 = vld [vmem:[%s1860_s1 + $0x258] sm:$0xff]  ;;  %v109_v10 = vld [vmem:[%s1860_s1 + $0x2d0] sm:$0xff] }
  0x1e   :  { %1180 = vmatprep.subr.bf16.mxu1 %v1330_v0  ;;  %v110_v11 = vld [vmem:[%s1860_s1 + $0x2d8] sm:$0xff]  ;;  %v95_v14 = vld [vmem:[%s1860_s1 + $0x260] sm:$0xff]  ;;  %v96_v15 = vld [vmem:[%s1860_s1 + $0x268] sm:$0xff] }
  0x1f   :  { %v111_v16 = vld [vmem:[%s1860_s1 + $0x2e0] sm:$0xff]  ;;  %v112_v17 = vld [vmem:[%s1860_s1 + $0x2e8] sm:$0xff]  ;;  %v97_v20 = vld [vmem:[%s1860_s1 + $0x270] sm:$0xff] }
  0x20   :  { %1158 = vmatpush3.bf16.msra.mxu0 %v1157_v48  ;;  %v101_v48 = vld [vmem:[%s1860_s1 + $0x290] sm:$0xff]  ;;  %v98_v21 = vld [vmem:[%s1860_s1 + $0x278] sm:$0xff]  ;;  %v115_v26 = vld [vmem:[%s1860_s1 + $0x300] sm:$0xff] }
  0x21   :  { %1182 = vmatpush3.bf16.msra.mxu1 %v1181_v49  ;;  %1183 = vmatprep.subr.bf16.mxu0 %v1330_v0  ;;  %v102_v49 = vld [vmem:[%s1860_s1 + $0x298] sm:$0xff]  ;;  %v113_v22 = vld [vmem:[%s1860_s1 + $0x2f0] sm:$0xff]  ;;  %v116_v27 = vld [vmem:[%s1860_s1 + $0x308] sm:$0xff] }
  0x22   :  { %1207 = vmatprep.subr.bf16.mxu1 %v1330_v0  ;;  %v1259_v51 = vpack.c.bf16 %v102_v49, %v101_v48  ;;  %v114_v23 = vld [vmem:[%s1860_s1 + $0x2f8] sm:$0xff]  ;;  %v131_v28 = vld [vmem:[%s1860_s1 + $0x380] sm:$0xff]  ;;  %v132_v29 = vld [vmem:[%s1860_s1 + $0x388] sm:$0xff] }
  0x23   :  { %888 = vmatmul.mubr.f32.vlgmr.msra.gmra.mrb[0].mxu0 %v11_v54  ;;  %v103_v54 = vld [vmem:[%s1860_s1 + $0x2a0] sm:$0xff]  ;;  %v16_v32 = vld [vmem:[%s1861_s0 + $0x14] sm:$0xf]  ;;  %v1304_v33 = vpack.c.bf16 %v132_v29, %v131_v28  ;;  %v118_v35 = vld [vmem:[%s1860_s1 + $0x318] sm:$0xff] }
  0x24   :  { %923 = vmatmul.mubr.f32.vlgmr.msra.gmra.mrb[0].mxu1 %v12_v56  ;;  %1185 = vmatpush3.bf16.msra.mxu0 %v1184_v55  ;;  %v104_v55 = vld [vmem:[%s1860_s1 + $0x2a8] sm:$0xff]  ;;  %v1238_v56 = vpack.c.bf16 %v88_v53, %v87_v52  ;;  %v117_v34 = vld [vmem:[%s1860_s1 + $0x310] sm:$0xff]  ;;  %v119_v40 = vld [vmem:[%s1860_s1 + $0x320] sm:$0xff] }
  0x25   :  { %1209 = vmatpush3.bf16.msra.mxu1 %v1208_v57  ;;  %1186 = vmatprep.subr.bf16.mxu0 %v1330_v0  ;;  %v1262_v57 = vpack.c.bf16 %v104_v55, %v103_v54  ;;  %v1283_v38 = vpack.c.bf16 %v118_v35, %v117_v34  ;;  %v120_v41 = vld [vmem:[%s1860_s1 + $0x328] sm:$0xff]  ;;  %v121_v46 = vld [vmem:[%s1860_s1 + $0x330] sm:$0xff]  ;;  %v122_v47 = vld [vmem:[%s1860_s1 + $0x338] sm:$0xff] }
  0x26   :  { %1210 = vmatprep.subr.bf16.mxu1 %v1330_v0  ;;  %957 = vmatprep.mubr.msk.f32.mxu0 %vm1331_vm0, %v1332_v8  ;;  %v138_v48 = vld [vmem:[%s1860_s1 + $0x3b8] sm:$0xff]  ;;  %v1289_v49 = vpack.c.bf16 %v122_v47, %v121_v46  ;;  %v124_v52 = vld [vmem:[%s1860_s1 + $0x348] sm:$0xff]  ;;  %v139_v53 = vld [vmem:[%s1860_s1 + $0x3c0] sm:$0xff] }
  0x27   :  { %992 = vmatprep.mubr.msk.f32.mxu1 %vm1331_vm0, %v1332_v8  ;;  %v140_v54 = vld [vmem:[%s1860_s1 + $0x3c8] sm:$0xff] }
  0x28   :  { %1188 = vmatpush3.bf16.msra.mxu0 %v1187_v62  ;;  %v1241_v62 = vpack.c.bf16 %v90_v59, %v89_v58  ;;  %v126_v58 = vld [vmem:[%s1860_s1 + $0x358] sm:$0xff]  ;;  %v141_v59 = vld [vmem:[%s1860_s1 + $0x3d0] sm:$0xff] }
  0x29   :  { %1212 = vmatpush3.bf16.msra.mxu1 %v1211_v63  ;;  %1189 = vmatprep.subr.bf16.mxu0 %v1330_v0  ;;  %v1265_v63 = vpack.c.bf16 %v106_v61, %v105_v60  ;;  %v142_v60 = vld [vmem:[%s1860_s1 + $0x3d8] sm:$0xff] }
  0x2a   :  { %1213 = vmatprep.subr.bf16.mxu1 %v1330_v0 }
  0x2c   :  { %1191 = vmatpush3.bf16.msra.mxu0 %v1190_v5  ;;  %v1244_v5 = vpack.c.bf16 %v92_v2, %v91_v1  ;;  %v128_v1 = vld [vmem:[%s1860_s1 + $0x368] sm:$0xff]  ;;  %v143_v2 = vld [vmem:[%s1860_s1 + $0x3e0] sm:$0xff] }
  0x2d   :  { %1215 = vmatpush3.bf16.msra.mxu1 %v1214_v6  ;;  %1192 = vmatprep.subr.bf16.mxu0 %v1330_v0  ;;  %v1268_v6 = vpack.c.bf16 %v108_v4, %v107_v3  ;;  %v144_v3 = vld [vmem:[%s1860_s1 + $0x3e8] sm:$0xff] }
  0x2e   :  { %1216 = vmatprep.subr.bf16.mxu1 %v1330_v0 }
  0x30   :  { %1194 = vmatpush3.bf16.msra.mxu0 %v1193_v12  ;;  %v1247_v12 = vpack.c.bf16 %v94_v9, %v93_v7  ;;  %v130_v7 = vld [vmem:[%s1860_s1 + $0x378] sm:$0xff]  ;;  %v145_v9 = vld [vmem:[%s1860_s1 + $0x3f0] sm:$0xff] }
  0x31   :  { %1218 = vmatpush3.bf16.msra.mxu1 %v1217_v13  ;;  %1195 = vmatprep.subr.bf16.mxu0 %v1330_v0  ;;  %v1271_v13 = vpack.c.bf16 %v110_v11, %v109_v10  ;;  %v146_v10 = vld [vmem:[%s1860_s1 + $0x3f8] sm:$0xff] }
  0x32   :  { %1219 = vmatprep.subr.bf16.mxu1 %v1330_v0 }
  0x34   :  { %1197 = vmatpush3.bf16.msra.mxu0 %v1196_v18  ;;  %v1250_v18 = vpack.c.bf16 %v96_v15, %v95_v14  ;;  %v18_v14 = vld [vmem:[%s1861_s0 + $0x1c] sm:$0xf] }
  0x35   :  { %1221 = vmatpush3.bf16.msra.mxu1 %v1220_v19  ;;  %1198 = vmatprep.subr.bf16.mxu0 %v1330_v0  ;;  %v1274_v19 = vpack.c.bf16 %v112_v17, %v111_v16 }
  0x36   :  { %1222 = vmatprep.subr.bf16.mxu1 %v1330_v0 }
  0x38   :  { %1200 = vmatpush3.bf16.msra.mxu0 %v1199_v24  ;;  %v1253_v24 = vpack.c.bf16 %v98_v21, %v97_v20 }
  0x39   :  { %1224 = vmatpush3.bf16.msra.mxu1 %v1223_v25  ;;  %1201 = vmatprep.subr.bf16.mxu0 %v1330_v0  ;;  %v1277_v25 = vpack.c.bf16 %v114_v23, %v113_v22 }
  0x3a   :  { %1225 = vmatprep.subr.bf16.mxu1 %v1330_v0 }
  0x3c   :  { %1203 = vmatpush3.bf16.msra.mxu0 %v1202_v30  ;;  %v15_v30 = vld [vmem:[%s1861_s0 + $0x10] sm:$0xf] }
  0x3d   :  { %1227 = vmatpush3.bf16.msra.mxu1 %v1226_v31  ;;  %1204 = vmatprep.subr.bf16.mxu0 %v1330_v0  ;;  %v1280_v31 = vpack.c.bf16 %v116_v27, %v115_v26 }
  0x3e   :  { %1228 = vmatprep.subr.bf16.mxu1 %v1330_v0 }
  0x40   :  { %1206 = vmatpush3.bf16.msra.mxu0 %v1205_v36  ;;  %v133_v36 = vld [vmem:[%s1860_s1 + $0x390] sm:$0xff] }
  0x41   :  { %1230 = vmatpush3.bf16.msra.mxu1 %v1229_v37  ;;  %1231 = vmatprep.subr.bf16.mxu0 %v1330_v0  ;;  %v134_v37 = vld [vmem:[%s1860_s1 + $0x398] sm:$0xff] }
  0x42   :  { %1255 = vmatprep.subr.bf16.mxu1 %v1330_v0  ;;  %v1307_v39 = vpack.c.bf16 %v134_v37, %v133_v36 }
  0x43   :  { %958 = vmatmul.mubr.f32.vlgmr.msra.gmra.mrb[2].mxu0 %v13_v42  ;;  %v135_v42 = vld [vmem:[%s1860_s1 + $0x3a0] sm:$0xff] }
  0x44   :  { %993 = vmatmul.mubr.f32.vlgmr.msra.gmra.mrb[2].mxu1 %v14_v44  ;;  %1233 = vmatpush3.bf16.msra.mxu0 %v1232_v43  ;;  %v136_v43 = vld [vmem:[%s1860_s1 + $0x3a8] sm:$0xff]  ;;  %v1286_v44 = vpack.c.bf16 %v120_v41, %v119_v40 }
  0x45   :  { %1257 = vmatpush3.bf16.msra.mxu1 %v1256_v45  ;;  %1234 = vmatprep.subr.bf16.mxu0 %v1330_v0  ;;  %v1310_v45 = vpack.c.bf16 %v136_v43, %v135_v42 }
  0x46   :  { %1258 = vmatprep.subr.bf16.mxu1 %v1330_v0  ;;  %1027 = vmatprep.mubr.msk.f32.mxu0 %vm1331_vm0, %v1332_v8 }
  0x47   :  { %1062 = vmatprep.mubr.msk.f32.mxu1 %vm1331_vm0, %v1332_v8 }
  0x48   :  { %1236 = vmatpush3.bf16.msra.mxu0 %v1235_v50 }
  0x49   :  { %1260 = vmatpush3.bf16.msra.mxu1 %v1259_v51  ;;  %1237 = vmatprep.subr.bf16.mxu0 %v1330_v0  ;;  %v123_v51 = vld [vmem:[%s1860_s1 + $0x340] sm:$0xff] }
  0x4a   :  { %1261 = vmatprep.subr.bf16.mxu1 %v1330_v0  ;;  %v1292_v55 = vpack.c.bf16 %v124_v52, %v123_v51 }
  0x4c   :  { %1239 = vmatpush3.bf16.msra.mxu0 %v1238_v56  ;;  %v1316_v56 = vpack.c.bf16 %v140_v54, %v139_v53 }
  0x4d   :  { %1263 = vmatpush3.bf16.msra.mxu1 %v1262_v57  ;;  %1240 = vmatprep.subr.bf16.mxu0 %v1330_v0  ;;  %v125_v57 = vld [vmem:[%s1860_s1 + $0x350] sm:$0xff] }
  0x4e   :  { %1264 = vmatprep.subr.bf16.mxu1 %v1330_v0  ;;  %v1295_v61 = vpack.c.bf16 %v126_v58, %v125_v57 }
  0x50   :  { %1242 = vmatpush3.bf16.msra.mxu0 %v1241_v62  ;;  %v1319_v62 = vpack.c.bf16 %v142_v60, %v141_v59 }
  0x51   :  { %1266 = vmatpush3.bf16.msra.mxu1 %v1265_v63  ;;  %1243 = vmatprep.subr.bf16.mxu0 %v1330_v0  ;;  %v127_v63 = vld [vmem:[%s1860_s1 + $0x360] sm:$0xff] }
  0x52   :  { %1267 = vmatprep.subr.bf16.mxu1 %v1330_v0  ;;  %v1298_v4 = vpack.c.bf16 %v128_v1, %v127_v63 }
  0x54   :  { %1245 = vmatpush3.bf16.msra.mxu0 %v1244_v5  ;;  %v1322_v5 = vpack.c.bf16 %v144_v3, %v143_v2 }
  0x55   :  { %1269 = vmatpush3.bf16.msra.mxu1 %v1268_v6  ;;  %1246 = vmatprep.subr.bf16.mxu0 %v1330_v0  ;;  %v129_v6 = vld [vmem:[%s1860_s1 + $0x370] sm:$0xff] }
  0x56   :  { %1270 = vmatprep.subr.bf16.mxu1 %v1330_v0  ;;  %v1301_v11 = vpack.c.bf16 %v130_v7, %v129_v6 }
  0x58   :  { %1248 = vmatpush3.bf16.msra.mxu0 %v1247_v12  ;;  %v1325_v12 = vpack.c.bf16 %v146_v10, %v145_v9 }
  0x59   :  { %1272 = vmatpush3.bf16.msra.mxu1 %v1271_v13  ;;  %1249 = vmatprep.subr.bf16.mxu0 %v1330_v0  ;;  %v17_v13 = vld [vmem:[%s1861_s0 + $0x18] sm:$0xf] }
  0x5a   :  { %1273 = vmatprep.subr.bf16.mxu1 %v1330_v0 }
  0x5c   :  { %1251 = vmatpush3.bf16.msra.mxu0 %v1250_v18 }
  0x5d   :  { %1275 = vmatpush3.bf16.msra.mxu1 %v1274_v19  ;;  %1252 = vmatprep.subr.bf16.mxu0 %v1330_v0 }
  0x5e   :  { %1276 = vmatprep.subr.bf16.mxu1 %v1330_v0 }
  0x60   :  { %1254 = vmatpush3.bf16.msra.mxu0 %v1253_v24 }
  0x61   :  { %1278 = vmatpush3.bf16.msra.mxu1 %v1277_v25  ;;  %1279 = vmatprep.subr.bf16.mxu0 %v1330_v0 }
  0x62   :  { %1303 = vmatprep.subr.bf16.mxu1 %v1330_v0 }
  0x63   :  { %1028 = vmatmul.mubr.f32.vlgmr.msra.gmra.mrb[4].mxu0 %v15_v30 }
  0x64   :  { %1063 = vmatmul.mubr.f32.vlgmr.msra.gmra.mrb[4].mxu1 %v16_v32  ;;  %1281 = vmatpush3.bf16.msra.mxu0 %v1280_v31 }
  0x65   :  { %1305 = vmatpush3.bf16.msra.mxu1 %v1304_v33  ;;  %1282 = vmatprep.subr.bf16.mxu0 %v1330_v0 }
  0x66   :  { %1306 = vmatprep.subr.bf16.mxu1 %v1330_v0  ;;  %1097 = vmatprep.mubr.msk.f32.mxu0 %vm1331_vm0, %v1332_v8 }
  0x67   :  { %1132 = vmatprep.mubr.msk.f32.mxu1 %vm1331_vm0, %v1332_v8  ;;  %v137_v8 = vld [vmem:[%s1860_s1 + $0x3b0] sm:$0xff] }
  0x68   :  { %1284 = vmatpush3.bf16.msra.mxu0 %v1283_v38  ;;  %v1313_v50 = vpack.c.bf16 %v138_v48, %v137_v8 }
  0x69   :  { %1308 = vmatpush3.bf16.msra.mxu1 %v1307_v39  ;;  %1285 = vmatprep.subr.bf16.mxu0 %v1330_v0 }
  0x6a   :  { %1309 = vmatprep.subr.bf16.mxu1 %v1330_v0 }
  0x6c   :  { %1287 = vmatpush3.bf16.msra.mxu0 %v1286_v44 }
  0x6d   :  { %1311 = vmatpush3.bf16.msra.mxu1 %v1310_v45  ;;  %1288 = vmatprep.subr.bf16.mxu0 %v1330_v0 }
  0x6e   :  { %1312 = vmatprep.subr.bf16.mxu1 %v1330_v0 }
  0x70   :  { %1290 = vmatpush3.bf16.msra.mxu0 %v1289_v49 }
  0x71   :  { %1314 = vmatpush3.bf16.msra.mxu1 %v1313_v50  ;;  %1291 = vmatprep.subr.bf16.mxu0 %v1330_v0 }
  0x72   :  { %1315 = vmatprep.subr.bf16.mxu1 %v1330_v0 }
  0x74   :  { %1293 = vmatpush3.bf16.msra.mxu0 %v1292_v55 }
  0x75   :  { %1317 = vmatpush3.bf16.msra.mxu1 %v1316_v56  ;;  %1294 = vmatprep.subr.bf16.mxu0 %v1330_v0 }
  0x76   :  { %1318 = vmatprep.subr.bf16.mxu1 %v1330_v0 }
  0x78   :  { %1296 = vmatpush3.bf16.msra.mxu0 %v1295_v61 }
  0x79   :  { %1320 = vmatpush3.bf16.msra.mxu1 %v1319_v62  ;;  %1297 = vmatprep.subr.bf16.mxu0 %v1330_v0 }
  0x7a   :  { %1321 = vmatprep.subr.bf16.mxu1 %v1330_v0 }
  0x7c   :  { %1299 = vmatpush3.bf16.msra.mxu0 %v1298_v4 }
  0x7d   :  { %1323 = vmatpush3.bf16.msra.mxu1 %v1322_v5  ;;  %1300 = vmatprep.subr.bf16.mxu0 %v1330_v0 }
  0x7e   :  { %1324 = vmatprep.subr.bf16.mxu1 %v1330_v0 }
  0x80   :  { %1302 = vmatpush3.bf16.msra.mxu0 %v1301_v11 }
  0x81   :  { %1326 = vmatpush3.bf16.msra.mxu1 %v1325_v12 }
  0x83   :  { %1098 = vmatmul.mubr.f32.vlgmr.msra.gmra.mrb[6].mxu0 %v17_v13 }
  0x84   :  { %1133 = vmatmul.mubr.f32.vlgmr.msra.gmra.mrb[6].mxu1 %v18_v14 }
  0xf6   :  { %v213_v15 = vpop.f32.mrb[0].mxu0 }
  0xf7   :  { %707 = vst [vmem:[%s1862_s2] sm:$0xf] %v213_v15  ;;  %v283_v16 = vpop.f32.mrb[0].mxu1  ;;  %v889_v17 = vpop.f32.mrb[1].mxu0 }
  0xf8   :  { %708 = vst [vmem:[%s1862_s2 + $0x4] sm:$0xf] %v283_v16  ;;  %v924_v0 = vpop.f32.mrb[1].mxu1 }
 0x116   :  { %v353_v18 = vpop.f32.mrb[2].mxu0 }
 0x117   :  { %709 = vst [vmem:[%s1862_s2 + $0x8] sm:$0xf] %v353_v18  ;;  %v423_v19 = vpop.f32.mrb[2].mxu1  ;;  %v959_v20 = vpop.f32.mrb[3].mxu0 }
 0x118   :  { %710 = vst [vmem:[%s1862_s2 + $0xc] sm:$0xf] %v423_v19  ;;  %v994_v21 = vpop.f32.mrb[3].mxu1 }
 0x136   :  { %v493_v22 = vpop.f32.mrb[4].mxu0 }
 0x137   :  { %711 = vst [vmem:[%s1862_s2 + $0x10] sm:$0xf] %v493_v22  ;;  %v563_v23 = vpop.f32.mrb[4].mxu1  ;;  %v1029_v24 = vpop.f32.mrb[5].mxu0 }
 0x138   :  { %712 = vst [vmem:[%s1862_s2 + $0x14] sm:$0xf] %v563_v23  ;;  %v1064_v25 = vpop.f32.mrb[5].mxu1 }
 0x156   :  { %v633_v26 = vpop.f32.mrb[6].mxu0 }
 0x157   :  { %713 = vst [vmem:[%s1862_s2 + $0x18] sm:$0xf] %v633_v26  ;;  %v703_v27 = vpop.f32.mrb[6].mxu1  ;;  %v1099_v28 = vpop.f32.mrb[7].mxu0 }
 0x158   :  { %714 = vst [vmem:[%s1862_s2 + $0x1c] sm:$0xf] %v703_v27  ;;  %v1134_v29 = vpop.f32.mrb[7].mxu1 }

// kernel: reverse.6
= control target key start
LH: loop header
LB: loop body
LE: loop exit
PB: predicated region body
PF: predicated region fallthrough
CT: control target
= control target key end

     0   :  { %s680_s0 = inlined_call_operand.vmem [shape: f32[16,4,16,7], index: 0, kind: input, shape index: {}]   ;;  %s681_s1 = inlined_call_operand.vmem [shape: f32[16,4,16,7], index: 1, kind: output, shape index: {}]  }
   0x1   :  { %v224_v0 = vld [vmem:[%s680_s0 + $0x60] sm:$0xff]  ;;  %v225_v1 = vld [vmem:[%s680_s0 + $0xd0] sm:$0xff]  ;;  %v278_v28 = vld [vmem:[%s680_s0 + $0x68] sm:$0xff] }
   0x2   :  { %v227_v2 = vld [vmem:[%s680_s0 + $0x140] sm:$0xff]  ;;  %4 = vst [vmem:[%s681_s1] sm:$0xff] %v224_v0  ;;  %226 = vst [vmem:[%s681_s1 + $0x70] sm:$0xff] %v225_v1  ;;  %v229_v3 = vld [vmem:[%s680_s0 + $0x1b0] sm:$0xff] }
   0x3   :  { %228 = vst [vmem:[%s681_s1 + $0xe0] sm:$0xff] %v227_v2  ;;  %v231_v4 = vld [vmem:[%s680_s0 + $0x50] sm:$0xff]  ;;  %v233_v5 = vld [vmem:[%s680_s0 + $0xc0] sm:$0xff]  ;;  %230 = vst [vmem:[%s681_s1 + $0x150] sm:$0xff] %v229_v3 }
   0x4   :  { %232 = vst [vmem:[%s681_s1 + $0x10] sm:$0xff] %v231_v4  ;;  %234 = vst [vmem:[%s681_s1 + $0x80] sm:$0xff] %v233_v5  ;;  %v235_v6 = vld [vmem:[%s680_s0 + $0x130] sm:$0xff]  ;;  %v237_v7 = vld [vmem:[%s680_s0 + $0x1a0] sm:$0xff] }
   0x5   :  { %v239_v8 = vld [vmem:[%s680_s0 + $0x40] sm:$0xff]  ;;  %236 = vst [vmem:[%s681_s1 + $0xf0] sm:$0xff] %v235_v6  ;;  %238 = vst [vmem:[%s681_s1 + $0x160] sm:$0xff] %v237_v7  ;;  %v241_v9 = vld [vmem:[%s680_s0 + $0xb0] sm:$0xff] }
   0x6   :  { %240 = vst [vmem:[%s681_s1 + $0x20] sm:$0xff] %v239_v8  ;;  %v243_v10 = vld [vmem:[%s680_s0 + $0x120] sm:$0xff]  ;;  %v245_v11 = vld [vmem:[%s680_s0 + $0x190] sm:$0xff]  ;;  %242 = vst [vmem:[%s681_s1 + $0x90] sm:$0xff] %v241_v9 }
   0x7   :  { %244 = vst [vmem:[%s681_s1 + $0x100] sm:$0xff] %v243_v10  ;;  %246 = vst [vmem:[%s681_s1 + $0x170] sm:$0xff] %v245_v11  ;;  %v247_v12 = vld [vmem:[%s680_s0 + $0x30] sm:$0xff]  ;;  %v249_v13 = vld [vmem:[%s680_s0 + $0xa0] sm:$0xff] }
   0x8   :  { %v251_v14 = vld [vmem:[%s680_s0 + $0x110] sm:$0xff]  ;;  %248 = vst [vmem:[%s681_s1 + $0x30] sm:$0xff] %v247_v12  ;;  %250 = vst [vmem:[%s681_s1 + $0xa0] sm:$0xff] %v249_v13  ;;  %v253_v15 = vld [vmem:[%s680_s0 + $0x180] sm:$0xff] }
   0x9   :  { %252 = vst [vmem:[%s681_s1 + $0x110] sm:$0xff] %v251_v14  ;;  %v255_v16 = vld [vmem:[%s680_s0 + $0x20] sm:$0xff]  ;;  %v257_v17 = vld [vmem:[%s680_s0 + $0x90] sm:$0xff]  ;;  %254 = vst [vmem:[%s681_s1 + $0x180] sm:$0xff] %v253_v15 }
   0xa   :  { %256 = vst [vmem:[%s681_s1 + $0x40] sm:$0xff] %v255_v16  ;;  %258 = vst [vmem:[%s681_s1 + $0xb0] sm:$0xff] %v257_v17  ;;  %v259_v18 = vld [vmem:[%s680_s0 + $0x100] sm:$0xff]  ;;  %v261_v19 = vld [vmem:[%s680_s0 + $0x170] sm:$0xff] }
   0xb   :  { %v263_v20 = vld [vmem:[%s680_s0 + $0x10] sm:$0xff]  ;;  %260 = vst [vmem:[%s681_s1 + $0x120] sm:$0xff] %v259_v18  ;;  %262 = vst [vmem:[%s681_s1 + $0x190] sm:$0xff] %v261_v19  ;;  %v265_v21 = vld [vmem:[%s680_s0 + $0x80] sm:$0xff] }
   0xc   :  { %264 = vst [vmem:[%s681_s1 + $0x50] sm:$0xff] %v263_v20  ;;  %v267_v22 = vld [vmem:[%s680_s0 + $0xf0] sm:$0xff]  ;;  %v269_v23 = vld [vmem:[%s680_s0 + $0x160] sm:$0xff]  ;;  %266 = vst [vmem:[%s681_s1 + $0xc0] sm:$0xff] %v265_v21 }
   0xd   :  { %268 = vst [vmem:[%s681_s1 + $0x130] sm:$0xff] %v267_v22  ;;  %270 = vst [vmem:[%s681_s1 + $0x1a0] sm:$0xff] %v269_v23  ;;  %v97_v24 = vld [vmem:[%s680_s0] sm:$0xff]  ;;  %v272_v25 = vld [vmem:[%s680_s0 + $0x70] sm:$0xff] }
   0xe   :  { %v274_v26 = vld [vmem:[%s680_s0 + $0xe0] sm:$0xff]  ;;  %271 = vst [vmem:[%s681_s1 + $0x60] sm:$0xff] %v97_v24  ;;  %273 = vst [vmem:[%s681_s1 + $0xd0] sm:$0xff] %v272_v25  ;;  %v276_v27 = vld [vmem:[%s680_s0 + $0x150] sm:$0xff] }
   0xf   :  { %275 = vst [vmem:[%s681_s1 + $0x140] sm:$0xff] %v274_v26  ;;  %v280_v29 = vld [vmem:[%s680_s0 + $0xd8] sm:$0xff]  ;;  %277 = vst [vmem:[%s681_s1 + $0x1b0] sm:$0xff] %v276_v27  ;;  %v282_v30 = vld [vmem:[%s680_s0 + $0x148] sm:$0xff] }
  0x10   :  { %279 = vst [vmem:[%s681_s1 + $0x8] sm:$0xff] %v278_v28  ;;  %281 = vst [vmem:[%s681_s1 + $0x78] sm:$0xff] %v280_v29  ;;  %v284_v31 = vld [vmem:[%s680_s0 + $0x1b8] sm:$0xff]  ;;  %v288_v33 = vld [vmem:[%s680_s0 + $0xc8] sm:$0xff] }
  0x11   :  { %v286_v32 = vld [vmem:[%s680_s0 + $0x58] sm:$0xff]  ;;  %283 = vst [vmem:[%s681_s1 + $0xe8] sm:$0xff] %v282_v30  ;;  %285 = vst [vmem:[%s681_s1 + $0x158] sm:$0xff] %v284_v31  ;;  %v292_v35 = vld [vmem:[%s680_s0 + $0x1a8] sm:$0xff] }
  0x12   :  { %287 = vst [vmem:[%s681_s1 + $0x18] sm:$0xff] %v286_v32  ;;  %v290_v34 = vld [vmem:[%s680_s0 + $0x138] sm:$0xff]  ;;  %289 = vst [vmem:[%s681_s1 + $0x88] sm:$0xff] %v288_v33  ;;  %v294_v36 = vld [vmem:[%s680_s0 + $0x48] sm:$0xff] }
  0x13   :  { %291 = vst [vmem:[%s681_s1 + $0xf8] sm:$0xff] %v290_v34  ;;  %293 = vst [vmem:[%s681_s1 + $0x168] sm:$0xff] %v292_v35  ;;  %v296_v37 = vld [vmem:[%s680_s0 + $0xb8] sm:$0xff]  ;;  %v298_v38 = vld [vmem:[%s680_s0 + $0x128] sm:$0xff] }
  0x14   :  { %295 = vst [vmem:[%s681_s1 + $0x28] sm:$0xff] %v294_v36  ;;  %297 = vst [vmem:[%s681_s1 + $0x98] sm:$0xff] %v296_v37  ;;  %v300_v39 = vld [vmem:[%s680_s0 + $0x198] sm:$0xff]  ;;  %v304_v41 = vld [vmem:[%s680_s0 + $0xa8] sm:$0xff] }
  0x15   :  { %299 = vst [vmem:[%s681_s1 + $0x108] sm:$0xff] %v298_v38  ;;  %v302_v40 = vld [vmem:[%s680_s0 + $0x38] sm:$0xff]  ;;  %301 = vst [vmem:[%s681_s1 + $0x178] sm:$0xff] %v300_v39  ;;  %v308_v43 = vld [vmem:[%s680_s0 + $0x188] sm:$0xff] }
  0x16   :  { %303 = vst [vmem:[%s681_s1 + $0x38] sm:$0xff] %v302_v40  ;;  %305 = vst [vmem:[%s681_s1 + $0xa8] sm:$0xff] %v304_v41  ;;  %v306_v42 = vld [vmem:[%s680_s0 + $0x118] sm:$0xff]  ;;  %v310_v44 = vld [vmem:[%s680_s0 + $0x28] sm:$0xff] }
  0x17   :  { %307 = vst [vmem:[%s681_s1 + $0x118] sm:$0xff] %v306_v42  ;;  %309 = vst [vmem:[%s681_s1 + $0x188] sm:$0xff] %v308_v43  ;;  %v312_v45 = vld [vmem:[%s680_s0 + $0x98] sm:$0xff]  ;;  %v314_v46 = vld [vmem:[%s680_s0 + $0x108] sm:$0xff] }
  0x18   :  { %311 = vst [vmem:[%s681_s1 + $0x48] sm:$0xff] %v310_v44  ;;  %v316_v47 = vld [vmem:[%s680_s0 + $0x178] sm:$0xff]  ;;  %313 = vst [vmem:[%s681_s1 + $0xb8] sm:$0xff] %v312_v45  ;;  %v320_v49 = vld [vmem:[%s680_s0 + $0x88] sm:$0xff] }
  0x19   :  { %315 = vst [vmem:[%s681_s1 + $0x128] sm:$0xff] %v314_v46  ;;  %317 = vst [vmem:[%s681_s1 + $0x198] sm:$0xff] %v316_v47  ;;  %v318_v48 = vld [vmem:[%s680_s0 + $0x18] sm:$0xff]  ;;  %v324_v51 = vld [vmem:[%s680_s0 + $0x168] sm:$0xff] }
  0x1a   :  { %v322_v50 = vld [vmem:[%s680_s0 + $0xf8] sm:$0xff]  ;;  %319 = vst [vmem:[%s681_s1 + $0x58] sm:$0xff] %v318_v48  ;;  %321 = vst [vmem:[%s681_s1 + $0xc8] sm:$0xff] %v320_v49  ;;  %v326_v52 = vld [vmem:[%s680_s0 + $0x8] sm:$0xff] }
  0x1b   :  { %323 = vst [vmem:[%s681_s1 + $0x138] sm:$0xff] %v322_v50  ;;  %v328_v53 = vld [vmem:[%s680_s0 + $0x78] sm:$0xff]  ;;  %325 = vst [vmem:[%s681_s1 + $0x1a8] sm:$0xff] %v324_v51  ;;  %v330_v54 = vld [vmem:[%s680_s0 + $0xe8] sm:$0xff] }
  0x1c   :  { %327 = vst [vmem:[%s681_s1 + $0x68] sm:$0xff] %v326_v52  ;;  %329 = vst [vmem:[%s681_s1 + $0xd8] sm:$0xff] %v328_v53  ;;  %v332_v55 = vld [vmem:[%s680_s0 + $0x158] sm:$0xff] }
  0x1d   :  { %331 = vst [vmem:[%s681_s1 + $0x148] sm:$0xff] %v330_v54  ;;  %333 = vst [vmem:[%s681_s1 + $0x1b8] sm:$0xff] %v332_v55 }

// kernel: ronn_cell_forward.9
= control target key start
LH: loop header
LB: loop body
LE: loop exit
PB: predicated region body
PF: predicated region fallthrough
CT: control target
= control target key end

     0   :  { %v937_v3 = vmov 0.0   ;;  %v938_v8 = vmov 0   ;;  %vm47_vm0 = vcmask 130048   ;;  %s1439_s0 = inlined_call_operand.vmem [shape: f32[16,1024], index: 0, kind: input, shape index: {}]   ;;  %s1440_s1 = inlined_call_operand.vmem [shape: f32[16,16], index: 1, kind: input, shape index: {}]   ;;  %s1441_s2 = inlined_call_operand.vmem [shape: f32[16,1], index: 2, kind: input, shape index: {}]   ;;  %s1442_s3 = inlined_call_operand.vmem [shape: f32[16,1024], index: 3, kind: input, shape index: {}]   ;;  %s1443_s4 = inlined_call_operand.vmem [shape: f32[16,1024], index: 4, kind: output, shape index: {}]  }
   0x1   :  { %v20_v0 = vld [vmem:[%s1439_s0 + $0x8] sm:$0xff]  ;;  %v22_v2 = vld [vmem:[%s1439_s0 + $0x18] sm:$0xff]  ;;  %118 = vmatprep.mubr.f32.mxu0 %v937_v3  ;;  %195 = vmatprep.mubr.f32.mxu1 %v937_v3  ;;  %v19_v6 = vld [vmem:[%s1439_s0] sm:$0xff] }
   0x2   :  { %v28_v1 = vld [vmem:[%s1439_s0 + $0x48] sm:$0xff]  ;;  %v30_v5 = vld [vmem:[%s1439_s0 + $0x58] sm:$0xff]  ;;  %v27_v7 = vld [vmem:[%s1439_s0 + $0x40] sm:$0xff]  ;;  %872 = vset.pattern.permute.xlu0 %v938_v8 }
   0x3   :  { %v854_v4 = vpack.c.bf16 %v28_v1, %v20_v0  ;;  %v858_v9 = vpack.c.bf16 %v30_v5, %v22_v2  ;;  %v856_v10 = vpack.c.bf16 %v27_v7, %v19_v6  ;;  %v21_v11 = vld [vmem:[%s1439_s0 + $0x10] sm:$0xff]  ;;  %v17_v13 = vld [vmem:[%s1440_s1] sm:$0xff]  ;;  %v24_v15 = vld [vmem:[%s1439_s0 + $0x28] sm:$0xff] }
   0x4   :  { %v29_v12 = vld [vmem:[%s1439_s0 + $0x50] sm:$0xff]  ;;  %v32_v16 = vld [vmem:[%s1439_s0 + $0x68] sm:$0xff]  ;;  %v26_v17 = vld [vmem:[%s1439_s0 + $0x38] sm:$0xff] }
   0x5   :  { %855 = vmatprep.subr.bf16.mxu0 %v854_v4  ;;  %v860_v14 = vpack.c.bf16 %v29_v12, %v21_v11  ;;  %859 = vmatprep.subr.bf16.mxu1 %v858_v9  ;;  %v862_v18 = vpack.c.bf16 %v32_v16, %v24_v15  ;;  %v34_v19 = vld [vmem:[%s1439_s0 + $0x78] sm:$0xff]  ;;  %v23_v20 = vld [vmem:[%s1439_s0 + $0x20] sm:$0xff]  ;;  %v25_v24 = vld [vmem:[%s1439_s0 + $0x30] sm:$0xff] }
   0x6   :  { %857 = vmatpush1.bf16.msra.mxu0 %v856_v10  ;;  %v31_v21 = vld [vmem:[%s1439_s0 + $0x60] sm:$0xff]  ;;  %v866_v22 = vpack.c.bf16 %v34_v19, %v26_v17  ;;  %v33_v25 = vld [vmem:[%s1439_s0 + $0x70] sm:$0xff]  ;;  %v18_v28 = vld [vmem:[%s1440_s1 + $0x8] sm:$0xff] }
   0x7   :  { %861 = vmatpush1.bf16.msra.mxu1 %v860_v14  ;;  %v864_v23 = vpack.c.bf16 %v31_v21, %v23_v20  ;;  %863 = vmatprep.subr.bf16.mxu0 %v862_v18  ;;  %v868_v26 = vpack.c.bf16 %v33_v25, %v25_v24  ;;  %v35_v27 = vld [vmem:[%s1441_s2] sm:$0xff]  ;;  %v36_v29 = vld [vmem:[%s1441_s2 + $0x8] sm:$0xff]  ;;  %v364_v35 = vld [vmem:[%s1442_s3 + $0x10] sm:$0xff] }
   0x8   :  { %867 = vmatprep.subr.bf16.mxu1 %v866_v22  ;;  %39 = vperm.xlu0 %872, %v35_v27   ;;  %v362_v32 = vld [vmem:[%s1442_s3] sm:$0xff]  ;;  %v363_v37 = vld [vmem:[%s1442_s3 + $0x8] sm:$0xff]  ;;  %v365_v41 = vld [vmem:[%s1442_s3 + $0x18] sm:$0xff] }
   0x9   :  { %846 = vmatmul.mubr.msk.f32.vlgmr.msra.gmra.mrb[0].mxu0 %vm47_vm0, %v17_v13  ;;  %v370_v1 = vld [vmem:[%s1442_s3 + $0x40] sm:$0xff]  ;;  %v372_v17 = vld [vmem:[%s1442_s3 + $0x50] sm:$0xff]  ;;  %v371_v18 = vld [vmem:[%s1442_s3 + $0x48] sm:$0xff] }
   0xa   :  { %848 = vmatmul.mubr.msk.f32.vlgmr.msra.gmra.mrb[0].mxu1 %vm47_vm0, %v17_v13  ;;  %865 = vmatpush1.bf16.msra.mxu0 %v864_v23  ;;  %v373_v25 = vld [vmem:[%s1442_s3 + $0x58] sm:$0xff] }
   0xb   :  { %869 = vmatpush1.bf16.msra.mxu1 %v868_v26  ;;  %124 = vmatprep.mubr.f32.mxu0 %v937_v3 }
   0xc   :  { %201 = vmatprep.mubr.f32.mxu1 %v937_v3  ;;  %44 = vperm.xlu0 %872, %v36_v29  }
   0xd   :  { %847 = vmatmul.mubr.msk.f32.gmra.mrb[2].mxu0 %vm47_vm0, %v18_v28 }
   0xe   :  { %849 = vmatmul.mubr.msk.f32.gmra.mrb[2].mxu1 %vm47_vm0, %v18_v28  ;;  %272 = vmatprep.mubr.f32.mxu0 %v937_v3 }
   0xf   :  { %349 = vmatprep.mubr.f32.mxu1 %v937_v3 }
  0x11   :  { %850 = vmatmul.mubr.msk.f32.vlgmr.msra.gmra.mrb[4].mxu0 %vm47_vm0, %v17_v13 }
  0x12   :  { %852 = vmatmul.mubr.msk.f32.vlgmr.msra.gmra.mrb[4].mxu1 %vm47_vm0, %v17_v13  ;;  %278 = vmatprep.mubr.f32.mxu0 %v937_v3 }
  0x13   :  { %355 = vmatprep.mubr.f32.mxu1 %v937_v3 }
  0x15   :  { %851 = vmatmul.mubr.msk.f32.gmra.mrb[6].mxu0 %vm47_vm0, %v18_v28 }
  0x16   :  { %853 = vmatmul.mubr.msk.f32.gmra.mrb[6].mxu1 %vm47_vm0, %v18_v28 }
  0x87   :  { %v1032_v30 = vpop.permute.xlu0 %39 }
  0x8b   :  { %v1062_v55 = vpop.permute.xlu0 %44 }
  0xdc   :  { %v120_v31 = vpop.f32.mrb[0].mxu0 }
  0xdd   :  { %v121_v33 = vadd.f32 %v120_v31, %v1032_v30  ;;  %v197_v34 = vpop.f32.mrb[0].mxu1  ;;  %v122_v36 = vpop.f32.mrb[1].mxu0 }
  0xde   :  { %v198_v38 = vadd.f32 %v197_v34, %v1032_v30  ;;  %v123_v39 = vadd.f32 %v122_v36, %v1032_v30  ;;  %v199_v40 = vpop.f32.mrb[1].mxu1 }
  0xdf   :  { %v378_v42 = vadd.f32 %v362_v32, %v121_v33  ;;  %v200_v43 = vadd.f32 %v199_v40, %v1032_v30 }
  0xe0   :  { %v380_v44 = vadd.f32 %v364_v35, %v198_v38  ;;  %v379_v45 = vadd.f32 %v363_v37, %v123_v39  ;;  %v126_v46 = vpop.f32.mrb[2].mxu0 }
  0xe1   :  { %v1050_v47 = vmul.f32 0.70710677, %v378_v42  ;;  %v1052_v48 = vadd.f32 %v365_v41, %v200_v43  ;;  %v203_v49 = vpop.f32.mrb[2].mxu1  ;;  %v128_v50 = vpop.f32.mrb[3].mxu0  ;;  %v127_v0 = vadd.f32 %v126_v46, %v1062_v55  ;;  %v1100_v27 = vmul.f32 0.5, %v378_v42 }
  0xe2   :  { %v1054_v51 = vmul.f32 0.70710677, %v380_v44  ;;  %v1056_v52 = vmul.f32 0.70710677, %v379_v45  ;;  %v205_v5 = vpop.f32.mrb[3].mxu1  ;;  %v204_v23 = vadd.f32 %v203_v49, %v1062_v55  ;;  %v129_v24 = vadd.f32 %v128_v50, %v1062_v55 }
  0xe3   :  { %v426_v53 = vand.u32 2147483647, %v1050_v47  ;;  %v1060_v54 = vmul.f32 0.70710677, %v1052_v48  ;;  %v1081_v16 = vadd.f32 %v370_v1, %v127_v0  ;;  %v206_v29 = vadd.f32 %v205_v5, %v1062_v55 }
  0xe4   :  { %v428_v56 = vand.u32 2147483647, %v1054_v51  ;;  %v427_v57 = vand.u32 2147483647, %v1056_v52  ;;  %v1071_v6 = vpop.f32.mrb[4].mxu0  ;;  %v1106_v32 = vadd.f32 %v372_v17, %v204_v23  ;;  %v1108_v33 = vadd.f32 %v371_v18, %v129_v24 }
  0xe5   :  { %v442_v58 = vmul.f32 0.3275911, %v426_v53  ;;  %v650_v59 = vsub.f32 0.0, %v426_v53  ;;  %v429_v60 = vand.u32 2147483647, %v1060_v54  ;;  %v1073_v8 = vpop.f32.mrb[4].mxu1  ;;  %v1111_v37 = vadd.f32 %v373_v25, %v206_v29 }
  0xe6   :  { %v444_v61 = vmul.f32 0.3275911, %v428_v56  ;;  %v652_v62 = vsub.f32 0.0, %v428_v56  ;;  %v443_v63 = vmul.f32 0.3275911, %v427_v57  ;;  %v651_v3 = vsub.f32 0.0, %v427_v57 }
  0xe7   :  { %v458_v2 = vadd.f32 1.0, %v442_v58  ;;  %v445_v4 = vmul.f32 0.3275911, %v429_v60  ;;  %v1075_v9 = vpop.f32.mrb[5].mxu0  ;;  %v666_v10 = vmul.f32 %v650_v59, %v426_v53  ;;  %v1077_v12 = vpop.f32.mrb[5].mxu1  ;;  %v653_v15 = vsub.f32 0.0, %v429_v60 }
  0xe8   :  { %v460_v7 = vadd.f32 1.0, %v444_v61  ;;  %v459_v11 = vadd.f32 1.0, %v443_v63  ;;  %v1079_v13 = vpop.f32.mrb[6].mxu0  ;;  %v668_v14 = vmul.f32 %v652_v62, %v428_v56  ;;  %v667_v21 = vmul.f32 %v651_v3, %v427_v57 }
  0xe9   :  { %873 = vrcp.f32 %v458_v2  ;;  %v1089_v19 = vpop.f32.mrb[6].mxu1  ;;  %v1091_v20 = vpop.f32.mrb[7].mxu0  ;;  %v461_v22 = vadd.f32 1.0, %v445_v4  ;;  %v1103_v28 = vmul.f32 0.70710677, %v1081_v16  ;;  %v669_v35 = vmul.f32 %v653_v15, %v429_v60 }
  0xea   :  { %875 = vrcp.f32 %v460_v7  ;;  %v1098_v26 = vpop.f32.mrb[7].mxu1  ;;  %v682_v31 = vmul.f32 1.442695, %v666_v10  ;;  %v686_v34 = vmul.f32 1.442695, %v668_v14  ;;  %v1113_v38 = vmul.f32 0.5, %v380_v44 }
  0xeb   :  { %877 = vrcp.f32 %v459_v11  ;;  %v434_v36 = vand.u32 2147483647, %v1103_v28  ;;  %v684_v39 = vmul.f32 1.442695, %v667_v21  ;;  %v1116_v40 = vmul.f32 0.70710677, %v1106_v32 }
  0xec   :  { %879 = vrcp.f32 %v461_v22  ;;  %v1118_v41 = vmul.f32 0.5, %v379_v45  ;;  %v1121_v46 = vmul.f32 0.70710677, %v1108_v33  ;;  %v1124_v49 = vmul.f32 0.5, %v1052_v48  ;;  %v366_v22 = vld [vmem:[%s1442_s3 + $0x20] sm:$0xff] }
  0xed   :  { %v450_v42 = vmul.f32 0.3275911, %v434_v36  ;;  %v658_v43 = vsub.f32 0.0, %v434_v36  ;;  %881 = vpow2.f32 %v682_v31  ;;  %v436_v50 = vand.u32 2147483647, %v1116_v40 }
  0xee   :  { %v1128_v44 = vmul.f32 0.70710677, %v1111_v37  ;;  %883 = vpow2.f32 %v686_v34  ;;  %v688_v53 = vmul.f32 1.442695, %v669_v35  ;;  %v435_v45 = vand.u32 2147483647, %v1121_v46 }
  0xef   :  { %v466_v56 = vadd.f32 1.0, %v450_v42  ;;  %885 = vpow2.f32 %v684_v39  ;;  %v452_v58 = vmul.f32 0.3275911, %v436_v50  ;;  %v660_v59 = vsub.f32 0.0, %v436_v50 }
  0xf0   :  { %v437_v60 = vand.u32 2147483647, %v1128_v44  ;;  %v674_v62 = vmul.f32 %v658_v43, %v434_v36  ;;  %v451_v63 = vmul.f32 0.3275911, %v435_v45  ;;  %v659_v3 = vsub.f32 0.0, %v435_v45 }
  0xf1   :  { %887 = vrcp.f32 %v466_v56  ;;  %v468_v1 = vadd.f32 1.0, %v452_v58  ;;  %v676_v2 = vmul.f32 %v660_v59, %v436_v50  ;;  %v275_v15 = vadd.f32 %v1071_v6, %v1032_v30 }
  0xf2   :  { %889 = vpow2.f32 %v688_v53  ;;  %v467_v5 = vadd.f32 1.0, %v451_v63  ;;  %v453_v7 = vmul.f32 0.3275911, %v437_v60  ;;  %v675_v14 = vmul.f32 %v659_v3, %v435_v45 }
  0xf3   :  { %v1131_v57 = vpop.eup %873  ;;  %891 = vrcp.f32 %v468_v1  ;;  %v698_v25 = vmul.f32 1.442695, %v674_v62  ;;  %v702_v29 = vmul.f32 1.442695, %v676_v2  ;;  %v661_v31 = vsub.f32 0.0, %v437_v60 }
  0xf4   :  { %v1134_v61 = vpop.eup %875  ;;  %v506_v48 = vmul.f32 1.0614054, %v1131_v57  ;;  %893 = vrcp.f32 %v467_v5  ;;  %v469_v21 = vadd.f32 1.0, %v453_v7  ;;  %v700_v42 = vmul.f32 1.442695, %v675_v14 }
  0xf5   :  { %v508_v0 = vmul.f32 1.0614054, %v1134_v61  ;;  %v1138_v10 = vpop.eup %877  ;;  %v677_v43 = vmul.f32 %v661_v31, %v437_v60  ;;  %v1151_v50 = vadd.f32 %v366_v22, %v275_v15  ;;  %v352_v59 = vadd.f32 %v1073_v8, %v1032_v30  ;;  %v368_v60 = vld [vmem:[%s1442_s3 + $0x30] sm:$0xff] }
  0xf6   :  { %v522_v4 = vadd.f32 -1.4531521, %v506_v48  ;;  %v507_v18 = vmul.f32 1.0614054, %v1138_v10  ;;  %v1147_v23 = vpop.eup %879  ;;  %895 = vrcp.f32 %v469_v21  ;;  %vm746_vm1 = vcmp.lt.f32.partialorder %v1050_v47, 0.0 }
  0xf7   :  { %v524_v11 = vadd.f32 -1.4531521, %v508_v0  ;;  %v509_v6 = vmul.f32 1.0614054, %v1147_v23  ;;  %v882_v36 = vpop.eup %881  ;;  %897 = vpow2.f32 %v698_v25  ;;  %v704_v63 = vmul.f32 1.442695, %v677_v43 }
  0xf8   :  { %v538_v17 = vmul.f32 %v1131_v57, %v522_v4  ;;  %v523_v35 = vadd.f32 -1.4531521, %v507_v18  ;;  %v884_v53 = vpop.eup %883  ;;  %v1161_v0 = vmul.f32 0.70710677, %v1151_v50  ;;  %899 = vpow2.f32 %v702_v29 }
  0xf9   :  { %v540_v24 = vmul.f32 %v1134_v61, %v524_v11  ;;  %v525_v58 = vadd.f32 -1.4531521, %v509_v6  ;;  %v1157_v48 = vpop.eup %885  ;;  %901 = vpow2.f32 %v700_v42  ;;  %v1175_v18 = vadd.f32 %v368_v60, %v352_v59 }
  0xfa   :  { %v554_v34 = vadd.f32 1.4214138, %v538_v17  ;;  %v539_v45 = vmul.f32 %v1138_v10, %v523_v35  ;;  %v1171_v7 = vand.u32 2147483647, %v1161_v0  ;;  %903 = vpow2.f32 %v704_v63 }
  0xfb   :  { %v556_v39 = vadd.f32 1.4214138, %v540_v24  ;;  %v1166_v1 = vpop.eup %887  ;;  %v541_v4 = vmul.f32 %v1147_v23, %v525_v58  ;;  %vm748_vm2 = vcmp.lt.f32.partialorder %v1054_v51, 0.0  ;;  %vm747_vm3 = vcmp.lt.f32.partialorder %v1056_v52, 0.0 }
  0xfc   :  { %v570_v56 = vmul.f32 %v1131_v57, %v554_v34  ;;  %v555_v3 = vadd.f32 1.4214138, %v539_v45  ;;  %v514_v5 = vmul.f32 1.0614054, %v1166_v1  ;;  %v890_v11 = vpop.eup %889  ;;  %v446_v25 = vmul.f32 0.3275911, %v1171_v7 }
  0xfd   :  { %v572_v62 = vmul.f32 %v1134_v61, %v556_v39  ;;  %v557_v17 = vadd.f32 1.4214138, %v541_v4  ;;  %v1177_v21 = vpop.eup %891  ;;  %vm749_vm4 = vcmp.lt.f32.partialorder %v1060_v54, 0.0  ;;  %v402_v52 = vmul.f32 0.5, %v1081_v16 }
  0xfe   :  { %v586_v2 = vadd.f32 -0.28449672, %v570_v56  ;;  %v571_v15 = vmul.f32 %v1138_v10, %v555_v3  ;;  %v530_v24 = vadd.f32 -1.4531521, %v514_v5  ;;  %v1181_v29 = vpop.eup %893  ;;  %v516_v6 = vmul.f32 1.0614054, %v1177_v21 }
  0xff   :  { %v588_v8 = vadd.f32 -0.28449672, %v572_v62  ;;  %v573_v35 = vmul.f32 %v1147_v23, %v557_v17  ;;  %v515_v43 = vmul.f32 1.0614054, %v1181_v29  ;;  %v1188_v56 = vadd.f32 1.0, %v446_v25 }
 0x100   :  { %v602_v14 = vmul.f32 %v1131_v57, %v586_v2  ;;  %v587_v34 = vadd.f32 -0.28449672, %v571_v15  ;;  %v546_v42 = vmul.f32 %v1166_v1, %v530_v24  ;;  %v1190_v45 = vpop.eup %895  ;;  %v532_v63 = vadd.f32 -1.4531521, %v516_v6 }
 0x101   :  { %v604_v22 = vmul.f32 %v1134_v61, %v588_v8  ;;  %v589_v62 = vadd.f32 -0.28449672, %v573_v35  ;;  %v531_v3 = vadd.f32 -1.4531521, %v515_v43  ;;  %v517_v4 = vmul.f32 1.0614054, %v1190_v45  ;;  %v898_v17 = vpop.eup %897 }
 0x102   :  { %v618_v31 = vadd.f32 0.2548296, %v602_v14  ;;  %v603_v59 = vmul.f32 %v1138_v10, %v587_v34  ;;  %v562_v2 = vadd.f32 1.4214138, %v546_v42  ;;  %v548_v15 = vmul.f32 %v1177_v21, %v532_v63 }
 0x103   :  { %v620_v39 = vadd.f32 0.2548296, %v604_v22  ;;  %v605_v14 = vmul.f32 %v1147_v23, %v589_v62  ;;  %v547_v24 = vmul.f32 %v1181_v29, %v531_v3  ;;  %v533_v25 = vadd.f32 -1.4531521, %v517_v4 }
 0x104   :  { %v634_v58 = vmul.f32 %v1131_v57, %v618_v31  ;;  %v619_v5 = vadd.f32 0.2548296, %v603_v59  ;;  %v578_v22 = vmul.f32 %v1166_v1, %v562_v2  ;;  %905 = vrcp.f32 %v1188_v56 }
 0x105   :  { %v636_v60 = vmul.f32 %v1134_v61, %v620_v39  ;;  %v900_v61 = vpop.eup %899  ;;  %v621_v35 = vadd.f32 0.2548296, %v605_v14  ;;  %v563_v43 = vadd.f32 1.4214138, %v547_v24  ;;  %vm754_vm5 = vcmp.lt.f32.partialorder %v1103_v28, 0.0  ;;  %v367_v28 = vld [vmem:[%s1442_s3 + $0x28] sm:$0xff] }
 0x106   :  { %v714_v8 = vmul.f32 %v882_v36, %v634_v58  ;;  %v635_v34 = vmul.f32 %v1138_v10, %v619_v5  ;;  %v564_v36 = vadd.f32 1.4214138, %v548_v15  ;;  %v902_v6 = vpop.eup %901  ;;  %v594_v42 = vadd.f32 -0.28449672, %v578_v22 }
 0x107   :  { %v716_v57 = vmul.f32 %v884_v53, %v636_v60  ;;  %v549_v53 = vmul.f32 %v1190_v45, %v533_v25  ;;  %v637_v62 = vmul.f32 %v1147_v23, %v621_v35  ;;  %v1208_v60 = vpop.eup %903  ;;  %v579_v3 = vmul.f32 %v1181_v29, %v563_v43 }
 0x108   :  { %v730_v31 = vsub.f32 1.0, %v714_v8  ;;  %v715_v59 = vmul.f32 %v1157_v48, %v635_v34  ;;  %v580_v63 = vmul.f32 %v1177_v21, %v564_v36  ;;  %v610_v2 = vmul.f32 %v1166_v1, %v594_v42 }
 0x109   :  { %v732_v39 = vsub.f32 1.0, %v716_v57  ;;  %v565_v4 = vadd.f32 1.4214138, %v549_v53  ;;  %v717_v14 = vmul.f32 %v890_v11, %v637_v62  ;;  %v595_v22 = vadd.f32 -0.28449672, %v579_v3 }
 0x10a   :  { %v762_v58 = vsub.f32 0.0, %v730_v31  ;;  %v731_v5 = vsub.f32 1.0, %v715_v59  ;;  %v596_v15 = vadd.f32 -0.28449672, %v580_v63  ;;  %v626_v48 = vadd.f32 0.2548296, %v610_v2 }
 0x10b   :  { %v764_v10 = vsub.f32 0.0, %v732_v39  ;;  %v733_v34 = vsub.f32 1.0, %v717_v14  ;;  %v611_v47 = vmul.f32 %v1181_v29, %v595_v22  ;;  %v581_v11 = vmul.f32 %v1190_v45, %v565_v4  ;;  %v369_v22 = vld [vmem:[%s1442_s3 + $0x38] sm:$0xff] }
 0x10c   :  { %v778_v8 = vsel %vm746_vm1, %v762_v58, %v730_v31  ;;  %v763_v25 = vsub.f32 0.0, %v731_v5  ;;  %v612_v35 = vmul.f32 %v1177_v21, %v596_v15  ;;  %v642_v42 = vmul.f32 %v1166_v1, %v626_v48 }
 0x10d   :  { %v794_v57 = vadd.f32 1.0, %v778_v8  ;;  %v780_v23 = vsel %vm748_vm2, %v764_v10, %v732_v39  ;;  %v765_v39 = vsub.f32 0.0, %v733_v34  ;;  %v597_v59 = vadd.f32 -0.28449672, %v581_v11 }
 0x10e   :  { %v796_v24 = vadd.f32 1.0, %v780_v23  ;;  %v779_v51 = vsel %vm747_vm3, %v763_v25, %v731_v5  ;;  %v628_v43 = vadd.f32 0.2548296, %v612_v35  ;;  %v722_v58 = vmul.f32 %v898_v17, %v642_v42  ;;  %v1270_v42 = vpop.eup %905 }
 0x10f   :  { %v810_v36 = vmul.f32 %v794_v57, %v1100_v27  ;;  %v795_v53 = vadd.f32 1.0, %v779_v51  ;;  %v627_v27 = vadd.f32 0.2548296, %v611_v47  ;;  %v404_v2 = vmul.f32 0.5, %v1106_v32 }
 0x110   :  { %v812_v31 = vmul.f32 %v796_v24, %v1113_v38  ;;  %v781_v38 = vsel %vm749_vm4, %v765_v39, %v733_v34  ;;  %v644_v1 = vmul.f32 %v1177_v21, %v628_v43  ;;  %v738_v10 = vsub.f32 1.0, %v722_v58  ;;  %v374_v39 = vld [vmem:[%s1442_s3 + $0x60] sm:$0xff] }
 0x111   :  { %826 = vst [vmem:[%s1443_s4] sm:$0xff] %v810_v36  ;;  %v811_v62 = vmul.f32 %v795_v53, %v1118_v41  ;;  %v797_v63 = vadd.f32 1.0, %v781_v38  ;;  %v643_v17 = vmul.f32 %v1181_v29, %v627_v27  ;;  %v613_v54 = vmul.f32 %v1190_v45, %v597_v59 }
 0x112   :  { %828 = vst [vmem:[%s1443_s4 + $0x10] sm:$0xff] %v812_v31  ;;  %v724_v3 = vmul.f32 %v900_v61, %v644_v1  ;;  %v770_v21 = vsub.f32 0.0, %v738_v10  ;;  %v1245_v41 = vmul.f32 0.70710677, %v1175_v18  ;;  %v403_v32 = vmul.f32 0.5, %v1108_v33 }
 0x113   :  { %827 = vst [vmem:[%s1443_s4 + $0x8] sm:$0xff] %v811_v62  ;;  %v813_v16 = vmul.f32 %v797_v63, %v1124_v49  ;;  %v723_v56 = vmul.f32 %v902_v6, %v643_v17  ;;  %v629_v61 = vadd.f32 0.2548296, %v613_v54  ;;  %v277_v4 = vadd.f32 %v1075_v9, %v1032_v30 }
 0x114   :  { %v740_v29 = vsub.f32 1.0, %v724_v3  ;;  %v786_v49 = vsel %vm754_vm5, %v770_v21, %v738_v10  ;;  %v654_v8 = vsub.f32 0.0, %v1171_v7  ;;  %v432_v5 = vand.u32 2147483647, %v1245_v41  ;;  %v376_v3 = vld [vmem:[%s1442_s3 + $0x70] sm:$0xff] }
 0x115   :  { %829 = vst [vmem:[%s1443_s4 + $0x18] sm:$0xff] %v813_v16  ;;  %v739_v6 = vsub.f32 1.0, %v723_v56  ;;  %v802_v14 = vadd.f32 1.0, %v786_v49  ;;  %v645_v57 = vmul.f32 %v1190_v45, %v629_v61  ;;  %v1259_v23 = vadd.f32 %v367_v28, %v277_v4  ;;  %v375_v28 = vld [vmem:[%s1442_s3 + $0x68] sm:$0xff] }
 0x116   :  { %v772_v15 = vsub.f32 0.0, %v740_v29  ;;  %vm756_vm6 = vcmp.lt.f32.partialorder %v1116_v40, 0.0  ;;  %v448_v9 = vmul.f32 0.3275911, %v432_v5  ;;  %v354_v48 = vadd.f32 %v1077_v12, %v1032_v30 }
 0x117   :  { %v771_v33 = vsub.f32 0.0, %v739_v6  ;;  %v818_v24 = vmul.f32 %v802_v14, %v402_v52  ;;  %vm755_vm7 = vcmp.lt.f32.partialorder %v1121_v46, 0.0  ;;  %v725_v34 = vmul.f32 %v1208_v60, %v645_v57 }
 0x118   :  { %v788_v25 = vsel %vm756_vm6, %v772_v15, %v740_v29  ;;  %v670_v36 = vmul.f32 %v654_v8, %v1171_v7  ;;  %v464_v40 = vadd.f32 1.0, %v448_v9  ;;  %v1276_v47 = vmul.f32 0.70710677, %v1259_v23 }
 0x119   :  { %v804_v45 = vadd.f32 1.0, %v788_v25  ;;  %v787_v35 = vsel %vm755_vm7, %v771_v33, %v739_v6  ;;  %834 = vst [vmem:[%s1443_s4 + $0x40] sm:$0xff] %v818_v24  ;;  %v741_v12 = vsub.f32 1.0, %v725_v34  ;;  %v1278_v11 = vadd.f32 %v369_v22, %v354_v48 }
 0x11a   :  { %v803_v30 = vadd.f32 1.0, %v787_v35  ;;  %v510_v60 = vmul.f32 1.0614054, %v1270_v42  ;;  %907 = vrcp.f32 %v464_v40  ;;  %vm757_vm8 = vcmp.lt.f32.partialorder %v1128_v44, 0.0 }
 0x11b   :  { %v820_v46 = vmul.f32 %v804_v45, %v404_v2  ;;  %v773_v7 = vsub.f32 0.0, %v741_v12  ;;  %v431_v51 = vand.u32 2147483647, %v1276_v47  ;;  %v690_v53 = vmul.f32 1.442695, %v670_v36 }
 0x11c   :  { %v819_v31 = vmul.f32 %v803_v30, %v403_v32  ;;  %v526_v43 = vadd.f32 -1.4531521, %v510_v60  ;;  %v1290_v58 = vmul.f32 0.70710677, %v1278_v11  ;;  %v281_v59 = vadd.f32 %v1079_v13, %v1062_v55 }
 0x11d   :  { %836 = vst [vmem:[%s1443_s4 + $0x50] sm:$0xff] %v820_v46  ;;  %v789_v44 = vsel %vm757_vm8, %v773_v7, %v741_v12  ;;  %v447_v27 = vmul.f32 0.3275911, %v431_v51  ;;  %v405_v38 = vmul.f32 0.5, %v1111_v37  ;;  %v656_v63 = vsub.f32 0.0, %v432_v5 }
 0x11e   :  { %835 = vst [vmem:[%s1443_s4 + $0x48] sm:$0xff] %v819_v31  ;;  %v805_v52 = vadd.f32 1.0, %v789_v44  ;;  %v542_v1 = vmul.f32 %v1270_v42, %v526_v43  ;;  %v433_v62 = vand.u32 2147483647, %v1290_v58  ;;  %v1300_v17 = vadd.f32 %v374_v39, %v281_v59 }
 0x11f   :  { %v463_v10 = vadd.f32 1.0, %v447_v27  ;;  %v358_v2 = vadd.f32 %v1089_v19, %v1062_v55  ;;  %909 = vpow2.f32 %v690_v53  ;;  %v672_v29 = vmul.f32 %v656_v63, %v432_v5 }
 0x120   :  { %v821_v54 = vmul.f32 %v805_v52, %v405_v38  ;;  %v558_v13 = vadd.f32 1.4214138, %v542_v1  ;;  %v449_v37 = vmul.f32 0.3275911, %v433_v62  ;;  %v1308_v16 = vmul.f32 0.70710677, %v1300_v17 }
 0x121   :  { %911 = vrcp.f32 %v463_v10  ;;  %v1314_v19 = vadd.f32 %v376_v3, %v358_v2  ;;  %v283_v61 = vadd.f32 %v1091_v20, %v1062_v55  ;;  %v655_v6 = vsub.f32 0.0, %v431_v51  ;;  %v377_v20 = vld [vmem:[%s1442_s3 + $0x78] sm:$0xff] }
 0x122   :  { %837 = vst [vmem:[%s1443_s4 + $0x58] sm:$0xff] %v821_v54  ;;  %v574_v21 = vmul.f32 %v1270_v42, %v558_v13  ;;  %v465_v56 = vadd.f32 1.0, %v449_v37  ;;  %v438_v32 = vand.u32 2147483647, %v1308_v16  ;;  %v657_v33 = vsub.f32 0.0, %v433_v62 }
 0x123   :  { %v1325_v15 = vadd.f32 %v375_v28, %v283_v61  ;;  %v1329_v5 = vmul.f32 0.70710677, %v1314_v19  ;;  %v360_v9 = vadd.f32 %v1098_v26, %v1062_v55  ;;  %v694_v22 = vmul.f32 1.442695, %v672_v29 }
 0x124   :  { %v1322_v4 = vpop.eup %907  ;;  %v590_v49 = vadd.f32 -0.28449672, %v574_v21  ;;  %913 = vrcp.f32 %v465_v56  ;;  %v454_v14 = vmul.f32 0.3275911, %v438_v32  ;;  %v671_v34 = vmul.f32 %v655_v6, %v431_v51 }
 0x125   :  { %v512_v8 = vmul.f32 1.0614054, %v1322_v4  ;;  %v440_v45 = vand.u32 2147483647, %v1329_v5  ;;  %v1339_v36 = vmul.f32 0.70710677, %v1325_v15  ;;  %v1341_v40 = vadd.f32 %v377_v20, %v360_v9 }
 0x126   :  { %v606_v57 = vmul.f32 %v1270_v42, %v590_v49  ;;  %v470_v24 = vadd.f32 1.0, %v454_v14  ;;  %v673_v30 = vmul.f32 %v657_v33, %v433_v62  ;;  %v398_v60 = vmul.f32 0.5, %v1151_v50 }
 0x127   :  { %v528_v48 = vadd.f32 -1.4531521, %v512_v8  ;;  %v456_v12 = vmul.f32 0.3275911, %v440_v45  ;;  %v439_v7 = vand.u32 2147483647, %v1339_v36 }
 0x128   :  { %v622_v25 = vadd.f32 0.2548296, %v606_v57  ;;  %915 = vrcp.f32 %v470_v24  ;;  %v692_v43 = vmul.f32 1.442695, %v671_v34  ;;  %v662_v27 = vsub.f32 0.0, %v438_v32 }
 0x129   :  { %v544_v35 = vmul.f32 %v1322_v4, %v528_v48  ;;  %v910_v55 = vpop.eup %909  ;;  %917 = vpow2.f32 %v694_v22  ;;  %v472_v53 = vadd.f32 1.0, %v456_v12  ;;  %v455_v59 = vmul.f32 0.3275911, %v439_v7 }
 0x12a   :  { %v638_v26 = vmul.f32 %v1270_v42, %v622_v25  ;;  %v1351_v42 = vmul.f32 0.70710677, %v1341_v40  ;;  %v696_v1 = vmul.f32 1.442695, %v673_v30  ;;  %vm750_vm9 = vcmp.lt.f32.partialorder %v1161_v0, 0.0 }
 0x12b   :  { %v1344_v46 = vpop.eup %911  ;;  %v560_v31 = vadd.f32 1.4214138, %v544_v35  ;;  %919 = vrcp.f32 %v472_v53  ;;  %v471_v10 = vadd.f32 1.0, %v455_v59  ;;  %v664_v54 = vsub.f32 0.0, %v440_v45 }
 0x12c   :  { %v718_v51 = vmul.f32 %v910_v55, %v638_v26  ;;  %v511_v39 = vmul.f32 1.0614054, %v1344_v46  ;;  %v1359_v13 = vand.u32 2147483647, %v1351_v42  ;;  %v678_v56 = vmul.f32 %v662_v27, %v438_v32 }
 0x12d   :  { %v576_v44 = vmul.f32 %v1322_v4, %v560_v31  ;;  %921 = vrcp.f32 %v471_v10  ;;  %v680_v33 = vmul.f32 %v664_v54, %v440_v45  ;;  %v663_v35 = vsub.f32 0.0, %v439_v7 }
 0x12e   :  { %v1353_v38 = vpop.eup %913  ;;  %v734_v52 = vsub.f32 1.0, %v718_v51  ;;  %v527_v50 = vadd.f32 -1.4531521, %v511_v39  ;;  %923 = vpow2.f32 %v692_v43  ;;  %v457_v0 = vmul.f32 0.3275911, %v1359_v13 }
 0x12f   :  { %v592_v62 = vadd.f32 -0.28449672, %v576_v44  ;;  %v513_v63 = vmul.f32 1.0614054, %v1353_v38  ;;  %925 = vpow2.f32 %v696_v1  ;;  %v706_v24 = vmul.f32 1.442695, %v678_v56 }
 0x130   :  { %v766_v2 = vsub.f32 0.0, %v734_v52  ;;  %v543_v3 = vmul.f32 %v1344_v46, %v527_v50  ;;  %v473_v9 = vadd.f32 1.0, %v457_v0  ;;  %v679_v44 = vmul.f32 %v663_v35, %v439_v7 }
 0x131   :  { %v608_v37 = vmul.f32 %v1322_v4, %v592_v62  ;;  %v529_v21 = vadd.f32 -1.4531521, %v513_v63  ;;  %v665_v1 = vsub.f32 0.0, %v1359_v13  ;;  %vm752_vm10 = vcmp.lt.f32.partialorder %v1245_v41, 0.0 }
 0x132   :  { %v782_v28 = vsel %vm750_vm9, %v766_v2, %v734_v52  ;;  %v559_v29 = vadd.f32 1.4214138, %v543_v3  ;;  %v1363_v61 = vpop.eup %915  ;;  %927 = vrcp.f32 %v473_v9  ;;  %v708_v41 = vmul.f32 1.442695, %v679_v44 }
 0x133   :  { %v798_v49 = vadd.f32 1.0, %v782_v28  ;;  %v624_v6 = vadd.f32 0.2548296, %v608_v37  ;;  %v545_v8 = vmul.f32 %v1353_v38, %v529_v21  ;;  %v518_v57 = vmul.f32 1.0614054, %v1363_v61  ;;  %v918_v32 = vpop.eup %917 }
 0x134   :  { %v575_v14 = vmul.f32 %v1344_v46, %v559_v29  ;;  %929 = vpow2.f32 %v706_v24  ;;  %vm751_vm11 = vcmp.lt.f32.partialorder %v1276_v47, 0.0  ;;  %vm753_vm12 = vcmp.lt.f32.partialorder %v1290_v58, 0.0 }
 0x135   :  { %v814_v20 = vmul.f32 %v798_v49, %v398_v60  ;;  %v640_v48 = vmul.f32 %v1322_v4, %v624_v6  ;;  %v561_v22 = vadd.f32 1.4214138, %v545_v8  ;;  %v534_v34 = vadd.f32 -1.4531521, %v518_v57  ;;  %v1373_v30 = vpop.eup %919 }
 0x136   :  { %v591_v25 = vadd.f32 -0.28449672, %v575_v14  ;;  %v710_v4 = vmul.f32 1.442695, %v680_v33  ;;  %v400_v60 = vmul.f32 0.5, %v1175_v18  ;;  %v399_v33 = vmul.f32 0.5, %v1259_v23 }
 0x137   :  { %830 = vst [vmem:[%s1443_s4 + $0x20] sm:$0xff] %v814_v20  ;;  %v720_v55 = vmul.f32 %v918_v32, %v640_v48  ;;  %v577_v26 = vmul.f32 %v1353_v38, %v561_v22  ;;  %v550_v12 = vmul.f32 %v1363_v61, %v534_v34  ;;  %v520_v39 = vmul.f32 1.0614054, %v1373_v30  ;;  %v1379_v27 = vpop.eup %921 }
 0x138   :  { %v607_v45 = vmul.f32 %v1344_v46, %v591_v25  ;;  %v924_v62 = vpop.eup %923  ;;  %v519_v10 = vmul.f32 1.0614054, %v1379_v27  ;;  %931 = vpow2.f32 %v710_v4  ;;  %vm758_vm13 = vcmp.lt.f32.partialorder %v1308_v16, 0.0 }
 0x139   :  { %v736_v31 = vsub.f32 1.0, %v720_v55  ;;  %v593_v51 = vadd.f32 -0.28449672, %v577_v26  ;;  %v566_v53 = vadd.f32 1.4214138, %v550_v12  ;;  %v926_v2 = vpop.eup %925  ;;  %933 = vpow2.f32 %v708_v41 }
 0x13a   :  { %v623_v43 = vadd.f32 0.2548296, %v607_v45  ;;  %v536_v50 = vadd.f32 -1.4531521, %v520_v39  ;;  %v535_v28 = vadd.f32 -1.4531521, %v519_v10 }
 0x13b   :  { %v768_v59 = vsub.f32 0.0, %v736_v31  ;;  %v609_v52 = vmul.f32 %v1353_v38, %v593_v51  ;;  %v582_v63 = vmul.f32 %v1363_v61, %v566_v53  ;;  %vm760_vm14 = vcmp.lt.f32.partialorder %v1329_v5, 0.0 }
 0x13c   :  { %v639_v18 = vmul.f32 %v1344_v46, %v623_v43  ;;  %v552_v54 = vmul.f32 %v1373_v30, %v536_v50  ;;  %v681_v46 = vmul.f32 %v665_v1, %v1359_v13  ;;  %v1390_v49 = vpop.eup %927  ;;  %v551_v57 = vmul.f32 %v1379_v27, %v535_v28 }
 0x13d   :  { %v784_v3 = vsel %vm752_vm10, %v768_v59, %v736_v31  ;;  %v625_v7 = vadd.f32 0.2548296, %v609_v52  ;;  %v598_v56 = vadd.f32 -0.28449672, %v582_v63  ;;  %v521_v20 = vmul.f32 1.0614054, %v1390_v49 }
 0x13e   :  { %v800_v37 = vadd.f32 1.0, %v784_v3  ;;  %v719_v21 = vmul.f32 %v924_v62, %v639_v18  ;;  %v568_v0 = vadd.f32 1.4214138, %v552_v54  ;;  %v567_v48 = vadd.f32 1.4214138, %v551_v57  ;;  %v930_v34 = vpop.eup %929 }
 0x13f   :  { %v641_v29 = vmul.f32 %v1353_v38, %v625_v7  ;;  %v614_v14 = vmul.f32 %v1363_v61, %v598_v56  ;;  %v537_v25 = vadd.f32 -1.4531521, %v521_v20  ;;  %v712_v26 = vmul.f32 1.442695, %v681_v46 }
 0x140   :  { %v816_v6 = vmul.f32 %v800_v37, %v400_v60  ;;  %v735_v8 = vsub.f32 1.0, %v719_v21  ;;  %v584_v32 = vmul.f32 %v1373_v30, %v568_v0  ;;  %v583_v55 = vmul.f32 %v1379_v27, %v567_v48 }
 0x141   :  { %v721_v9 = vmul.f32 %v926_v2, %v641_v29  ;;  %v630_v13 = vadd.f32 0.2548296, %v614_v14  ;;  %v553_v47 = vmul.f32 %v1390_v49, %v537_v25  ;;  %v401_v60 = vmul.f32 0.5, %v1278_v11 }
 0x142   :  { %832 = vst [vmem:[%s1443_s4 + $0x30] sm:$0xff] %v816_v6  ;;  %v767_v38 = vsub.f32 0.0, %v735_v8  ;;  %v600_v24 = vadd.f32 -0.28449672, %v584_v32  ;;  %v599_v51 = vadd.f32 -0.28449672, %v583_v55  ;;  %v932_v39 = vpop.eup %931  ;;  %935 = vpow2.f32 %v712_v26 }
 0x143   :  { %v737_v22 = vsub.f32 1.0, %v721_v9  ;;  %v646_v35 = vmul.f32 %v1363_v61, %v630_v13  ;;  %v569_v61 = vadd.f32 1.4214138, %v553_v47  ;;  %v934_v7 = vpop.eup %933  ;;  %v406_v54 = vmul.f32 0.5, %v1300_v17 }
 0x144   :  { %v783_v23 = vsel %vm751_vm11, %v767_v38, %v735_v8  ;;  %v616_v4 = vmul.f32 %v1373_v30, %v600_v24  ;;  %v615_v50 = vmul.f32 %v1379_v27, %v599_v51  ;;  %v408_v17 = vmul.f32 0.5, %v1314_v19 }
 0x145   :  { %v799_v45 = vadd.f32 1.0, %v783_v23  ;;  %v769_v12 = vsub.f32 0.0, %v737_v22  ;;  %v726_v31 = vmul.f32 %v930_v34, %v646_v35  ;;  %v585_v58 = vmul.f32 %v1390_v49, %v569_v61 }
 0x146   :  { %v632_v44 = vadd.f32 0.2548296, %v616_v4  ;;  %v631_v18 = vadd.f32 0.2548296, %v615_v50  ;;  %vm759_vm15 = vcmp.lt.f32.partialorder %v1339_v36, 0.0  ;;  %v407_v5 = vmul.f32 0.5, %v1325_v15 }
 0x147   :  { %v815_v43 = vmul.f32 %v799_v45, %v399_v33  ;;  %v785_v53 = vsel %vm753_vm12, %v769_v12, %v737_v22  ;;  %v742_v52 = vsub.f32 1.0, %v726_v31  ;;  %v601_v10 = vadd.f32 -0.28449672, %v585_v58 }
 0x148   :  { %v801_v59 = vadd.f32 1.0, %v785_v53  ;;  %v648_v11 = vmul.f32 %v1373_v30, %v632_v44  ;;  %v647_v3 = vmul.f32 %v1379_v27, %v631_v18  ;;  %vm761_vm0 = vcmp.lt.f32.partialorder %v1351_v42, 0.0 }
 0x149   :  { %831 = vst [vmem:[%s1443_s4 + $0x28] sm:$0xff] %v815_v43  ;;  %v774_v62 = vsub.f32 0.0, %v742_v52  ;;  %v617_v21 = vmul.f32 %v1390_v49, %v601_v10  ;;  %v409_v36 = vmul.f32 0.5, %v1341_v40 }
 0x14a   :  { %v817_v1 = vmul.f32 %v801_v59, %v401_v60  ;;  %v728_v63 = vmul.f32 %v932_v39, %v648_v11  ;;  %v727_v56 = vmul.f32 %v934_v7, %v647_v3 }
 0x14b   :  { %v790_v2 = vsel %vm758_vm13, %v774_v62, %v742_v52  ;;  %v633_v16 = vadd.f32 0.2548296, %v617_v21 }
 0x14c   :  { %833 = vst [vmem:[%s1443_s4 + $0x38] sm:$0xff] %v817_v1  ;;  %v806_v30 = vadd.f32 1.0, %v790_v2  ;;  %v744_v37 = vsub.f32 1.0, %v728_v63  ;;  %v743_v0 = vsub.f32 1.0, %v727_v56  ;;  %v936_v46 = vpop.eup %935 }
 0x14d   :  { %v649_v27 = vmul.f32 %v1390_v49, %v633_v16 }
 0x14e   :  { %v822_v28 = vmul.f32 %v806_v30, %v406_v54  ;;  %v776_v29 = vsub.f32 0.0, %v744_v37  ;;  %v775_v8 = vsub.f32 0.0, %v743_v0 }
 0x14f   :  { %v729_v14 = vmul.f32 %v936_v46, %v649_v27 }
 0x150   :  { %838 = vst [vmem:[%s1443_s4 + $0x60] sm:$0xff] %v822_v28  ;;  %v792_v41 = vsel %vm760_vm14, %v776_v29, %v744_v37  ;;  %v791_v33 = vsel %vm759_vm15, %v775_v8, %v743_v0 }
 0x151   :  { %v808_v6 = vadd.f32 1.0, %v792_v41  ;;  %v807_v9 = vadd.f32 1.0, %v791_v33  ;;  %v745_v32 = vsub.f32 1.0, %v729_v14 }
 0x153   :  { %v824_v57 = vmul.f32 %v808_v6, %v408_v17  ;;  %v823_v20 = vmul.f32 %v807_v9, %v407_v5  ;;  %v777_v49 = vsub.f32 0.0, %v745_v32 }
 0x155   :  { %840 = vst [vmem:[%s1443_s4 + $0x70] sm:$0xff] %v824_v57  ;;  %839 = vst [vmem:[%s1443_s4 + $0x68] sm:$0xff] %v823_v20  ;;  %v793_v19 = vsel %vm761_vm0, %v777_v49, %v745_v32 }
 0x156   :  { %v809_v38 = vadd.f32 1.0, %v793_v19 }
 0x158   :  { %v825_v13 = vmul.f32 %v809_v38, %v409_v36 }
 0x15a   :  { %841 = vst [vmem:[%s1443_s4 + $0x78] sm:$0xff] %v825_v13 }

// kernel: ronn_cell_forward.13
= control target key start
LH: loop header
LB: loop body
LE: loop exit
PB: predicated region body
PF: predicated region fallthrough
CT: control target
= control target key end

     0   :  { %14 = vsyncpa [#allocation3], 0  ;;  %s5759_s0 = inlined_call_operand.vmem [shape: f32[16,1024], index: 0, kind: input, shape index: {}]   ;;  %s5760_s1 = inlined_call_operand.vmem [shape: f32[16,1024], index: 1, kind: input, shape index: {}]   ;;  %s5761_s2 = inlined_call_operand.vmem [shape: f32[16,16], index: 2, kind: input, shape index: {}]   ;;  %s5762_s3 = inlined_call_operand.vmem [shape: f32[16,1], index: 3, kind: input, shape index: {}]   ;;  %s5763_s4 = inlined_call_operand.vmem [shape: f32[64,16], index: 4, kind: input, shape index: {}]   ;;  %s5764_s5 = inlined_call_operand.vmem [shape: f32[64,1], index: 5, kind: input, shape index: {}]   ;;  %s5765_s6 = inlined_call_operand.vmem [shape: f32[2,64], index: 6, kind: input, shape index: {}]   ;;  %s5766_s7 = inlined_call_operand.vmem [shape: f32[2,1], index: 7, kind: input, shape index: {}]   ;;  %s5767_s8 = inlined_call_operand.vmem [shape: f32[1,4], index: 8, kind: input, shape index: {}]   ;;  %s5768_s9 = inlined_call_operand.vmem [shape: f32[2,256], index: 9, kind: output, shape index: {}]  }
   0x1   :  { %s37_s11 = sshll.u32 %s5767_s8, 4  ;;  %s38_s11 = int_to_ptr.vmem [resolvable:$true] %s37_s11 }
   0x2   :  { %s3421_s12 = scalar_lea.vmem %s38_s11, 16  ;;  %p3426_p1 = scmp.lt.s32.totalorder %s38_s11, %s38_s11 }
   0x3   :  { %p3422_p0 = scmp.ne.s32.totalorder %s38_s11, %s3421_s12  ;;  %p3427_p2 = scmp.lt.s32.totalorder %s3421_s12, %s3421_s12 }
   0x5   :  { %p3428_p3 = por %p3427_p2, %p3426_p1 }
   0x7   :  { %p3429_p4 = pnand %p3428_p3, %p3422_p0 }
   0x9   :  { %3432 = shalt.err (!%p3429_p4)
}
   0xa   :  { %s3435_s13 = smov [#allocation2]  }
   0xb   :  { %40 = dma.vmem_to_smem %s38_s11, 16, %s3435_s13, [#allocation3]  }
   0xc   :  { %3433 = dma.done.wait [#allocation3], 16  }
   0xd   :  { %3434 = vsyncadd [#allocation3], 4294967280 }
   0xe   :  { %44 = sfence }
   0xf   :  { %v48_v0 = vld [vmem:[%s5759_s0 + $0x8] sm:$0xff]  ;;  %v50_v2 = vld [vmem:[%s5759_s0 + $0x18] sm:$0xff]  ;;  %v47_v5 = vld [vmem:[%s5759_s0] sm:$0xff]  ;;  %v5769_v7 = vmov 0.0   ;;  %v3437_v12 = vmov 0   ;;  %vm75_vm0 = vcmask 130048  }
  0x10   :  { %v56_v1 = vld [vmem:[%s5759_s0 + $0x48] sm:$0xff]  ;;  %v58_v4 = vld [vmem:[%s5759_s0 + $0x58] sm:$0xff]  ;;  %v55_v6 = vld [vmem:[%s5759_s0 + $0x40] sm:$0xff]  ;;  %146 = vmatprep.mubr.f32.mxu0 %v5769_v7  ;;  %223 = vmatprep.mubr.f32.mxu1 %v5769_v7  ;;  %s3060_s18 = sld [smem:[#allocation2 + $0x1]]  ;;  %s3061_s19 = sld [smem:[#allocation2 + $0x2]] }
  0x11   :  { %v3064_v3 = vpack.c.bf16 %v56_v1, %v48_v0  ;;  %v3068_v8 = vpack.c.bf16 %v58_v4, %v50_v2  ;;  %v3066_v9 = vpack.c.bf16 %v55_v6, %v47_v5  ;;  %v49_v10 = vld [vmem:[%s5759_s0 + $0x10] sm:$0xff]  ;;  %3163 = vset.pattern.permute.xlu0 %v3437_v12  ;;  %3164 = vset.pattern.permute.xlu1 %v3437_v12  ;;  %v45_v14 = vld [vmem:[%s5761_s2] sm:$0xff]  ;;  %v52_v15 = vld [vmem:[%s5759_s0 + $0x28] sm:$0xff]  ;;  %s3062_s20 = sld [smem:[#allocation2 + $0x3]] }
  0x12   :  { %v57_v11 = vld [vmem:[%s5759_s0 + $0x50] sm:$0xff]  ;;  %v60_v16 = vld [vmem:[%s5759_s0 + $0x68] sm:$0xff]  ;;  %v54_v18 = vld [vmem:[%s5759_s0 + $0x38] sm:$0xff] }
  0x13   :  { %3065 = vmatprep.subr.bf16.mxu0 %v3064_v3  ;;  %v3070_v13 = vpack.c.bf16 %v57_v11, %v49_v10  ;;  %3069 = vmatprep.subr.bf16.mxu1 %v3068_v8  ;;  %v3072_v17 = vpack.c.bf16 %v60_v16, %v52_v15  ;;  %v62_v19 = vld [vmem:[%s5759_s0 + $0x78] sm:$0xff]  ;;  %v51_v20 = vld [vmem:[%s5759_s0 + $0x20] sm:$0xff]  ;;  %v53_v23 = vld [vmem:[%s5759_s0 + $0x30] sm:$0xff] }
  0x14   :  { %3067 = vmatpush1.bf16.msra.mxu0 %v3066_v9  ;;  %v3076_v21 = vpack.c.bf16 %v62_v19, %v54_v18  ;;  %v59_v22 = vld [vmem:[%s5759_s0 + $0x60] sm:$0xff]  ;;  %v61_v24 = vld [vmem:[%s5759_s0 + $0x70] sm:$0xff]  ;;  %v46_v28 = vld [vmem:[%s5761_s2 + $0x8] sm:$0xff] }
  0x15   :  { %3071 = vmatpush1.bf16.msra.mxu1 %v3070_v13  ;;  %3073 = vmatprep.subr.bf16.mxu0 %v3072_v17  ;;  %v3074_v25 = vpack.c.bf16 %v59_v22, %v51_v20  ;;  %v3078_v26 = vpack.c.bf16 %v61_v24, %v53_v23  ;;  %v63_v27 = vld [vmem:[%s5762_s3] sm:$0xff]  ;;  %v64_v29 = vld [vmem:[%s5762_s3 + $0x8] sm:$0xff]  ;;  %v432_v30 = vld [vmem:[%s5764_s5 + $0x10] sm:$0xff] }
  0x16   :  { %3077 = vmatprep.subr.bf16.mxu1 %v3076_v21  ;;  %67 = vperm.xlu0 %3163, %v63_v27   ;;  %v434_v31 = vld [vmem:[%s5764_s5 + $0x20] sm:$0xff]  ;;  %v436_v32 = vld [vmem:[%s5764_s5 + $0x30] sm:$0xff]  ;;  %v431_v35 = vld [vmem:[%s5764_s5 + $0x8] sm:$0xff] }
  0x17   :  { %3016 = vmatmul.mubr.msk.f32.vlgmr.msra.gmra.mrb[0].mxu0 %vm75_vm0, %v45_v14  ;;  %v2683_v33 = vld [vmem:[%s5766_s7] sm:$0x3]  ;;  %v433_v36 = vld [vmem:[%s5764_s5 + $0x18] sm:$0xff]  ;;  %v435_v37 = vld [vmem:[%s5764_s5 + $0x28] sm:$0xff] }
  0x18   :  { %3018 = vmatmul.mubr.msk.f32.vlgmr.msra.gmra.mrb[0].mxu1 %vm75_vm0, %v45_v14  ;;  %152 = vmatprep.mubr.f32.mxu0 %v5769_v7  ;;  %v430_v34 = vld [vmem:[%s5764_s5] sm:$0xff]  ;;  %v437_v38 = vld [vmem:[%s5764_s5 + $0x38] sm:$0xff]  ;;  %v392_v48 = vld [vmem:[%s5760_s1 + $0x10] sm:$0xff] }
  0x19   :  { %229 = vmatprep.mubr.f32.mxu1 %v5769_v7  ;;  %3075 = vmatpush1.bf16.msra.mxu0 %v3074_v25  ;;  %v390_v46 = vld [vmem:[%s5760_s1] sm:$0xff]  ;;  %v391_v52 = vld [vmem:[%s5760_s1 + $0x8] sm:$0xff]  ;;  %v400_v56 = vld [vmem:[%s5760_s1 + $0x50] sm:$0xff] }
  0x1a   :  { %3079 = vmatpush1.bf16.msra.mxu1 %v3078_v26  ;;  %72 = vperm.xlu0 %3163, %v64_v29   ;;  %v398_v51 = vld [vmem:[%s5760_s1 + $0x40] sm:$0xff]  ;;  %v399_v58 = vld [vmem:[%s5760_s1 + $0x48] sm:$0xff]  ;;  %v393_v59 = vld [vmem:[%s5760_s1 + $0x18] sm:$0xff] }
  0x1b   :  { %3017 = vmatmul.mubr.msk.f32.gmra.mrb[2].mxu0 %vm75_vm0, %v46_v28  ;;  %440 = vperm.xlu1 %3164, %v430_v34   ;;  %v401_v63 = vld [vmem:[%s5760_s1 + $0x58] sm:$0xff]  ;;  %v394_v18 = vld [vmem:[%s5760_s1 + $0x20] sm:$0xff]  ;;  %v396_v21 = vld [vmem:[%s5760_s1 + $0x30] sm:$0xff] }
  0x1c   :  { %3019 = vmatmul.mubr.msk.f32.gmra.mrb[2].mxu1 %vm75_vm0, %v46_v28  ;;  %300 = vmatprep.mubr.f32.mxu0 %v5769_v7  ;;  %v395_v23 = vld [vmem:[%s5760_s1 + $0x28] sm:$0xff]  ;;  %v402_v25 = vld [vmem:[%s5760_s1 + $0x60] sm:$0xff]  ;;  %v404_v29 = vld [vmem:[%s5760_s1 + $0x70] sm:$0xff] }
  0x1d   :  { %377 = vmatprep.mubr.f32.mxu1 %v5769_v7 }
  0x1e   :  { %450 = vperm.xlu0 %3163, %v432_v30  }
  0x1f   :  { %3020 = vmatmul.mubr.msk.f32.vlgmr.msra.gmra.mrb[4].mxu0 %vm75_vm0, %v45_v14  ;;  %445 = vperm.xlu1 %3164, %v431_v35  }
  0x20   :  { %3022 = vmatmul.mubr.msk.f32.vlgmr.msra.gmra.mrb[4].mxu1 %vm75_vm0, %v45_v14  ;;  %306 = vmatprep.mubr.f32.mxu0 %v5769_v7 }
  0x21   :  { %383 = vmatprep.mubr.f32.mxu1 %v5769_v7 }
  0x22   :  { %460 = vperm.xlu0 %3163, %v434_v31   ;;  %v403_v31 = vld [vmem:[%s5760_s1 + $0x68] sm:$0xff] }
  0x23   :  { %3021 = vmatmul.mubr.msk.f32.gmra.mrb[6].mxu0 %vm75_vm0, %v46_v28  ;;  %455 = vperm.xlu1 %3164, %v433_v36  }
  0x24   :  { %3023 = vmatmul.mubr.msk.f32.gmra.mrb[6].mxu1 %vm75_vm0, %v46_v28  ;;  %566 = vmatprep.mubr.f32.mxu0 %v5769_v7 }
  0x25   :  { %679 = vmatprep.mubr.f32.mxu1 %v5769_v7 }
  0x26   :  { %470 = vperm.xlu0 %3163, %v436_v32   ;;  %v3641_v32 = vld [vmem:[%s5763_s4] sm:$0xff] }
  0x27   :  { %465 = vperm.xlu1 %3164, %v435_v37   ;;  %v405_v37 = vld [vmem:[%s5760_s1 + $0x78] sm:$0xff] }
  0x2a   :  { %2686 = vperm.xlu0 %3163, %v2683_v33   ;;  %v397_v33 = vld [vmem:[%s5760_s1 + $0x38] sm:$0xff] }
  0x2b   :  { %475 = vperm.xlu1 %3164, %v437_v38  }
  0x95   :  { %v68_v39 = vpop.permute.xlu0 %67 }
  0x99   :  { %v73_v45 = vpop.permute.xlu0 %72 }
  0xea   :  { %v148_v40 = vpop.f32.mrb[0].mxu0 }
  0xeb   :  { %v225_v41 = vpop.f32.mrb[0].mxu1  ;;  %v150_v42 = vpop.f32.mrb[1].mxu0  ;;  %v149_v44 = vadd.f32 %v148_v40, %v68_v39 }
  0xec   :  { %v227_v43 = vpop.f32.mrb[1].mxu1  ;;  %v226_v47 = vadd.f32 %v225_v41, %v68_v39  ;;  %v151_v49 = vadd.f32 %v150_v42, %v68_v39 }
  0xed   :  { %v228_v53 = vadd.f32 %v227_v43, %v68_v39  ;;  %v406_v0 = vadd.f32 %v390_v46, %v149_v44 }
  0xee   :  { %v154_v50 = vpop.f32.mrb[2].mxu0  ;;  %v408_v3 = vadd.f32 %v392_v48, %v226_v47  ;;  %v407_v4 = vadd.f32 %v391_v52, %v151_v49  ;;  %v423_v49 = vld [vmem:[%s5763_s4 + $0x8] sm:$0xff]  ;;  %v424_v52 = vld [vmem:[%s5763_s4 + $0x10] sm:$0xff] }
  0xef   :  { %v155_v54 = vadd.f32 %v154_v50, %v73_v45  ;;  %v231_v55 = vpop.f32.mrb[2].mxu1  ;;  %v156_v57 = vpop.f32.mrb[3].mxu0  ;;  %v409_v9 = vadd.f32 %v393_v59, %v228_v53  ;;  %v425_v53 = vld [vmem:[%s5763_s4 + $0x18] sm:$0xff] }
  0xf0   :  { %v232_v60 = vadd.f32 %v231_v55, %v73_v45  ;;  %v157_v61 = vadd.f32 %v156_v57, %v73_v45  ;;  %v233_v62 = vpop.f32.mrb[3].mxu1  ;;  %v427_v55 = vld [vmem:[%s5763_s4 + $0x28] sm:$0xff]  ;;  %v429_v57 = vld [vmem:[%s5763_s4 + $0x38] sm:$0xff] }
  0xf1   :  { %v414_v1 = vadd.f32 %v398_v51, %v155_v54  ;;  %v234_v2 = vadd.f32 %v233_v62, %v73_v45  ;;  %v426_v54 = vld [vmem:[%s5763_s4 + $0x20] sm:$0xff] }
  0xf2   :  { %v416_v5 = vadd.f32 %v400_v56, %v232_v60  ;;  %v415_v6 = vadd.f32 %v399_v58, %v157_v61  ;;  %v302_v8 = vpop.f32.mrb[4].mxu0  ;;  %v428_v56 = vld [vmem:[%s5763_s4 + $0x30] sm:$0xff]  ;;  %v3738_v58 = vpop.permute.xlu1 %440 }
  0xf3   :  { %v3082_v10 = vpack.c.bf16 %v414_v1, %v406_v0  ;;  %v417_v11 = vadd.f32 %v401_v63, %v234_v2  ;;  %v379_v12 = vpop.f32.mrb[4].mxu1  ;;  %v304_v13 = vpop.f32.mrb[5].mxu0  ;;  %v303_v17 = vadd.f32 %v302_v8, %v68_v39  ;;  %5828 = vst [vmem:[#allocation5_spill] sm:$0xff] %v3738_v58 }
  0xf4   :  { %v3086_v14 = vpack.c.bf16 %v416_v5, %v408_v3  ;;  %v381_v15 = vpop.f32.mrb[5].mxu1  ;;  %v3080_v16 = vpack.c.bf16 %v415_v6, %v407_v4  ;;  %v380_v20 = vadd.f32 %v379_v12, %v68_v39  ;;  %v305_v22 = vadd.f32 %v304_v13, %v68_v39 }
  0xf5   :  { %v3084_v19 = vpack.c.bf16 %v417_v11, %v409_v9  ;;  %v382_v26 = vadd.f32 %v381_v15, %v68_v39  ;;  %v410_v38 = vadd.f32 %v394_v18, %v303_v17 }
  0xf6   :  { %v308_v24 = vpop.f32.mrb[6].mxu0  ;;  %3081 = vmatprep.subr.bf16.mxu0 %v3080_v16  ;;  %v412_v41 = vadd.f32 %v396_v21, %v380_v20  ;;  %v411_v42 = vadd.f32 %v395_v23, %v305_v22  ;;  %v3763_v11 = vpop.permute.xlu1 %445 }
  0xf7   :  { %v309_v27 = vadd.f32 %v308_v24, %v73_v45  ;;  %v385_v28 = vpop.f32.mrb[6].mxu1  ;;  %3085 = vmatprep.subr.bf16.mxu1 %v3084_v19  ;;  %v310_v30 = vpop.f32.mrb[7].mxu0  ;;  %3083 = vmatpush1.bf16.msra.mxu0 %v3082_v10  ;;  %v413_v46 = vadd.f32 %v397_v33, %v382_v26  ;;  %5829 = vst [vmem:[#allocation6_spill] sm:$0xff] %v3763_v11 }
  0xf8   :  { %v386_v34 = vadd.f32 %v385_v28, %v73_v45  ;;  %v311_v35 = vadd.f32 %v310_v30, %v73_v45  ;;  %v387_v36 = vpop.f32.mrb[7].mxu1  ;;  %3087 = vmatpush1.bf16.msra.mxu1 %v3086_v14 }
  0xf9   :  { %v418_v39 = vadd.f32 %v402_v25, %v309_v27  ;;  %v388_v40 = vadd.f32 %v387_v36, %v73_v45 }
  0xfa   :  { %v420_v43 = vadd.f32 %v404_v29, %v386_v34  ;;  %v419_v44 = vadd.f32 %v403_v31, %v311_v35  ;;  %3024 = vmatmul.mubr.msk.f32.vlgmr.msra.gmra.mrb[8].mxu0 %vm75_vm0, %v3641_v32 }
  0xfb   :  { %v3090_v47 = vpack.c.bf16 %v418_v39, %v410_v38  ;;  %v421_v48 = vadd.f32 %v405_v37, %v388_v40  ;;  %3032 = vmatmul.mubr.msk.f32.vlgmr.msra.gmra.mrb[8].mxu1 %vm75_vm0, %v3641_v32  ;;  %572 = vmatprep.mubr.f32.mxu0 %v5769_v7 }
  0xfc   :  { %v3094_v45 = vpack.c.bf16 %v420_v43, %v412_v41  ;;  %685 = vmatprep.mubr.f32.mxu1 %v5769_v7  ;;  %v3088_v50 = vpack.c.bf16 %v419_v44, %v411_v42 }
  0xfd   :  { %v3092_v51 = vpack.c.bf16 %v421_v48, %v413_v46 }
  0xfe   :  { %3025 = vmatmul.mubr.msk.f32.gmra.mrb[10].mxu0 %vm75_vm0, %v423_v49  ;;  %3089 = vmatprep.subr.bf16.mxu0 %v3088_v50 }
  0xff   :  { %3033 = vmatmul.mubr.msk.f32.gmra.mrb[10].mxu1 %vm75_vm0, %v423_v49  ;;  %3093 = vmatprep.subr.bf16.mxu1 %v3092_v51 }
 0x100   :  { %3091 = vmatpush1.bf16.msra.mxu0 %v3090_v47  ;;  %3095 = vmatpush1.bf16.msra.mxu1 %v3094_v45 }
 0x101   :  { %578 = vmatprep.mubr.f32.mxu0 %v5769_v7  ;;  %691 = vmatprep.mubr.f32.mxu1 %v5769_v7 }
 0x102   :  { %3026 = vmatmul.mubr.msk.f32.gmra.mrb[12].mxu0 %vm75_vm0, %v424_v52 }
 0x103   :  { %3034 = vmatmul.mubr.msk.f32.gmra.mrb[12].mxu1 %vm75_vm0, %v424_v52  ;;  %584 = vmatprep.mubr.f32.mxu0 %v5769_v7 }
 0x104   :  { %697 = vmatprep.mubr.f32.mxu1 %v5769_v7 }
 0x106   :  { %3027 = vmatmul.mubr.msk.f32.gmra.mrb[14].mxu0 %vm75_vm0, %v425_v53 }
 0x107   :  { %3035 = vmatmul.mubr.msk.f32.gmra.mrb[14].mxu1 %vm75_vm0, %v425_v53  ;;  %590 = vmatprep.mubr.f32.mxu0 %v5769_v7 }
 0x108   :  { %703 = vmatprep.mubr.f32.mxu1 %v5769_v7 }
 0x10a   :  { %3028 = vmatmul.mubr.msk.f32.gmra.mrb[16].mxu0 %vm75_vm0, %v426_v54 }
 0x10b   :  { %3036 = vmatmul.mubr.msk.f32.gmra.mrb[16].mxu1 %vm75_vm0, %v426_v54  ;;  %596 = vmatprep.mubr.f32.mxu0 %v5769_v7 }
 0x10c   :  { %709 = vmatprep.mubr.f32.mxu1 %v5769_v7 }
 0x10e   :  { %3029 = vmatmul.mubr.msk.f32.gmra.mrb[18].mxu0 %vm75_vm0, %v427_v55 }
 0x10f   :  { %3037 = vmatmul.mubr.msk.f32.gmra.mrb[18].mxu1 %vm75_vm0, %v427_v55  ;;  %602 = vmatprep.mubr.f32.mxu0 %v5769_v7 }
 0x110   :  { %715 = vmatprep.mubr.f32.mxu1 %v5769_v7 }
 0x112   :  { %3030 = vmatmul.mubr.msk.f32.gmra.mrb[20].mxu0 %vm75_vm0, %v428_v56 }
 0x113   :  { %3038 = vmatmul.mubr.msk.f32.gmra.mrb[20].mxu1 %vm75_vm0, %v428_v56  ;;  %608 = vmatprep.mubr.f32.mxu0 %v5769_v7 }
 0x114   :  { %721 = vmatprep.mubr.f32.mxu1 %v5769_v7 }
 0x116   :  { %3031 = vmatmul.mubr.msk.f32.gmra.mrb[22].mxu0 %vm75_vm0, %v429_v57 }
 0x117   :  { %3039 = vmatmul.mubr.msk.f32.gmra.mrb[22].mxu1 %vm75_vm0, %v429_v57  ;;  %792 = vmatprep.mubr.f32.mxu0 %v5769_v7 }
 0x118   :  { %905 = vmatprep.mubr.f32.mxu1 %v5769_v7 }
 0x11a   :  { %3040 = vmatmul.mubr.msk.f32.vlgmr.msra.gmra.mrb[24].mxu0 %vm75_vm0, %v3641_v32 }
 0x11b   :  { %3048 = vmatmul.mubr.msk.f32.vlgmr.msra.gmra.mrb[24].mxu1 %vm75_vm0, %v3641_v32  ;;  %798 = vmatprep.mubr.f32.mxu0 %v5769_v7 }
 0x11c   :  { %911 = vmatprep.mubr.f32.mxu1 %v5769_v7 }
 0x11e   :  { %3041 = vmatmul.mubr.msk.f32.gmra.mrb[26].mxu0 %vm75_vm0, %v423_v49 }
 0x11f   :  { %3049 = vmatmul.mubr.msk.f32.gmra.mrb[26].mxu1 %vm75_vm0, %v423_v49  ;;  %804 = vmatprep.mubr.f32.mxu0 %v5769_v7 }
 0x120   :  { %917 = vmatprep.mubr.f32.mxu1 %v5769_v7 }
 0x122   :  { %3042 = vmatmul.mubr.msk.f32.gmra.mrb[28].mxu0 %vm75_vm0, %v424_v52 }
 0x123   :  { %3050 = vmatmul.mubr.msk.f32.gmra.mrb[28].mxu1 %vm75_vm0, %v424_v52  ;;  %810 = vmatprep.mubr.f32.mxu0 %v5769_v7 }
 0x124   :  { %923 = vmatprep.mubr.f32.mxu1 %v5769_v7 }
 0x126   :  { %3043 = vmatmul.mubr.msk.f32.gmra.mrb[30].mxu0 %vm75_vm0, %v425_v53 }
 0x127   :  { %3051 = vmatmul.mubr.msk.f32.gmra.mrb[30].mxu1 %vm75_vm0, %v425_v53  ;;  %816 = vmatprep.mubr.f32.mxu0 %v5769_v7 }
 0x128   :  { %929 = vmatprep.mubr.f32.mxu1 %v5769_v7 }
 0x12a   :  { %3044 = vmatmul.mubr.msk.f32.gmra.mrb[32].mxu0 %vm75_vm0, %v426_v54 }
 0x12b   :  { %3052 = vmatmul.mubr.msk.f32.gmra.mrb[32].mxu1 %vm75_vm0, %v426_v54  ;;  %822 = vmatprep.mubr.f32.mxu0 %v5769_v7 }
 0x12c   :  { %935 = vmatprep.mubr.f32.mxu1 %v5769_v7 }
 0x12e   :  { %3045 = vmatmul.mubr.msk.f32.gmra.mrb[34].mxu0 %vm75_vm0, %v427_v55 }
 0x12f   :  { %3053 = vmatmul.mubr.msk.f32.gmra.mrb[34].mxu1 %vm75_vm0, %v427_v55  ;;  %828 = vmatprep.mubr.f32.mxu0 %v5769_v7 }
 0x130   :  { %941 = vmatprep.mubr.f32.mxu1 %v5769_v7 }
 0x132   :  { %3046 = vmatmul.mubr.msk.f32.gmra.mrb[36].mxu0 %vm75_vm0, %v428_v56 }
 0x133   :  { %3054 = vmatmul.mubr.msk.f32.gmra.mrb[36].mxu1 %vm75_vm0, %v428_v56  ;;  %834 = vmatprep.mubr.f32.mxu0 %v5769_v7 }
 0x134   :  { %947 = vmatprep.mubr.f32.mxu1 %v5769_v7 }
 0x136   :  { %3047 = vmatmul.mubr.msk.f32.gmra.mrb[38].mxu0 %vm75_vm0, %v429_v57 }
 0x137   :  { %3055 = vmatmul.mubr.msk.f32.gmra.mrb[38].mxu1 %vm75_vm0, %v429_v57  ;;  %2757 = vmatprep.mubr.f32.mxu0 %v5769_v7 }
 0x138   :  { %2828 = vmatprep.mubr.f32.mxu1 %v5769_v7 }
 0x1cd   :  { %v568_v59 = vpop.f32.mrb[8].mxu0 }
 0x1ce   :  { %v3741_v60 = vadd.f32 %v568_v59, %v3738_v58  ;;  %v681_v61 = vpop.f32.mrb[8].mxu1  ;;  %v570_v62 = vpop.f32.mrb[9].mxu0 }
 0x1cf   :  { %v3744_v63 = vadd.f32 %v681_v61, %v3738_v58  ;;  %v3747_v0 = vadd.f32 %v570_v62, %v3738_v58  ;;  %v683_v1 = vpop.f32.mrb[9].mxu1  ;;  %v3825_v62 = vpop.permute.xlu0 %450 }
 0x1d0   :  { %v3750_v2 = vmul.f32 0.70710677, %v3741_v60  ;;  %v3761_v9 = vadd.f32 %v683_v1, %v3738_v58  ;;  %5834 = vst [vmem:[#allocation11_spill] sm:$0xff] %v3825_v62 }
 0x1d1   :  { %v3753_v3 = vmul.f32 0.70710677, %v3744_v63  ;;  %v3757_v5 = vmul.f32 0.70710677, %v3747_v0  ;;  %v574_v14 = vpop.f32.mrb[10].mxu0 }
 0x1d2   :  { %v1082_v4 = vand.u32 2147483647, %v3750_v2  ;;  %v687_v15 = vpop.f32.mrb[10].mxu1  ;;  %v576_v17 = vpop.f32.mrb[11].mxu0  ;;  %v3771_v19 = vmul.f32 0.70710677, %v3761_v9  ;;  %v3776_v22 = vadd.f32 %v574_v14, %v3763_v11 }
 0x1d3   :  { %v1084_v6 = vand.u32 2147483647, %v3753_v3  ;;  %v3766_v13 = vand.u32 2147483647, %v3757_v5  ;;  %v3768_v18 = vpop.f32.mrb[11].mxu1  ;;  %v3784_v26 = vadd.f32 %v687_v15, %v3763_v11  ;;  %v3823_v61 = vadd.f32 %v576_v17, %v3763_v11 }
 0x1d4   :  { %v1146_v8 = vmul.f32 0.3275911, %v1082_v4  ;;  %v3791_v29 = vmul.f32 0.70710677, %v3776_v22  ;;  %v3798_v32 = vand.u32 2147483647, %v3771_v19 }
 0x1d5   :  { %v1148_v10 = vmul.f32 0.3275911, %v1084_v6  ;;  %v580_v20 = vpop.f32.mrb[12].mxu0  ;;  %v1147_v25 = vmul.f32 0.3275911, %v3766_v13  ;;  %v1978_v40 = vsub.f32 0.0, %v1082_v4 }
 0x1d6   :  { %v1210_v12 = vadd.f32 1.0, %v1146_v8  ;;  %v3773_v21 = vpop.f32.mrb[12].mxu1  ;;  %v3778_v23 = vpop.f32.mrb[13].mxu0  ;;  %v3801_v33 = vmul.f32 0.70710677, %v3784_v26  ;;  %v1980_v41 = vsub.f32 0.0, %v1084_v6  ;;  %v3834_v15 = vadd.f32 %v580_v20, %v3825_v62 }
 0x1d7   :  { %v1212_v16 = vadd.f32 1.0, %v1148_v10  ;;  %v3780_v24 = vpop.f32.mrb[13].mxu1  ;;  %v1090_v34 = vand.u32 2147483647, %v3791_v29  ;;  %v1211_v36 = vadd.f32 1.0, %v1147_v25  ;;  %v2042_v54 = vmul.f32 %v1978_v40, %v1082_v4 }
 0x1d8   :  { %3165 = vrcp.f32 %v1210_v12  ;;  %v1092_v37 = vand.u32 2147483647, %v3801_v33  ;;  %v1149_v44 = vmul.f32 0.3275911, %v3798_v32  ;;  %v2044_v55 = vmul.f32 %v1980_v41, %v1084_v6 }
 0x1d9   :  { %3167 = vrcp.f32 %v1212_v16  ;;  %v3786_v27 = vpop.f32.mrb[14].mxu0  ;;  %v1154_v42 = vmul.f32 0.3275911, %v1090_v34  ;;  %v2106_v6 = vmul.f32 1.442695, %v2042_v54  ;;  %v1986_v40 = vsub.f32 0.0, %v1090_v34 }
 0x1da   :  { %v3788_v28 = vpop.f32.mrb[14].mxu1  ;;  %v3793_v30 = vpop.f32.mrb[15].mxu0  ;;  %v1156_v46 = vmul.f32 0.3275911, %v1092_v37  ;;  %3169 = vrcp.f32 %v1211_v36  ;;  %v1213_v59 = vadd.f32 1.0, %v1149_v44  ;;  %vm2362_vm1 = vcmp.lt.f32.partialorder %v3750_v2, 0.0 }
 0x1db   :  { %v3795_v31 = vpop.f32.mrb[15].mxu1  ;;  %v1218_v47 = vadd.f32 1.0, %v1154_v42  ;;  %v2110_v25 = vmul.f32 1.442695, %v2044_v55  ;;  %v3837_v17 = vmul.f32 0.70710677, %v3823_v61 }
 0x1dc   :  { %v1220_v45 = vadd.f32 1.0, %v1156_v46  ;;  %v1988_v42 = vsub.f32 0.0, %v1092_v37  ;;  %v3841_v46 = vadd.f32 %v3768_v18, %v3763_v11  ;;  %vm2364_vm2 = vcmp.lt.f32.partialorder %v3753_v3, 0.0 }
 0x1dd   :  { %v3804_v35 = vpop.f32.mrb[16].mxu0  ;;  %3171 = vrcp.f32 %v1218_v47  ;;  %v3844_v47 = vmul.f32 0.70710677, %v3834_v15  ;;  %vm2370_vm3 = vcmp.lt.f32.partialorder %v3791_v29, 0.0  ;;  %vm2372_vm4 = vcmp.lt.f32.partialorder %v3801_v33, 0.0 }
 0x1de   :  { %v3807_v38 = vpop.f32.mrb[16].mxu1  ;;  %v3809_v39 = vpop.f32.mrb[17].mxu0  ;;  %3173 = vrcp.f32 %v1220_v45  ;;  %vm2363_vm5 = vcmp.lt.f32.partialorder %v3757_v5, 0.0  ;;  %vm2365_vm6 = vcmp.lt.f32.partialorder %v3771_v19, 0.0  ;;  %vm2371_vm7 = vcmp.lt.f32.partialorder %v3837_v17, 0.0 }
 0x1df   :  { %v3811_v43 = vpop.f32.mrb[17].mxu1  ;;  %3175 = vrcp.f32 %v1213_v59  ;;  %vm2378_vm8 = vcmp.lt.f32.partialorder %v3844_v47, 0.0 }
 0x1e0   :  { %3177 = vpow2.f32 %v2106_v6 }
 0x1e1   :  { %v3814_v48 = vpop.f32.mrb[18].mxu0  ;;  %3179 = vpow2.f32 %v2110_v25 }
 0x1e2   :  { %5830 = vst [vmem:[#allocation7_spill] sm:$0xff] %v3814_v48  ;;  %v3166_v49 = vpop.eup %3165  ;;  %v3816_v50 = vpop.f32.mrb[18].mxu1 }
 0x1e3   :  { %5831 = vst [vmem:[#allocation8_spill] sm:$0xff] %v3816_v50  ;;  %v3818_v51 = vpop.f32.mrb[19].mxu0  ;;  %v3168_v52 = vpop.eup %3167  ;;  %v1402_v53 = vmul.f32 1.0614054, %v3166_v49 }
 0x1e4   :  { %5832 = vst [vmem:[#allocation9_spill] sm:$0xff] %v3818_v51  ;;  %v3820_v56 = vpop.f32.mrb[19].mxu1  ;;  %v1404_v57 = vmul.f32 1.0614054, %v3168_v52  ;;  %v3846_v20 = vpop.eup %3169 }
 0x1e5   :  { %5833 = vst [vmem:[#allocation10_spill] sm:$0xff] %v3820_v56  ;;  %v1466_v1 = vadd.f32 -1.4531521, %v1402_v53  ;;  %v3827_v8 = vpop.f32.mrb[20].mxu0  ;;  %v3849_v53 = vand.u32 2147483647, %v3837_v17 }
 0x1e6   :  { %5835 = vst [vmem:[#allocation12_spill] sm:$0xff] %v3827_v8  ;;  %v1468_v10 = vadd.f32 -1.4531521, %v1404_v57  ;;  %v3829_v12 = vpop.f32.mrb[20].mxu1  ;;  %v3831_v14 = vpop.f32.mrb[21].mxu0  ;;  %v2050_v57 = vmul.f32 %v1986_v40, %v1090_v34 }
 0x1e7   :  { %5836 = vst [vmem:[#allocation13_spill] sm:$0xff] %v3829_v12  ;;  %5837 = vst [vmem:[#allocation14_spill] sm:$0xff] %v3831_v14  ;;  %v1530_v4 = vmul.f32 %v3166_v49, %v1466_v1  ;;  %v3172_v54 = vpop.eup %3171  ;;  %v1155_v34 = vmul.f32 0.3275911, %v3849_v53 }
 0x1e8   :  { %v1532_v16 = vmul.f32 %v3168_v52, %v1468_v10  ;;  %v3851_v59 = vpop.eup %3173  ;;  %v1410_v10 = vmul.f32 1.0614054, %v3172_v54 }
 0x1e9   :  { %v1594_v36 = vadd.f32 1.4214138, %v1530_v4  ;;  %v2052_v4 = vmul.f32 %v1988_v42, %v1092_v37  ;;  %v1412_v6 = vmul.f32 1.0614054, %v3851_v59  ;;  %v3862_v11 = vpop.eup %3175 }
 0x1ea   :  { %v1596_v41 = vadd.f32 1.4214138, %v1532_v16  ;;  %v3855_v16 = vmul.f32 0.70710677, %v3841_v46  ;;  %v1474_v7 = vadd.f32 -1.4531521, %v1410_v10  ;;  %v3178_v51 = vpop.eup %3177 }
 0x1eb   :  { %v1658_v44 = vmul.f32 %v3166_v49, %v1594_v36  ;;  %v3858_v36 = vand.u32 2147483647, %v3844_v47 }
 0x1ec   :  { %v1660_v45 = vmul.f32 %v3168_v52, %v1596_v41  ;;  %v1403_v41 = vmul.f32 1.0614054, %v3846_v20  ;;  %v1538_v42 = vmul.f32 %v3172_v54, %v1474_v7  ;;  %v3867_v10 = vand.u32 2147483647, %v3855_v16  ;;  %v3180_v7 = vpop.eup %3179 }
 0x1ed   :  { %v1722_v55 = vadd.f32 -0.28449672, %v1658_v44  ;;  %v2122_v44 = vmul.f32 1.442695, %v2050_v57  ;;  %v1162_v12 = vmul.f32 0.3275911, %v3858_v36 }
 0x1ee   :  { %v1724_v1 = vadd.f32 -0.28449672, %v1660_v45  ;;  %v1476_v45 = vadd.f32 -1.4531521, %v1412_v6  ;;  %v1602_v56 = vadd.f32 1.4214138, %v1538_v42 }
 0x1ef   :  { %v1786_v18 = vmul.f32 %v3166_v49, %v1722_v55  ;;  %v2126_v55 = vmul.f32 1.442695, %v2052_v4  ;;  %v1405_v57 = vmul.f32 1.0614054, %v3862_v11  ;;  %3181 = vpow2.f32 %v2122_v44 }
 0x1f0   :  { %v1788_v25 = vmul.f32 %v3168_v52, %v1724_v1  ;;  %v1540_v14 = vmul.f32 %v3851_v59, %v1476_v45  ;;  %v1467_v1 = vadd.f32 -1.4531521, %v1403_v41  ;;  %v1219_v6 = vadd.f32 1.0, %v1155_v34 }
 0x1f1   :  { %v1850_v40 = vadd.f32 0.2548296, %v1786_v18  ;;  %v1666_v4 = vmul.f32 %v3172_v54, %v1602_v56  ;;  %3183 = vpow2.f32 %v2126_v55  ;;  %v1226_v41 = vadd.f32 1.0, %v1162_v12 }
 0x1f2   :  { %v1852_v37 = vadd.f32 0.2548296, %v1788_v25  ;;  %v1604_v18 = vadd.f32 1.4214138, %v1540_v14  ;;  %v3870_v25 = vpop.f32.mrb[21].mxu1  ;;  %v1531_v42 = vmul.f32 %v3846_v20, %v1467_v1  ;;  %3185 = vrcp.f32 %v1219_v6 }
 0x1f3   :  { %v1914_v58 = vmul.f32 %v3166_v49, %v1850_v40  ;;  %5838 = vst [vmem:[#allocation15_spill] sm:$0xff] %v3870_v25  ;;  %v1730_v45 = vadd.f32 -0.28449672, %v1666_v4  ;;  %v1469_v50 = vadd.f32 -1.4531521, %v1405_v57  ;;  %v1979_v25 = vsub.f32 0.0, %v3766_v13 }
 0x1f4   :  { %v1916_v8 = vmul.f32 %v3168_v52, %v1852_v37  ;;  %v1668_v52 = vmul.f32 %v3851_v59, %v1604_v18  ;;  %v1157_v37 = vmul.f32 0.3275911, %v3867_v10  ;;  %3187 = vrcp.f32 %v1226_v41 }
 0x1f5   :  { %v2234_v49 = vmul.f32 %v3178_v51, %v1914_v58  ;;  %v1794_v34 = vmul.f32 %v3172_v54, %v1730_v45  ;;  %v1595_v56 = vadd.f32 1.4214138, %v1531_v42  ;;  %v1981_v1 = vsub.f32 0.0, %v3798_v32 }
 0x1f6   :  { %v2236_v40 = vmul.f32 %v3180_v7, %v1916_v8  ;;  %v1732_v48 = vadd.f32 -0.28449672, %v1668_v52  ;;  %v1533_v8 = vmul.f32 %v3862_v11, %v1469_v50  ;;  %v1221_v55 = vadd.f32 1.0, %v1157_v37  ;;  %v3884_v52 = vpop.f32.mrb[22].mxu1 }
 0x1f7   :  { %v2298_v14 = vsub.f32 1.0, %v2234_v49  ;;  %v1858_v51 = vadd.f32 0.2548296, %v1794_v34  ;;  %v954_v6 = vmul.f32 0.5, %v3741_v60  ;;  %v2043_v4 = vmul.f32 %v1979_v25, %v3766_v13  ;;  %5840 = vst [vmem:[#allocation17_spill] sm:$0xff] %v3884_v52 }
 0x1f8   :  { %v2300_v44 = vsub.f32 1.0, %v2236_v40  ;;  %v1796_v58 = vmul.f32 %v3851_v59, %v1732_v48  ;;  %v3882_v48 = vpop.f32.mrb[22].mxu0  ;;  %v956_v50 = vmul.f32 0.5, %v3744_v63  ;;  %v1659_v60 = vmul.f32 %v3846_v20, %v1595_v56 }
 0x1f9   :  { %v2426_v18 = vsub.f32 0.0, %v2298_v14  ;;  %v1922_v57 = vmul.f32 %v3172_v54, %v1858_v51  ;;  %v3182_v7 = vpop.eup %3181  ;;  %5839 = vst [vmem:[#allocation16_spill] sm:$0xff] %v3882_v48  ;;  %v3890_v54 = vadd.f32 %v3773_v21, %v3825_v62  ;;  %v1597_v37 = vadd.f32 1.4214138, %v1533_v8  ;;  %v3910_v29 = vpop.f32.mrb[23].mxu0 }
 0x1fa   :  { %v1860_v12 = vadd.f32 0.2548296, %v1796_v58  ;;  %v2428_v49 = vsub.f32 0.0, %v2300_v44  ;;  %3189 = vrcp.f32 %v1221_v55  ;;  %v2045_v25 = vmul.f32 %v1981_v1, %v3798_v32  ;;  %5841 = vst [vmem:[#allocation18_spill] sm:$0xff] %v3910_v29 }
 0x1fb   :  { %v3184_v41 = vpop.eup %3183  ;;  %v2242_v45 = vmul.f32 %v3182_v7, %v1922_v57  ;;  %v2108_v63 = vmul.f32 1.442695, %v2043_v4  ;;  %v962_v58 = vmul.f32 0.5, %v3776_v22  ;;  %v3901_v56 = vmul.f32 0.70710677, %v3890_v54 }
 0x1fc   :  { %v1924_v40 = vmul.f32 %v3851_v59, %v1860_v12  ;;  %v2490_v59 = vsel %vm2362_vm1, %v2426_v18, %v2298_v14  ;;  %v3895_v34 = vpop.eup %3185  ;;  %v2492_v2 = vsel %vm2364_vm2, %v2428_v49, %v2300_v44  ;;  %v1723_v32 = vadd.f32 -0.28449672, %v1659_v60 }
 0x1fd   :  { %v2306_v42 = vsub.f32 1.0, %v2242_v45  ;;  %v2554_v3 = vadd.f32 1.0, %v2490_v59  ;;  %v1661_v8 = vmul.f32 %v3862_v11, %v1597_v37  ;;  %v2556_v44 = vadd.f32 1.0, %v2492_v2 }
 0x1fe   :  { %v2244_v13 = vmul.f32 %v3184_v41, %v1924_v40  ;;  %v3903_v14 = vpop.eup %3187  ;;  %v1411_v22 = vmul.f32 1.0614054, %v3895_v34  ;;  %v3908_v18 = vand.u32 2147483647, %v3901_v56  ;;  %3191 = vpow2.f32 %v2108_v63  ;;  %v3919_v41 = vpop.f32.mrb[23].mxu1 }
 0x1ff   :  { %v2434_v21 = vsub.f32 0.0, %v2306_v42  ;;  %v964_v1 = vmul.f32 0.5, %v3784_v26  ;;  %v1418_v49 = vmul.f32 1.0614054, %v3903_v14  ;;  %v3917_v40 = vadd.f32 %v3778_v23, %v3825_v62  ;;  %5842 = vst [vmem:[#allocation19_spill] sm:$0xff] %v3919_v41 }
 0x200   :  { %v2308_v51 = vsub.f32 1.0, %v2244_v13  ;;  %v1164_v4 = vmul.f32 0.3275911, %v3908_v18  ;;  %v3921_v45 = vmul.f32 %v2554_v3, %v954_v6  ;;  %v1787_v60 = vmul.f32 %v3846_v20, %v1723_v32 }
 0x201   :  { %v2498_v55 = vsel %vm2370_vm3, %v2434_v21, %v2306_v42  ;;  %v1725_v37 = vadd.f32 -0.28449672, %v1661_v8  ;;  %v3926_v26 = vmul.f32 %v2556_v44, %v956_v50  ;;  %v1475_v42 = vadd.f32 -1.4531521, %v1411_v22  ;;  %v3939_v50 = vpop.permute.xlu1 %455 }
 0x202   :  { %v2436_v12 = vsub.f32 0.0, %v2308_v51  ;;  %v2562_v33 = vadd.f32 1.0, %v2498_v55  ;;  %5843 = vst [vmem:[#allocation20_spill] sm:$0xff] %v3921_v45  ;;  %v1228_v2 = vadd.f32 1.0, %v1164_v4  ;;  %v1482_v21 = vadd.f32 -1.4531521, %v1418_v49 }
 0x203   :  { %5845 = vst [vmem:[#allocation22_spill] sm:$0xff] %v3926_v26  ;;  %5847 = vst [vmem:[#allocation24_spill] sm:$0xff] %v3939_v50  ;;  %v1851_v3 = vadd.f32 0.2548296, %v1787_v60  ;;  %v1789_v32 = vmul.f32 %v3862_v11, %v1725_v37  ;;  %v1539_v8 = vmul.f32 %v3895_v34, %v1475_v42  ;;  %v3949_v44 = vadd.f32 %v3780_v24, %v3825_v62  ;;  %v3963_v24 = vpop.f32.mrb[24].mxu0 }
 0x204   :  { %v2500_v57 = vsel %vm2372_vm4, %v2436_v12, %v2308_v51  ;;  %v3924_v13 = vmul.f32 %v2562_v33, %v962_v58  ;;  %v3930_v63 = vpop.eup %3189  ;;  %v2112_v51 = vmul.f32 1.442695, %v2045_v25  ;;  %3193 = vrcp.f32 %v1228_v2  ;;  %5848 = vst [vmem:[#allocation25_spill] sm:$0xff] %v3963_v24 }
 0x205   :  { %v2564_v7 = vadd.f32 1.0, %v2500_v57  ;;  %v3937_v58 = vmul.f32 0.70710677, %v3917_v40  ;;  %v1413_v25 = vmul.f32 1.0614054, %v3930_v63  ;;  %v3953_v55 = vadd.f32 %v3786_v27, %v3939_v50 }
 0x206   :  { %5844 = vst [vmem:[#allocation21_spill] sm:$0xff] %v3924_v13  ;;  %3195 = vpow2.f32 %v2112_v51  ;;  %v1987_v22 = vsub.f32 0.0, %v3849_v53  ;;  %v1546_v33 = vmul.f32 %v3903_v14, %v1482_v21  ;;  %v1915_v57 = vmul.f32 %v3846_v20, %v1851_v3  ;;  %v3975_v51 = vpop.f32.mrb[24].mxu1 }
 0x207   :  { %v3928_v59 = vmul.f32 %v2564_v7, %v964_v1  ;;  %v3945_v12 = vand.u32 2147483647, %v3937_v58  ;;  %v1989_v7 = vsub.f32 0.0, %v3867_v10  ;;  %v3961_v4 = vmul.f32 0.70710677, %v3953_v55  ;;  %5849 = vst [vmem:[#allocation26_spill] sm:$0xff] %v3975_v51 }
 0x208   :  { %v3192_v1 = vpop.eup %3191  ;;  %v1853_v60 = vadd.f32 0.2548296, %v1789_v32  ;;  %v1603_v27 = vadd.f32 1.4214138, %v1539_v8  ;;  %v1477_v37 = vadd.f32 -1.4531521, %v1413_v25  ;;  %v3967_v42 = vadd.f32 %v3788_v28, %v3939_v50 }
 0x209   :  { %5846 = vst [vmem:[#allocation23_spill] sm:$0xff] %v3928_v59  ;;  %v1163_v49 = vmul.f32 0.3275911, %v3945_v12  ;;  %v3970_v2 = vmul.f32 0.70710677, %v3949_v44  ;;  %v3978_v21 = vmul.f32 0.5, %v3747_v0  ;;  %v2235_v28 = vmul.f32 %v3192_v1, %v1915_v57 }
 0x20a   :  { %v3973_v20 = vand.u32 2147483647, %v3961_v4  ;;  %v3981_v3 = vmul.f32 0.5, %v3761_v9  ;;  %v3984_v32 = vmul.f32 0.5, %v3823_v61  ;;  %v1610_v8 = vadd.f32 1.4214138, %v1546_v33 }
 0x20b   :  { %v1994_v25 = vsub.f32 0.0, %v3858_v36  ;;  %v1227_v6 = vadd.f32 1.0, %v1163_v49  ;;  %v1667_v59 = vmul.f32 %v3895_v34, %v1603_v27  ;;  %v2051_v0 = vmul.f32 %v1987_v22, %v3849_v53 }
 0x20c   :  { %v1170_v23 = vmul.f32 0.3275911, %v3973_v20  ;;  %v2053_v45 = vmul.f32 %v1989_v7, %v3867_v10  ;;  %v3994_v9 = vmul.f32 0.70710677, %v3967_v42  ;;  %v1917_v61 = vmul.f32 %v3862_v11, %v1853_v60  ;;  %v4012_v7 = vpop.f32.mrb[25].mxu0 }
 0x20d   :  { %v1541_v33 = vmul.f32 %v3930_v63, %v1477_v37  ;;  %v4000_v57 = vand.u32 2147483647, %v3970_v2  ;;  %v1674_v49 = vmul.f32 %v3903_v14, %v1610_v8  ;;  %v4008_v53 = vadd.f32 %v3793_v30, %v3939_v50  ;;  %5850 = vst [vmem:[#allocation27_spill] sm:$0xff] %v4012_v7  ;;  %v4025_v7 = vpop.permute.xlu0 %460 }
 0x20e   :  { %v3988_v26 = vpop.eup %3193  ;;  %v1234_v13 = vadd.f32 1.0, %v1170_v23  ;;  %v4004_v27 = vand.u32 2147483647, %v3994_v9  ;;  %v2299_v10 = vsub.f32 1.0, %v2235_v28  ;;  %v2058_v11 = vmul.f32 %v1994_v25, %v3858_v36  ;;  %5852 = vst [vmem:[#allocation29_spill] sm:$0xff] %v4025_v7 }
 0x20f   :  { %v1420_v1 = vmul.f32 1.0614054, %v3988_v26  ;;  %3197 = vrcp.f32 %v1227_v6  ;;  %v1731_v37 = vadd.f32 -0.28449672, %v1667_v59  ;;  %v1996_v23 = vsub.f32 0.0, %v3908_v18 }
 0x210   :  { %v3196_v60 = vpop.eup %3195  ;;  %3199 = vrcp.f32 %v1234_v13  ;;  %v1172_v8 = vmul.f32 0.3275911, %v4004_v27  ;;  %v2124_v62 = vmul.f32 1.442695, %v2051_v0  ;;  %v2128_v51 = vmul.f32 1.442695, %v2053_v45 }
 0x211   :  { %v1484_v22 = vadd.f32 -1.4531521, %v1420_v1  ;;  %v1165_v28 = vmul.f32 0.3275911, %v4000_v57  ;;  %v2237_v24 = vmul.f32 %v3196_v60, %v1917_v61  ;;  %v1738_v41 = vadd.f32 -0.28449672, %v1674_v49 }
 0x212   :  { %v1236_v36 = vadd.f32 1.0, %v1172_v8  ;;  %v4019_v6 = vmul.f32 0.70710677, %v4008_v53  ;;  %v1605_v25 = vadd.f32 1.4214138, %v1541_v33  ;;  %v4023_v13 = vadd.f32 %v3795_v31, %v3939_v50 }
 0x213   :  { %v1548_v30 = vmul.f32 %v3988_v26, %v1484_v22  ;;  %v2138_v1 = vmul.f32 1.442695, %v2058_v11  ;;  %v2427_v45 = vsub.f32 0.0, %v2299_v10  ;;  %v1795_v0 = vmul.f32 %v3895_v34, %v1731_v37 }
 0x214   :  { %5851 = vst [vmem:[#allocation28_spill] sm:$0xff] %v4019_v6  ;;  %v2060_v22 = vmul.f32 %v1996_v23, %v3908_v18  ;;  %3201 = vrcp.f32 %v1236_v36  ;;  %v1229_v49 = vadd.f32 1.0, %v1165_v28  ;;  %v2002_v33 = vsub.f32 0.0, %v3973_v20 }
 0x215   :  { %v1612_v59 = vadd.f32 1.4214138, %v1548_v30  ;;  %v4034_v11 = vadd.f32 %v3804_v35, %v4025_v7  ;;  %v2301_v31 = vsub.f32 1.0, %v2237_v24  ;;  %3203 = vpow2.f32 %v2124_v62  ;;  %v4044_v30 = vpop.f32.mrb[25].mxu1 }
 0x216   :  { %v1802_v60 = vmul.f32 %v3903_v14, %v1738_v41  ;;  %v4038_v37 = vand.u32 2147483647, %v4019_v6  ;;  %v1669_v18 = vmul.f32 %v3930_v63, %v1605_v25  ;;  %3205 = vpow2.f32 %v2138_v1  ;;  %5854 = vst [vmem:[#allocation31_spill] sm:$0xff] %v4044_v30 }
 0x217   :  { %v1676_v61 = vmul.f32 %v3988_v26, %v1612_v59  ;;  %v4042_v8 = vmul.f32 0.70710677, %v4023_v13  ;;  %v2491_v35 = vsel %vm2363_vm5, %v2427_v45, %v2299_v10  ;;  %v4049_v24 = vmul.f32 0.5, %v3841_v46 }
 0x218   :  { %3207 = vpow2.f32 %v2128_v51  ;;  %v2142_v62 = vmul.f32 1.442695, %v2060_v22  ;;  %v1859_v28 = vadd.f32 0.2548296, %v1795_v0  ;;  %v2066_v36 = vmul.f32 %v2002_v33, %v3973_v20 }
 0x219   :  { %v1740_v23 = vadd.f32 -0.28449672, %v1676_v61  ;;  %5853 = vst [vmem:[#allocation30_spill] sm:$0xff] %v4042_v8  ;;  %v4051_v41 = vpop.eup %3197  ;;  %3209 = vrcp.f32 %v1229_v49  ;;  %v4055_v25 = vmul.f32 0.70710677, %v4034_v11  ;;  %v2429_v59 = vsub.f32 0.0, %v2301_v31 }
 0x21a   :  { %v4057_v1 = vpop.eup %3199  ;;  %v1866_v61 = vadd.f32 0.2548296, %v1802_v60  ;;  %v2004_v5 = vsub.f32 0.0, %v4004_v27  ;;  %v1171_v46 = vmul.f32 0.3275911, %v4038_v37  ;;  %3211 = vpow2.f32 %v2142_v62 }
 0x21b   :  { %5855 = vst [vmem:[#allocation32_spill] sm:$0xff] %v4055_v25  ;;  %v1733_v10 = vadd.f32 -0.28449672, %v1669_v18  ;;  %v1804_v51 = vmul.f32 %v3988_v26, %v1740_v23  ;;  %v1426_v45 = vmul.f32 1.0614054, %v4057_v1  ;;  %v4072_v49 = vadd.f32 %v3807_v38, %v4025_v7 }
 0x21c   :  { %v4064_v0 = vand.u32 2147483647, %v4042_v8  ;;  %v1419_v20 = vmul.f32 1.0614054, %v4051_v41  ;;  %v4068_v22 = vand.u32 2147483647, %v4055_v25  ;;  %v1923_v60 = vmul.f32 %v3895_v34, %v1859_v28 }
 0x21d   :  { %v4074_v33 = vadd.f32 1.0, %v2491_v35  ;;  %v1490_v18 = vadd.f32 -1.4531521, %v1426_v45  ;;  %v2154_v23 = vmul.f32 1.442695, %v2066_v36  ;;  %v2493_v62 = vsel %vm2365_vm6, %v2429_v59, %v2301_v31 }
 0x21e   :  { %v4077_v50 = vpop.eup %3201  ;;  %v1930_v30 = vmul.f32 %v3903_v14, %v1866_v61  ;;  %v2068_v29 = vmul.f32 %v2004_v5, %v4004_v27  ;;  %v1235_v52 = vadd.f32 1.0, %v1171_v46  ;;  %v1868_v48 = vadd.f32 0.2548296, %v1804_v51 }
 0x21f   :  { %v1554_v38 = vmul.f32 %v4057_v1, %v1490_v18  ;;  %v1428_v35 = vmul.f32 1.0614054, %v4077_v50  ;;  %v1173_v25 = vmul.f32 0.3275911, %v4064_v0  ;;  %v3204_v34 = vpop.eup %3203  ;;  %v1797_v28 = vmul.f32 %v3930_v63, %v1733_v10 }
 0x220   :  { %v1483_v36 = vadd.f32 -1.4531521, %v1419_v20  ;;  %v1178_v45 = vmul.f32 0.3275911, %v4068_v22  ;;  %v4089_v19 = vmul.f32 0.70710677, %v4072_v49  ;;  %v3206_v14 = vpop.eup %3205  ;;  %v2243_v31 = vmul.f32 %v3204_v34, %v1923_v60 }
 0x221   :  { %v1618_v27 = vadd.f32 1.4214138, %v1554_v38  ;;  %3213 = vpow2.f32 %v2154_v23  ;;  %v1492_v59 = vadd.f32 -1.4531521, %v1428_v35  ;;  %v2250_v5 = vmul.f32 %v3206_v14, %v1930_v30 }
 0x222   :  { %5856 = vst [vmem:[#allocation33_spill] sm:$0xff] %v4089_v19  ;;  %v3208_v61 = vpop.eup %3207  ;;  %v2158_v46 = vmul.f32 1.442695, %v2068_v29  ;;  %3215 = vrcp.f32 %v1235_v52  ;;  %v4092_v51 = vand.u32 2147483647, %v4089_v19  ;;  %v1932_v10 = vmul.f32 %v3988_v26, %v1868_v48 }
 0x223   :  { %v4094_v18 = vpop.eup %3209  ;;  %v1682_v20 = vmul.f32 %v4057_v1, %v1618_v27  ;;  %v1556_v8 = vmul.f32 %v4077_v50, %v1492_v59  ;;  %v1237_v6 = vadd.f32 1.0, %v1173_v25  ;;  %v2557_v60 = vadd.f32 1.0, %v2493_v62 }
 0x224   :  { %v1861_v38 = vadd.f32 0.2548296, %v1797_v28  ;;  %v1547_v23 = vmul.f32 %v4051_v41, %v1483_v36  ;;  %v1242_v35 = vadd.f32 1.0, %v1178_v45  ;;  %v1180_v30 = vmul.f32 0.3275911, %v4092_v51  ;;  %v3212_v34 = vpop.eup %3211  ;;  %v4105_v28 = vpop.f32.mrb[26].mxu0 }
 0x225   :  { %v1746_v52 = vadd.f32 -0.28449672, %v1682_v20  ;;  %v1620_v29 = vadd.f32 1.4214138, %v1556_v8  ;;  %v2307_v14 = vsub.f32 1.0, %v2243_v31  ;;  %v2314_v19 = vsub.f32 1.0, %v2250_v5 }
 0x226   :  { %v1421_v48 = vmul.f32 1.0614054, %v4094_v18  ;;  %3217 = vpow2.f32 %v2158_v46  ;;  %v2252_v26 = vmul.f32 %v3212_v34, %v1932_v10  ;;  %5857 = vst [vmem:[#allocation34_spill] sm:$0xff] %v4105_v28  ;;  %v1925_v36 = vmul.f32 %v3930_v63, %v1861_v38 }
 0x227   :  { %v1810_v25 = vmul.f32 %v4057_v1, %v1746_v52  ;;  %v1684_v62 = vmul.f32 %v4077_v50, %v1620_v29  ;;  %3219 = vrcp.f32 %v1237_v6  ;;  %v1611_v45 = vadd.f32 1.4214138, %v1547_v23 }
 0x228   :  { %v1995_v8 = vsub.f32 0.0, %v3945_v12  ;;  %3221 = vrcp.f32 %v1242_v35  ;;  %v970_v31 = vmul.f32 0.5, %v3834_v15  ;;  %v1244_v5 = vadd.f32 1.0, %v1180_v30 }
 0x229   :  { %v1874_v27 = vadd.f32 0.2548296, %v1810_v25  ;;  %v1748_v59 = vadd.f32 -0.28449672, %v1684_v62  ;;  %v2435_v46 = vsub.f32 0.0, %v2307_v14  ;;  %v2442_v10 = vsub.f32 0.0, %v2314_v19 }
 0x22a   :  { %v1485_v20 = vadd.f32 -1.4531521, %v1421_v48  ;;  %v4112_v6 = vmul.f32 0.5, %v3890_v54  ;;  %v2316_v29 = vsub.f32 1.0, %v2252_v26  ;;  %v4120_v15 = vmul.f32 %v4074_v33, %v3978_v21 }
 0x22b   :  { %v3214_v52 = vpop.eup %3213  ;;  %v1938_v63 = vmul.f32 %v4057_v1, %v1874_v27  ;;  %v1812_v38 = vmul.f32 %v4077_v50, %v1748_v59  ;;  %v4123_v35 = vmul.f32 %v2557_v60, %v3981_v3  ;;  %v4125_v30 = vmul.f32 %v3208_v61, %v1925_v36  ;;  %v4137_v60 = vpop.f32.mrb[26].mxu1 }
 0x22c   :  { %v4116_v23 = vpop.eup %3215  ;;  %5858 = vst [vmem:[#allocation35_spill] sm:$0xff] %v4120_v15  ;;  %v2059_v34 = vmul.f32 %v1995_v8, %v3945_v12  ;;  %v1675_v54 = vmul.f32 %v4051_v41, %v1611_v45  ;;  %3223 = vrcp.f32 %v1244_v5  ;;  %v2499_v1 = vsel %vm2371_vm7, %v2435_v46, %v2307_v14  ;;  %5860 = vst [vmem:[#allocation37_spill] sm:$0xff] %v4137_v60  ;;  %v4148_v59 = vpop.f32.mrb[27].mxu0 }
 0x22d   :  { %5859 = vst [vmem:[#allocation36_spill] sm:$0xff] %v4123_v35  ;;  %v2258_v48 = vmul.f32 %v3214_v52, %v1938_v63  ;;  %v1876_v26 = vadd.f32 0.2548296, %v1812_v38  ;;  %v2506_v25 = vsel %vm2378_vm8, %v2442_v10, %v2314_v19  ;;  %vm2380_vm9 = vcmp.lt.f32.partialorder %v3901_v56, 0.0  ;;  %5861 = vst [vmem:[#allocation38_spill] sm:$0xff] %v4148_v59 }
 0x22e   :  { %v1549_v21 = vmul.f32 %v4094_v18, %v1485_v20  ;;  %v2444_v3 = vsub.f32 0.0, %v2316_v29  ;;  %v1427_v12 = vmul.f32 1.0614054, %v4116_v23  ;;  %v2309_v36 = vsub.f32 1.0, %v4125_v30 }
 0x22f   :  { %v2322_v33 = vsub.f32 1.0, %v2258_v48  ;;  %v1940_v61 = vmul.f32 %v4077_v50, %v1876_v26  ;;  %v2140_v17 = vmul.f32 1.442695, %v2059_v34  ;;  %v1997_v14 = vsub.f32 0.0, %v4000_v57 }
 0x230   :  { %v3218_v62 = vpop.eup %3217  ;;  %v978_v47 = vmul.f32 0.5, %v3953_v55  ;;  %v1739_v45 = vadd.f32 -0.28449672, %v1675_v54  ;;  %v4146_v50 = vadd.f32 %v3809_v39, %v4025_v7  ;;  %v2570_v46 = vadd.f32 1.0, %v2506_v25 }
 0x231   :  { %v4142_v19 = vpop.eup %3219  ;;  %v2450_v8 = vsub.f32 0.0, %v2322_v33  ;;  %v2260_v27 = vmul.f32 %v3218_v62, %v1940_v61  ;;  %v1613_v10 = vadd.f32 1.4214138, %v1549_v21  ;;  %vm2386_vm10 = vcmp.lt.f32.partialorder %v3961_v4, 0.0 }
 0x232   :  { %v4150_v5 = vpop.eup %3221  ;;  %v980_v20 = vmul.f32 0.5, %v3967_v42  ;;  %v2508_v55 = vsel %vm2380_vm9, %v2444_v3, %v2316_v29  ;;  %v1491_v38 = vadd.f32 -1.4531521, %v1427_v12  ;;  %3225 = vpow2.f32 %v2140_v17  ;;  %v4176_v12 = vpop.f32.mrb[27].mxu1 }
 0x233   :  { %v2514_v52 = vsel %vm2386_vm10, %v2450_v8, %v2322_v33  ;;  %v2324_v63 = vsub.f32 1.0, %v2260_v27  ;;  %v2061_v39 = vmul.f32 %v1997_v14, %v4000_v57  ;;  %v1429_v54 = vmul.f32 1.0614054, %v4142_v19  ;;  %5864 = vst [vmem:[#allocation41_spill] sm:$0xff] %v4176_v12 }
 0x234   :  { %v2578_v34 = vadd.f32 1.0, %v2514_v52  ;;  %vm2373_vm11 = vcmp.lt.f32.partialorder %v3855_v16, 0.0  ;;  %v1803_v48 = vmul.f32 %v4051_v41, %v1739_v45  ;;  %v1434_v4 = vmul.f32 1.0614054, %v4150_v5 }
 0x235   :  { %v2452_v26 = vsub.f32 0.0, %v2324_v63  ;;  %v4162_v42 = vmul.f32 0.70710677, %v4146_v50  ;;  %v4164_v56 = vmul.f32 %v2570_v46, %v970_v31  ;;  %v2572_v29 = vadd.f32 1.0, %v2508_v55 }
 0x236   :  { %v4166_v25 = vmul.f32 %v2578_v34, %v978_v47  ;;  %vm2388_vm12 = vcmp.lt.f32.partialorder %v3994_v9, 0.0  ;;  %v4169_v57 = vpop.eup %3223  ;;  %v1677_v21 = vmul.f32 %v4094_v18, %v1613_v10  ;;  %v1555_v33 = vmul.f32 %v4116_v23, %v1491_v38 }
 0x237   :  { %5862 = vst [vmem:[#allocation39_spill] sm:$0xff] %v4164_v56  ;;  %v2516_v3 = vsel %vm2388_vm12, %v2452_v26, %v2324_v63  ;;  %v4174_v61 = vand.u32 2147483647, %v4162_v42  ;;  %v1493_v17 = vadd.f32 -1.4531521, %v1429_v54  ;;  %v4182_v9 = vadd.f32 %v3811_v43, %v4025_v7  ;;  %v4200_v54 = vpop.permute.xlu1 %465 }
 0x238   :  { %5863 = vst [vmem:[#allocation40_spill] sm:$0xff] %v4166_v25  ;;  %v2580_v62 = vadd.f32 1.0, %v2516_v3  ;;  %v2563_v14 = vadd.f32 1.0, %v2499_v1  ;;  %v2437_v47 = vsub.f32 0.0, %v2309_v36  ;;  %v1867_v45 = vadd.f32 0.2548296, %v1803_v48 }
 0x239   :  { %v1498_v8 = vadd.f32 -1.4531521, %v1434_v4  ;;  %v4187_v27 = vmul.f32 %v2572_v29, %v4112_v6  ;;  %v1436_v10 = vmul.f32 1.0614054, %v4169_v57  ;;  %v1179_v55 = vmul.f32 0.3275911, %v4174_v61 }
 0x23a   :  { %v4189_v46 = vmul.f32 %v2580_v62, %v980_v20  ;;  %v4194_v52 = vmul.f32 0.5, %v3917_v40  ;;  %v1741_v43 = vadd.f32 -0.28449672, %v1677_v21  ;;  %v2144_v63 = vmul.f32 1.442695, %v2061_v39  ;;  %5867 = vst [vmem:[#allocation44_spill] sm:$0xff] %v4200_v54 }
 0x23b   :  { %5865 = vst [vmem:[#allocation42_spill] sm:$0xff] %v4187_v27  ;;  %v2003_v1 = vsub.f32 0.0, %v4038_v37  ;;  %v1619_v34 = vadd.f32 1.4214138, %v1555_v33  ;;  %v1557_v6 = vmul.f32 %v4142_v19, %v1493_v17  ;;  %v4203_v20 = vmul.f32 0.70710677, %v4182_v9 }
 0x23c   :  { %5866 = vst [vmem:[#allocation43_spill] sm:$0xff] %v4189_v46  ;;  %v4206_v48 = vmul.f32 %v2563_v14, %v3984_v32  ;;  %v1931_v40 = vmul.f32 %v4051_v41, %v1867_v45  ;;  %v2005_v39 = vsub.f32 0.0, %v4064_v0  ;;  %v1562_v26 = vmul.f32 %v4150_v5, %v1498_v8  ;;  %v3226_v4 = vpop.eup %3225  ;;  %v5869_v62 = vld [vmem:[#allocation7_spill] sm:$0xff]  ;;  %v4224_v14 = vpop.f32.mrb[28].mxu0 }
 0x23d   :  { %v2501_v29 = vsel %vm2373_vm11, %v2437_v47, %v2309_v36  ;;  %v1500_v21 = vadd.f32 -1.4531521, %v1436_v10  ;;  %v1243_v3 = vadd.f32 1.0, %v1179_v55  ;;  %v4216_v33 = vand.u32 2147483647, %v4203_v20  ;;  %5870 = vst [vmem:[#allocation7_spill] sm:$0xff] %v4224_v14 }
 0x23e   :  { %5868 = vst [vmem:[#allocation45_spill] sm:$0xff] %v4206_v48  ;;  %v1805_v32 = vmul.f32 %v4094_v18, %v1741_v43  ;;  %3227 = vpow2.f32 %v2144_v63  ;;  %v2010_v41 = vsub.f32 0.0, %v4068_v22  ;;  %v4222_v17 = vadd.f32 %v5869_v62, %v4200_v54  ;;  %v5871_v62 = vld [vmem:[#allocation8_spill] sm:$0xff] }
 0x23f   :  { %v1683_v30 = vmul.f32 %v4116_v23, %v1619_v34  ;;  %v2067_v16 = vmul.f32 %v2003_v1, %v4038_v37  ;;  %v1621_v36 = vadd.f32 1.4214138, %v1557_v6  ;;  %v1181_v47 = vmul.f32 0.3275911, %v4216_v33  ;;  %v4238_v34 = vpop.f32.mrb[28].mxu1  ;;  %v5882_v14 = vld [vmem:[#allocation28_spill] sm:$0xff] }
 0x240   :  { %v2565_v45 = vadd.f32 1.0, %v2501_v29  ;;  %v2251_v8 = vmul.f32 %v3226_v4, %v1931_v40  ;;  %v2069_v10 = vmul.f32 %v2005_v39, %v4064_v0  ;;  %v1626_v55 = vadd.f32 1.4214138, %v1562_v26  ;;  %5872 = vst [vmem:[#allocation8_spill] sm:$0xff] %v4238_v34 }
 0x241   :  { %v1564_v43 = vmul.f32 %v4169_v57, %v1500_v21  ;;  %3229 = vrcp.f32 %v1243_v3  ;;  %v4232_v63 = vmul.f32 0.70710677, %v4222_v17  ;;  %v4236_v38 = vadd.f32 %v5871_v62, %v4200_v54 }
 0x242   :  { %v4241_v37 = vmul.f32 0.5, %v3949_v44  ;;  %v1869_v1 = vadd.f32 0.2548296, %v1805_v32  ;;  %v2074_v6 = vmul.f32 %v2010_v41, %v4068_v22  ;;  %v1245_v0 = vadd.f32 1.0, %v1181_v47  ;;  %v5873_v44 = vld [vmem:[#allocation9_spill] sm:$0xff] }
 0x243   :  { %v1747_v40 = vadd.f32 -0.28449672, %v1683_v30  ;;  %v2156_v39 = vmul.f32 1.442695, %v2067_v16  ;;  %v1685_v26 = vmul.f32 %v4142_v19, %v1621_v36  ;;  %v1122_v4 = vand.u32 2147483647, %v4232_v63 }
 0x244   :  { %vm2379_vm13 = vcmp.lt.f32.partialorder %v3937_v58, 0.0  ;;  %v2160_v29 = vmul.f32 1.442695, %v2069_v10  ;;  %v1690_v21 = vmul.f32 %v4150_v5, %v1626_v55  ;;  %v4249_v3 = vmul.f32 0.70710677, %v4236_v38 }
 0x245   :  { %v4253_v32 = vadd.f32 %v5873_v44, %v4200_v54  ;;  %v4256_v22 = vmul.f32 %v2565_v45, %v4049_v24  ;;  %v2315_v41 = vsub.f32 1.0, %v2251_v8  ;;  %v1628_v30 = vadd.f32 1.4214138, %v1564_v43 }
 0x246   :  { %v1186_v16 = vmul.f32 0.3275911, %v1122_v4  ;;  %v1933_v36 = vmul.f32 %v4094_v18, %v1869_v1  ;;  %v2170_v47 = vmul.f32 1.442695, %v2074_v6  ;;  %3231 = vrcp.f32 %v1245_v0  ;;  %v5875_v1 = vld [vmem:[#allocation10_spill] sm:$0xff]  ;;  %v4273_v0 = vpop.f32.mrb[29].mxu0 }
 0x247   :  { %5874 = vst [vmem:[#allocation9_spill] sm:$0xff] %v4256_v22  ;;  %v4260_v10 = vand.u32 2147483647, %v4249_v3  ;;  %v1811_v55 = vmul.f32 %v4116_v23, %v1747_v40  ;;  %v1749_v62 = vadd.f32 -0.28449672, %v1685_v26  ;;  %v2012_v31 = vsub.f32 0.0, %v4092_v51 }
 0x248   :  { %v1250_v44 = vadd.f32 1.0, %v1186_v16  ;;  %v3228_v27 = vpop.eup %3227  ;;  %3233 = vpow2.f32 %v2156_v39  ;;  %v1754_v24 = vadd.f32 -0.28449672, %v1690_v21  ;;  %v4266_v8 = vmul.f32 0.70710677, %v4253_v32  ;;  %5876 = vst [vmem:[#allocation10_spill] sm:$0xff] %v4273_v0 }
 0x249   :  { %v1188_v45 = vmul.f32 0.3275911, %v4260_v10  ;;  %v2443_v18 = vsub.f32 0.0, %v2315_v41  ;;  %v1692_v43 = vmul.f32 %v4169_v57, %v1628_v30  ;;  %v4271_v6 = vadd.f32 %v5875_v1, %v4200_v54 }
 0x24a   :  { %3235 = vrcp.f32 %v1250_v44  ;;  %v4275_v40 = vmul.f32 %v3228_v27, %v1933_v36  ;;  %v4278_v26 = vand.u32 2147483647, %v4266_v8  ;;  %v4283_v16 = vmul.f32 0.5, %v4008_v53  ;;  %v4291_v36 = vpop.permute.xlu0 %470 }
 0x24b   :  { %3237 = vpow2.f32 %v2160_v29  ;;  %v1252_v39 = vadd.f32 1.0, %v1188_v45  ;;  %v4280_v21 = vpop.eup %3229  ;;  %v1875_v30 = vadd.f32 0.2548296, %v1811_v55  ;;  %v2076_v44 = vmul.f32 %v2012_v31, %v4092_v51  ;;  %5877 = vst [vmem:[#allocation46_spill] sm:$0xff] %v4291_v36 }
 0x24c   :  { %3239 = vpow2.f32 %v2170_v47  ;;  %v4287_v1 = vmul.f32 0.5, %v4023_v13  ;;  %v1813_v27 = vmul.f32 %v4142_v19, %v1749_v62  ;;  %v1818_v29 = vmul.f32 %v4150_v5, %v1754_v24  ;;  %v5878_v47 = vld [vmem:[#allocation12_spill] sm:$0xff]  ;;  %v4305_v24 = vpop.f32.mrb[29].mxu1 }
 0x24d   :  { %3241 = vrcp.f32 %v1252_v39  ;;  %v2507_v45 = vsel %vm2379_vm13, %v2443_v18, %v2315_v41  ;;  %v1756_v46 = vadd.f32 -0.28449672, %v1692_v43  ;;  %v2018_v53 = vsub.f32 0.0, %v1122_v4  ;;  %5879 = vst [vmem:[#allocation12_spill] sm:$0xff] %v4305_v24 }
 0x24e   :  { %v4296_v55 = vmul.f32 0.70710677, %v4271_v6  ;;  %v2317_v51 = vsub.f32 1.0, %v4275_v40  ;;  %v1435_v13 = vmul.f32 1.0614054, %v4280_v21  ;;  %v4303_v62 = vadd.f32 %v5878_v47, %v4291_v36 }
 0x24f   :  { %v1187_v31 = vmul.f32 0.3275911, %v4278_v26  ;;  %vm2381_vm14 = vcmp.lt.f32.partialorder %v3970_v2, 0.0  ;;  %v1939_v58 = vmul.f32 %v4116_v23, %v1875_v30  ;;  %v4310_v41 = vmul.f32 0.5, %v4034_v11  ;;  %v5880_v11 = vld [vmem:[#allocation13_spill] sm:$0xff] }
 0x250   :  { %v2174_v18 = vmul.f32 1.442695, %v2076_v44  ;;  %v4313_v43 = vand.u32 2147483647, %v4296_v55  ;;  %v4315_v40 = vpop.eup %3231  ;;  %v2571_v39 = vadd.f32 1.0, %v2507_v45  ;;  %v4318_v47 = vmul.f32 0.5, %v4072_v49 }
 0x251   :  { %v1877_v56 = vadd.f32 0.2548296, %v1813_v27  ;;  %v1882_v25 = vadd.f32 0.2548296, %v1818_v29  ;;  %v1820_v22 = vmul.f32 %v4169_v57, %v1756_v46  ;;  %v2082_v35 = vmul.f32 %v2018_v53, %v1122_v4 }
 0x252   :  { %v2020_v23 = vsub.f32 0.0, %v4260_v10  ;;  %v4324_v30 = vadd.f32 %v5880_v11, %v4291_v36  ;;  %v3234_v44 = vpop.eup %3233  ;;  %v2445_v48 = vsub.f32 0.0, %v2317_v51  ;;  %v1499_v15 = vadd.f32 -1.4531521, %v1435_v13 }
 0x253   :  { %v1251_v54 = vadd.f32 1.0, %v1187_v31  ;;  %v4327_v45 = vmul.f32 0.70710677, %v4303_v62  ;;  %v4331_v49 = vmul.f32 %v3234_v44, %v1939_v58  ;;  %3243 = vpow2.f32 %v2174_v18 }
 0x254   :  { %v4329_v27 = vpop.eup %3235  ;;  %v1437_v46 = vmul.f32 1.0614054, %v4315_v40  ;;  %v1189_v4 = vmul.f32 0.3275911, %v4313_v43  ;;  %v1941_v53 = vmul.f32 %v4142_v19, %v1877_v56  ;;  %v1946_v11 = vmul.f32 %v4150_v5, %v1882_v25 }
 0x255   :  { %v3238_v29 = vpop.eup %3237  ;;  %v1442_v13 = vmul.f32 1.0614054, %v4329_v27  ;;  %v4339_v31 = vand.u32 2147483647, %v4327_v45  ;;  %v1884_v24 = vadd.f32 0.2548296, %v1820_v22  ;;  %v2084_v58 = vmul.f32 %v2020_v23, %v4260_v10 }
 0x256   :  { %v3240_v7 = vpop.eup %3239  ;;  %v2186_v0 = vmul.f32 1.442695, %v2082_v35  ;;  %v4343_v18 = vmul.f32 0.70710677, %v4324_v30  ;;  %v1563_v34 = vmul.f32 %v4280_v21, %v1499_v15  ;;  %3245 = vrcp.f32 %v1251_v54  ;;  %v4358_v54 = vpop.f32.mrb[30].mxu0 }
 0x257   :  { %v4345_v44 = vpop.eup %3241  ;;  %v1506_v19 = vadd.f32 -1.4531521, %v1442_v13  ;;  %v1194_v5 = vmul.f32 0.3275911, %v4339_v31  ;;  %v4350_v56 = vmul.f32 %v2571_v39, %v4194_v52  ;;  %v1501_v25 = vadd.f32 -1.4531521, %v1437_v46 }
 0x258   :  { %v1444_v22 = vmul.f32 1.0614054, %v4345_v44  ;;  %v1253_v35 = vadd.f32 1.0, %v1189_v4  ;;  %v2509_v10 = vsel %vm2381_vm14, %v2445_v48, %v2317_v51  ;;  %v2323_v23 = vsub.f32 1.0, %v4331_v49  ;;  %5883 = vst [vmem:[#allocation28_spill] sm:$0xff] %v4358_v54 }
 0x259   :  { %5881 = vst [vmem:[#allocation13_spill] sm:$0xff] %v4350_v56  ;;  %vm2387_vm15 = vcmp.lt.f32.partialorder %v5882_v14, 0.0  ;;  %v1570_v15 = vmul.f32 %v4329_v27, %v1506_v19  ;;  %v1258_v13 = vadd.f32 1.0, %v1194_v5  ;;  %v2261_v12 = vmul.f32 %v3238_v29, %v1941_v53  ;;  %v5884_v5 = vld [vmem:[#allocation30_spill] sm:$0xff] }
 0x25a   :  { %v2266_v59 = vmul.f32 %v3240_v7, %v1946_v11  ;;  %v1508_v52 = vadd.f32 -1.4531521, %v1444_v22  ;;  %v4361_v39 = vand.u32 2147483647, %v4343_v18  ;;  %v1627_v46 = vadd.f32 1.4214138, %v1563_v34 }
 0x25b   :  { %v1634_v4 = vadd.f32 1.4214138, %v1570_v15  ;;  %3247 = vpow2.f32 %v2186_v0  ;;  %v2190_v2 = vmul.f32 1.442695, %v2084_v58  ;;  %v1948_v48 = vmul.f32 %v4169_v57, %v1884_v24  ;;  %v5885_v11 = vld [vmem:[#allocation32_spill] sm:$0xff] }
 0x25c   :  { %v1565_v51 = vmul.f32 %v4315_v40, %v1501_v25  ;;  %v1572_v49 = vmul.f32 %v4345_v44, %v1508_v52  ;;  %3249 = vrcp.f32 %v1253_v35  ;;  %v2451_v19 = vsub.f32 0.0, %v2323_v23 }
 0x25d   :  { %vm2389_vm0 = vcmp.lt.f32.partialorder %v5884_v5, 0.0  ;;  %v2011_v7 = vsub.f32 0.0, %v4174_v61  ;;  %v1698_v29 = vmul.f32 %v4329_v27, %v1634_v4  ;;  %3251 = vrcp.f32 %v1258_v13  ;;  %v3244_v53 = vpop.eup %3243 }
 0x25e   :  { %v2325_v34 = vsub.f32 1.0, %v2261_v12  ;;  %vm2394_vm1 = vcmp.lt.f32.partialorder %v5885_v11, 0.0  ;;  %v2013_v0 = vsub.f32 0.0, %v4216_v33  ;;  %v1636_v57 = vadd.f32 1.4214138, %v1572_v49 }
 0x25f   :  { %v1196_v24 = vmul.f32 0.3275911, %v4361_v39  ;;  %v2330_v58 = vsub.f32 1.0, %v2266_v59  ;;  %v1691_v25 = vmul.f32 %v4280_v21, %v1627_v46  ;;  %v1762_v22 = vadd.f32 -0.28449672, %v1698_v29  ;;  %v5886_v59 = vld [vmem:[#allocation14_spill] sm:$0xff] }
 0x260   :  { %3253 = vpow2.f32 %v2190_v2  ;;  %v4373_v35 = vadd.f32 1.0, %v2509_v10  ;;  %v2268_v15 = vmul.f32 %v3244_v53, %v1948_v48  ;;  %v1629_v52 = vadd.f32 1.4214138, %v1565_v51  ;;  %v4376_v4 = vpop.eup %3245  ;;  %v4389_v29 = vpop.f32.mrb[30].mxu1 }
 0x261   :  { %v1700_v13 = vmul.f32 %v4345_v44, %v1636_v57  ;;  %v4379_v12 = vmul.f32 0.5, %v4146_v50  ;;  %v2075_v49 = vmul.f32 %v2011_v7, %v4174_v61  ;;  %v1826_v56 = vmul.f32 %v4329_v27, %v1762_v22  ;;  %5887 = vst [vmem:[#allocation30_spill] sm:$0xff] %v4389_v29  ;;  %v5888_v57 = vld [vmem:[#allocation33_spill] sm:$0xff] }
 0x262   :  { %v4385_v46 = vadd.f32 %v5886_v59, %v4291_v36  ;;  %v2515_v10 = vsel %vm2387_vm15, %v2451_v19, %v2323_v23  ;;  %v2453_v2 = vsub.f32 0.0, %v2325_v34  ;;  %v1260_v51 = vadd.f32 1.0, %v1196_v24 }
 0x263   :  { %v1764_v48 = vadd.f32 -0.28449672, %v1700_v13  ;;  %v2458_v53 = vsub.f32 0.0, %v2330_v58  ;;  %vm2396_vm2 = vcmp.lt.f32.partialorder %v5888_v57, 0.0  ;;  %v1755_v50 = vadd.f32 -0.28449672, %v1691_v25 }
 0x264   :  { %v2077_v61 = vmul.f32 %v2013_v0, %v4216_v33  ;;  %v1890_v7 = vadd.f32 0.2548296, %v1826_v56  ;;  %v2332_v22 = vsub.f32 1.0, %v2268_v15  ;;  %v1693_v54 = vmul.f32 %v4315_v40, %v1629_v52 }
 0x265   :  { %v1828_v59 = vmul.f32 %v4345_v44, %v1764_v48  ;;  %v1443_v14 = vmul.f32 1.0614054, %v4376_v4  ;;  %v3248_v23 = vpop.eup %3247  ;;  %v2172_v19 = vmul.f32 1.442695, %v2075_v49  ;;  %v4397_v24 = vmul.f32 0.5, %v4182_v9  ;;  %v4414_v48 = vpop.f32.mrb[31].mxu0 }
 0x266   :  { %v1954_v13 = vmul.f32 %v4329_v27, %v1890_v7  ;;  %v4401_v29 = vmul.f32 0.70710677, %v4385_v46  ;;  %v4403_v25 = vpop.eup %3249  ;;  %v4405_v33 = vadd.f32 1.0, %v2515_v10  ;;  %v2517_v56 = vsel %vm2389_vm0, %v2453_v2, %v2325_v34  ;;  %5889 = vst [vmem:[#allocation32_spill] sm:$0xff] %v4414_v48 }
 0x267   :  { %v1892_v0 = vadd.f32 0.2548296, %v1828_v59  ;;  %3255 = vrcp.f32 %v1260_v51  ;;  %v4409_v15 = vpop.eup %3251  ;;  %v2522_v9 = vsel %vm2394_vm1, %v2458_v53, %v2330_v58  ;;  %v1819_v52 = vmul.f32 %v4280_v21, %v1755_v50 }
 0x268   :  { %v2176_v27 = vmul.f32 1.442695, %v2077_v61  ;;  %v2274_v49 = vmul.f32 %v3248_v23, %v1954_v13  ;;  %v2460_v7 = vsub.f32 0.0, %v2332_v22  ;;  %v1757_v60 = vadd.f32 -0.28449672, %v1693_v54 }
 0x269   :  { %v1956_v10 = vmul.f32 %v4345_v44, %v1892_v0  ;;  %v1507_v28 = vadd.f32 -1.4531521, %v1443_v14  ;;  %3257 = vpow2.f32 %v2172_v19  ;;  %v1445_v2 = vmul.f32 1.0614054, %v4403_v25  ;;  %v4428_v19 = vpop.permute.xlu1 %475 }
 0x26a   :  { %v3254_v5 = vpop.eup %3253  ;;  %v2338_v34 = vsub.f32 1.0, %v2274_v49  ;;  %v4419_v51 = vand.u32 2147483647, %v4401_v29  ;;  %v994_v11 = vmul.f32 0.5, %v4222_v17  ;;  %vm2402_vm3 = vcmp.lt.f32.partialorder %v4232_v63, 0.0  ;;  %5890 = vst [vmem:[#allocation14_spill] sm:$0xff] %v4428_v19 }
 0x26b   :  { %v2276_v58 = vmul.f32 %v3254_v5, %v1956_v10  ;;  %v1450_v53 = vmul.f32 1.0614054, %v4409_v15  ;;  %v2586_v50 = vadd.f32 1.0, %v2522_v9  ;;  %v1883_v54 = vadd.f32 0.2548296, %v1819_v52  ;;  %v4433_v49 = vpop.f32.mrb[31].mxu1 }
 0x26c   :  { %v2466_v61 = vsub.f32 0.0, %v2338_v34  ;;  %v996_v44 = vmul.f32 0.5, %v4236_v38  ;;  %v2524_v59 = vsel %vm2396_vm2, %v2460_v7, %v2332_v22  ;;  %v1821_v14 = vmul.f32 %v4315_v40, %v1757_v60  ;;  %5891 = vst [vmem:[#allocation33_spill] sm:$0xff] %v4433_v49 }
 0x26d   :  { %3259 = vpow2.f32 %v2176_v27  ;;  %v2340_v23 = vsub.f32 1.0, %v2276_v58  ;;  %v1571_v63 = vmul.f32 %v4376_v4, %v1507_v28  ;;  %v1509_v13 = vadd.f32 -1.4531521, %v1445_v2  ;;  %v5893_v27 = vld [vmem:[#allocation15_spill] sm:$0xff] }
 0x26e   :  { %v2530_v17 = vsel %vm2402_vm3, %v2466_v61, %v2338_v34  ;;  %v1195_v0 = vmul.f32 0.3275911, %v4419_v51  ;;  %vm2404_vm4 = vcmp.lt.f32.partialorder %v4249_v3, 0.0  ;;  %v1514_v38 = vadd.f32 -1.4531521, %v1450_v53  ;;  %v5895_v34 = vld [vmem:[#allocation16_spill] sm:$0xff] }
 0x26f   :  { %v2594_v9 = vadd.f32 1.0, %v2530_v17  ;;  %v2468_v52 = vsub.f32 0.0, %v2340_v23  ;;  %v4436_v57 = vmul.f32 %v2586_v50, %v4310_v41  ;;  %v2588_v60 = vadd.f32 1.0, %v2524_v59 }
 0x270   :  { %v1947_v22 = vmul.f32 %v4280_v21, %v1883_v54  ;;  %v4441_v7 = vadd.f32 %v5893_v27, %v4291_v36  ;;  %v1885_v10 = vadd.f32 0.2548296, %v1821_v14  ;;  %v4449_v2 = vadd.f32 %v5895_v34, %v4428_v19 }
 0x271   :  { %5892 = vst [vmem:[#allocation47_spill] sm:$0xff] %v4436_v57  ;;  %v4443_v28 = vpop.eup %3255  ;;  %v4445_v5 = vmul.f32 %v2594_v9, %v994_v11  ;;  %v2532_v3 = vsel %vm2404_vm4, %v2468_v52, %v2340_v23  ;;  %v1635_v41 = vadd.f32 1.4214138, %v1571_v63  ;;  %v1573_v53 = vmul.f32 %v4403_v25, %v1509_v13 }
 0x272   :  { %v2596_v58 = vadd.f32 1.0, %v2532_v3  ;;  %v1259_v50 = vadd.f32 1.0, %v1195_v0  ;;  %v2581_v21 = vadd.f32 1.0, %v2517_v56  ;;  %v2019_v61 = vsub.f32 0.0, %v4278_v26 }
 0x273   :  { %5894 = vst [vmem:[#allocation15_spill] sm:$0xff] %v4445_v5  ;;  %v1578_v59 = vmul.f32 %v4409_v15, %v1514_v38  ;;  %v3258_v11 = vpop.eup %3257  ;;  %v4457_v14 = vmul.f32 %v2588_v60, %v4318_v47  ;;  %v1452_v17 = vmul.f32 1.0614054, %v4443_v28  ;;  %v4463_v63 = vmul.f32 0.70710677, %v4441_v7 }
 0x274   :  { %v4459_v23 = vmul.f32 %v2596_v58, %v996_v44  ;;  %v2267_v13 = vmul.f32 %v3258_v11, %v1947_v22  ;;  %v1949_v56 = vmul.f32 %v4315_v40, %v1885_v10  ;;  %v2021_v0 = vsub.f32 0.0, %v4313_v43 }
 0x275   :  { %5896 = vst [vmem:[#allocation16_spill] sm:$0xff] %v4457_v14  ;;  %v4468_v9 = vmul.f32 0.70710677, %v4449_v2  ;;  %v1699_v47 = vmul.f32 %v4376_v4, %v1635_v41  ;;  %v1637_v44 = vadd.f32 1.4214138, %v1573_v53  ;;  %3261 = vrcp.f32 %v1259_v50 }
 0x276   :  { %5897 = vst [vmem:[#allocation48_spill] sm:$0xff] %v4459_v23  ;;  %v4475_v60 = vmul.f32 %v4373_v35, %v4241_v37  ;;  %v1642_v22 = vadd.f32 1.4214138, %v1578_v59  ;;  %v4478_v40 = vand.u32 2147483647, %v4463_v63  ;;  %v4485_v10 = vmul.f32 %v4405_v33, %v4283_v16  ;;  %v4490_v37 = vpop.f32.mrb[32].mxu0 }
 0x277   :  { %v3260_v38 = vpop.eup %3259  ;;  %v4481_v27 = vand.u32 2147483647, %v4468_v9  ;;  %vm2395_vm5 = vcmp.lt.f32.partialorder %v4162_v42, 0.0  ;;  %v2083_v3 = vmul.f32 %v2019_v61, %v4278_v26  ;;  %v2026_v34 = vsub.f32 0.0, %v4339_v31  ;;  %5900 = vst [vmem:[#allocation51_spill] sm:$0xff] %v4490_v37  ;;  %v4497_v59 = vpop.f32.mrb[32].mxu1 }
 0x278   :  { %5898 = vst [vmem:[#allocation49_spill] sm:$0xff] %v4475_v60  ;;  %5899 = vst [vmem:[#allocation50_spill] sm:$0xff] %v4485_v10  ;;  %v1516_v58 = vadd.f32 -1.4531521, %v1452_v17  ;;  %v4493_v35 = vmul.f32 %v2581_v21, %v4287_v1  ;;  %v2331_v41 = vsub.f32 1.0, %v2267_v13  ;;  %v2085_v53 = vmul.f32 %v2021_v0, %v4313_v43  ;;  %v5903_v21 = vld [vmem:[#allocation17_spill] sm:$0xff] }
 0x279   :  { %v1197_v50 = vmul.f32 0.3275911, %v4478_v40  ;;  %5902 = vst [vmem:[#allocation53_spill] sm:$0xff] %v4497_v59  ;;  %v2269_v16 = vmul.f32 %v3260_v38, %v1949_v56  ;;  %v1763_v33 = vadd.f32 -0.28449672, %v1699_v47  ;;  %v1701_v11 = vmul.f32 %v4403_v25, %v1637_v44 }
 0x27a   :  { %5901 = vst [vmem:[#allocation52_spill] sm:$0xff] %v4493_v35  ;;  %v1202_v26 = vmul.f32 0.3275911, %v4481_v27  ;;  %v4502_v61 = vmul.f32 0.5, %v4253_v32  ;;  %v1706_v17 = vmul.f32 %v4409_v15, %v1642_v22  ;;  %v4507_v13 = vadd.f32 %v5903_v21, %v4428_v19 }
 0x27b   :  { %v1261_v1 = vadd.f32 1.0, %v1197_v50  ;;  %v2188_v43 = vmul.f32 1.442695, %v2083_v3  ;;  %v2090_v0 = vmul.f32 %v2026_v34, %v4339_v31  ;;  %v1580_v56 = vmul.f32 %v4443_v28, %v1516_v58 }
 0x27c   :  { %v1266_v47 = vadd.f32 1.0, %v1202_v26  ;;  %v2459_v38 = vsub.f32 0.0, %v2331_v41  ;;  %vm2397_vm6 = vcmp.lt.f32.partialorder %v4203_v20, 0.0  ;;  %v2192_v44 = vmul.f32 1.442695, %v2085_v53 }
 0x27d   :  { %v2028_v32 = vsub.f32 0.0, %v4361_v39  ;;  %3263 = vrcp.f32 %v1261_v1  ;;  %v2333_v52 = vsub.f32 1.0, %v2269_v16  ;;  %v1827_v22 = vmul.f32 %v4376_v4, %v1763_v33  ;;  %v5904_v16 = vld [vmem:[#allocation18_spill] sm:$0xff] }
 0x27e   :  { %v1765_v50 = vadd.f32 -0.28449672, %v1701_v11  ;;  %3265 = vrcp.f32 %v1266_v47  ;;  %v4515_v21 = vmul.f32 0.5, %v4271_v6  ;;  %v4518_v31 = vmul.f32 0.5, %v4303_v62  ;;  %v4529_v11 = vpop.f32.mrb[33].mxu0 }
 0x27f   :  { %v1770_v3 = vadd.f32 -0.28449672, %v1706_v17  ;;  %v4521_v34 = vmul.f32 0.70710677, %v4507_v13  ;;  %v4523_v58 = vpop.eup %3261  ;;  %3267 = vpow2.f32 %v2188_v43  ;;  %v2202_v53 = vmul.f32 1.442695, %v2090_v0 }
 0x280   :  { %v1644_v26 = vadd.f32 1.4214138, %v1580_v56  ;;  %v4527_v33 = vadd.f32 %v5904_v16, %v4428_v19  ;;  %5905 = vst [vmem:[#allocation17_spill] sm:$0xff] %v4529_v11  ;;  %v2523_v6 = vsel %vm2395_vm5, %v2459_v38, %v2331_v41  ;;  %3269 = vpow2.f32 %v2192_v44  ;;  %v5906_v41 = vld [vmem:[#allocation19_spill] sm:$0xff] }
 0x281   :  { %v2092_v62 = vmul.f32 %v2028_v32, %v4361_v39  ;;  %v4535_v17 = vand.u32 2147483647, %v4521_v34  ;;  %v2461_v1 = vsub.f32 0.0, %v2333_v52  ;;  %v1891_v47 = vadd.f32 0.2548296, %v1827_v22  ;;  %v4548_v39 = vpop.f32.mrb[33].mxu1 }
 0x282   :  { %v1829_v43 = vmul.f32 %v4403_v25, %v1765_v50  ;;  %v4539_v0 = vmul.f32 0.70710677, %v4527_v33  ;;  %v1834_v56 = vmul.f32 %v4409_v15, %v1770_v3  ;;  %v1451_v16 = vmul.f32 1.0614054, %v4523_v58  ;;  %5907 = vst [vmem:[#allocation18_spill] sm:$0xff] %v4548_v39 }
 0x283   :  { %v1204_v42 = vmul.f32 0.3275911, %v4535_v17  ;;  %v4546_v38 = vadd.f32 %v5906_v41, %v4428_v19  ;;  %3271 = vpow2.f32 %v2202_v53  ;;  %v4551_v44 = vmul.f32 0.5, %v4324_v30 }
 0x284   :  { %v1708_v32 = vmul.f32 %v4443_v28, %v1644_v26  ;;  %v2034_v22 = vsub.f32 0.0, %v4481_v27  ;;  %v4555_v50 = vadd.f32 1.0, %v2523_v6  ;;  %v2206_v3 = vmul.f32 1.442695, %v2092_v62 }
 0x285   :  { %v1268_v54 = vadd.f32 1.0, %v1204_v42  ;;  %v4558_v14 = vand.u32 2147483647, %v4539_v0  ;;  %v2525_v41 = vsel %vm2397_vm6, %v2461_v1, %v2333_v52  ;;  %v1893_v23 = vadd.f32 0.2548296, %v1829_v43  ;;  %v5909_v52 = vld [vmem:[#allocation5_spill] sm:$0xff] }
 0x286   :  { %v2027_v53 = vsub.f32 0.0, %v4419_v51  ;;  %v4564_v30 = vmul.f32 0.70710677, %v4546_v38  ;;  %v1955_v26 = vmul.f32 %v4376_v4, %v1891_v47  ;;  %v1898_v6 = vadd.f32 0.2548296, %v1834_v56  ;;  %v5910_v1 = vld [vmem:[#allocation25_spill] sm:$0xff] }
 0x287   :  { %v4566_v57 = vpop.eup %3263  ;;  %v1515_v5 = vadd.f32 -1.4531521, %v1451_v16  ;;  %3273 = vrcp.f32 %v1268_v54  ;;  %v1772_v42 = vadd.f32 -0.28449672, %v1708_v32  ;;  %v4572_v35 = vmul.f32 0.5, %v4385_v46 }
 0x288   :  { %5908 = vst [vmem:[#allocation19_spill] sm:$0xff] %v4564_v30  ;;  %v4569_v62 = vpop.eup %3265  ;;  %v2098_v20 = vmul.f32 %v2034_v22, %v4481_v27  ;;  %v4577_v43 = vadd.f32 %v5910_v1, %v5909_v52  ;;  %3275 = vpow2.f32 %v2206_v3  ;;  %v1203_v4 = vmul.f32 0.3275911, %v4558_v14 }
 0x289   :  { %v1458_v60 = vmul.f32 1.0614054, %v4569_v62  ;;  %v4582_v47 = vand.u32 2147483647, %v4564_v30  ;;  %v3268_v54 = vpop.eup %3267  ;;  %v4584_v56 = vadd.f32 1.0, %v2525_v41  ;;  %v1957_v46 = vmul.f32 %v4403_v25, %v1893_v23 }
 0x28a   :  { %v2091_v16 = vmul.f32 %v2027_v53, %v4419_v51  ;;  %v1453_v27 = vmul.f32 1.0614054, %v4566_v57  ;;  %v3270_v32 = vpop.eup %3269  ;;  %v4589_v22 = vmul.f32 %v3268_v54, %v1955_v26  ;;  %v1962_v3 = vmul.f32 %v4409_v15, %v1898_v6  ;;  %v5912_v53 = vld [vmem:[#allocation26_spill] sm:$0xff] }
 0x28b   :  { %v1579_v1 = vmul.f32 %v4523_v58, %v1515_v5  ;;  %v1522_v10 = vadd.f32 -1.4531521, %v1458_v60  ;;  %v1836_v19 = vmul.f32 %v4443_v28, %v1772_v42  ;;  %v2218_v36 = vmul.f32 1.442695, %v2098_v20 }
 0x28c   :  { %v2036_v41 = vsub.f32 0.0, %v4535_v17  ;;  %v4596_v39 = vmul.f32 0.70710677, %v4577_v43  ;;  %v1267_v51 = vadd.f32 1.0, %v1203_v4  ;;  %v1205_v23 = vmul.f32 0.3275911, %v4582_v47 }
 0x28d   :  { %v1586_v25 = vmul.f32 %v4569_v62, %v1522_v10  ;;  %v4602_v26 = vadd.f32 %v5912_v53, %v5909_v52  ;;  %v3272_v15 = vpop.eup %3271  ;;  %v4604_v5 = vmul.f32 %v3270_v32, %v1957_v46  ;;  %v2204_v60 = vmul.f32 1.442695, %v2091_v16  ;;  %v4617_v46 = vpop.f32.mrb[34].mxu0 }
 0x28e   :  { %5911 = vst [vmem:[#allocation5_spill] sm:$0xff] %v4596_v39  ;;  %v1517_v6 = vadd.f32 -1.4531521, %v1453_v27  ;;  %v4607_v42 = vand.u32 2147483647, %v4596_v39  ;;  %v2339_v20 = vsub.f32 1.0, %v4589_v22  ;;  %v4610_v54 = vmul.f32 %v3272_v15, %v1962_v3 }
 0x28f   :  { %v1643_v10 = vadd.f32 1.4214138, %v1579_v1  ;;  %v1650_v4 = vadd.f32 1.4214138, %v1586_v25  ;;  %3277 = vpow2.f32 %v2218_v36  ;;  %v2100_v11 = vmul.f32 %v2036_v41, %v4535_v17  ;;  %5914 = vst [vmem:[#allocation26_spill] sm:$0xff] %v4617_v46 }
 0x290   :  { %v1150_v53 = vmul.f32 0.3275911, %v4607_v42  ;;  %v4615_v59 = vmul.f32 0.70710677, %v4602_v26  ;;  %v1900_v27 = vadd.f32 0.2548296, %v1836_v19  ;;  %3279 = vrcp.f32 %v1267_v51 }
 0x291   :  { %v4619_v16 = vpop.eup %3273  ;;  %v1714_v32 = vmul.f32 %v4569_v62, %v1650_v4  ;;  %v1269_v22 = vadd.f32 1.0, %v1205_v23  ;;  %v2341_v3 = vsub.f32 1.0, %v4604_v5  ;;  %v1581_v36 = vmul.f32 %v4566_v57, %v1517_v6  ;;  %v5915_v4 = vld [vmem:[#allocation27_spill] sm:$0xff] }
 0x292   :  { %5913 = vst [vmem:[#allocation25_spill] sm:$0xff] %v4615_v59  ;;  %v1460_v17 = vmul.f32 1.0614054, %v4619_v16  ;;  %v1214_v1 = vadd.f32 1.0, %v1150_v53  ;;  %v3276_v41 = vpop.eup %3275  ;;  %vm2403_vm7 = vcmp.lt.f32.partialorder %v4266_v8, 0.0  ;;  %vm2410_vm8 = vcmp.lt.f32.partialorder %v4327_v45, 0.0 }
 0x293   :  { %v1707_v25 = vmul.f32 %v4523_v58, %v1643_v10  ;;  %v2029_v19 = vsub.f32 0.0, %v4478_v40  ;;  %v1778_v15 = vadd.f32 -0.28449672, %v1714_v32  ;;  %v4630_v51 = vand.u32 2147483647, %v4615_v59  ;;  %v4642_v59 = vpop.f32.mrb[34].mxu1 }
 0x294   :  { %vm2405_vm9 = vcmp.lt.f32.partialorder %v4296_v55, 0.0  ;;  %v2346_v23 = vsub.f32 1.0, %v4610_v54  ;;  %v1524_v5 = vadd.f32 -1.4531521, %v1460_v17  ;;  %v2222_v6 = vmul.f32 1.442695, %v2100_v11 }
 0x295   :  { %v4636_v53 = vadd.f32 %v5915_v4, %v5909_v52  ;;  %v1964_v46 = vmul.f32 %v4443_v28, %v1900_v27  ;;  %v1842_v10 = vmul.f32 %v4569_v62, %v1778_v15  ;;  %3281 = vrcp.f32 %v1269_v22  ;;  %v4676_v45 = vpop.f32.mrb[35].mxu0 }
 0x296   :  { %v1152_v32 = vmul.f32 0.3275911, %v4630_v51  ;;  %v2467_v37 = vsub.f32 0.0, %v2339_v20  ;;  %v1645_v49 = vadd.f32 1.4214138, %v1581_v36  ;;  %v1588_v48 = vmul.f32 %v4619_v16, %v1524_v5  ;;  %5918 = vst [vmem:[#allocation55_spill] sm:$0xff] %v4676_v45 }
 0x297   :  { %3283 = vrcp.f32 %v1214_v1  ;;  %v2469_v54 = vsub.f32 0.0, %v2341_v3  ;;  %v1771_v11 = vadd.f32 -0.28449672, %v1707_v25  ;;  %v1906_v17 = vadd.f32 0.2548296, %v1842_v10 }
 0x298   :  { %v1216_v39 = vadd.f32 1.0, %v1152_v32  ;;  %v2474_v4 = vsub.f32 0.0, %v2346_v23  ;;  %v1652_v30 = vadd.f32 1.4214138, %v1588_v48  ;;  %3285 = vpow2.f32 %v2222_v6 }
 0x299   :  { %v4645_v28 = vmul.f32 0.70710677, %v4636_v53  ;;  %v2284_v27 = vmul.f32 %v3276_v41, %v1964_v46  ;;  %v2093_v22 = vmul.f32 %v2029_v19, %v4478_v40  ;;  %v1970_v36 = vmul.f32 %v4569_v62, %v1906_v17  ;;  %v3278_v15 = vpop.eup %3277 }
 0x29a   :  { %3287 = vrcp.f32 %v1216_v39  ;;  %v4651_v1 = vmul.f32 %v4555_v50, %v4379_v12  ;;  %v1709_v25 = vmul.f32 %v4566_v57, %v1645_v49  ;;  %v1716_v5 = vmul.f32 %v4619_v16, %v1652_v30  ;;  %v4658_v6 = vpop.eup %3279 }
 0x29b   :  { %v4656_v48 = vand.u32 2147483647, %v4645_v28  ;;  %v4662_v40 = vmul.f32 %v4584_v56, %v4397_v24  ;;  %v1835_v39 = vmul.f32 %v4523_v58, %v1771_v11  ;;  %3289 = vpow2.f32 %v2204_v60 }
 0x29c   :  { %5916 = vst [vmem:[#allocation27_spill] sm:$0xff] %v4651_v1  ;;  %v2290_v62 = vmul.f32 %v3278_v15, %v1970_v36  ;;  %v2531_v12 = vsel %vm2403_vm7, %v2467_v37, %v2339_v20  ;;  %v2538_v49 = vsel %vm2410_vm8, %v2474_v4, %v2346_v23  ;;  %vm2412_vm10 = vcmp.lt.f32.partialorder %v4343_v18, 0.0 }
 0x29d   :  { %5917 = vst [vmem:[#allocation54_spill] sm:$0xff] %v4662_v40  ;;  %v1780_v50 = vadd.f32 -0.28449672, %v1716_v5  ;;  %v1151_v30 = vmul.f32 0.3275911, %v4656_v48  ;;  %v2533_v46 = vsel %vm2405_vm9, %v2469_v54, %v2341_v3  ;;  %v2348_v24 = vsub.f32 1.0, %v2284_v27 }
 0x29e   :  { %v2208_v56 = vmul.f32 1.442695, %v2093_v22  ;;  %v2354_v41 = vsub.f32 1.0, %v2290_v62  ;;  %v1773_v19 = vadd.f32 -0.28449672, %v1709_v25  ;;  %v1010_v60 = vmul.f32 0.5, %v4449_v2 }
 0x29f   :  { %v1844_v8 = vmul.f32 %v4619_v16, %v1780_v50  ;;  %v1459_v37 = vmul.f32 1.0614054, %v4658_v6  ;;  %v4678_v20 = vpop.eup %3281  ;;  %v2595_v23 = vadd.f32 1.0, %v2531_v12  ;;  %v2602_v10 = vadd.f32 1.0, %v2538_v49  ;;  %v5919_v27 = vld [vmem:[#allocation31_spill] sm:$0xff] }
 0x2a0   :  { %v1899_v32 = vadd.f32 0.2548296, %v1835_v39  ;;  %v2482_v11 = vsub.f32 0.0, %v2354_v41  ;;  %v2597_v3 = vadd.f32 1.0, %v2533_v46  ;;  %vm2418_vm11 = vcmp.lt.f32.partialorder %v4468_v9, 0.0 }
 0x2a1   :  { %v4680_v55 = vpop.eup %3283  ;;  %v1908_v54 = vadd.f32 0.2548296, %v1844_v8  ;;  %v1215_v17 = vadd.f32 1.0, %v1151_v30  ;;  %v2476_v2 = vsub.f32 0.0, %v2348_v24  ;;  %3291 = vpow2.f32 %v2208_v56 }
 0x2a2   :  { %v2546_v4 = vsel %vm2418_vm11, %v2482_v11, %v2354_v41  ;;  %v4685_v22 = vadd.f32 %v5919_v27, %v5909_v52  ;;  %v3286_v36 = vpop.eup %3285  ;;  %v1837_v15 = vmul.f32 %v4566_v57, %v1773_v19  ;;  %v1523_v39 = vadd.f32 -1.4531521, %v1459_v37  ;;  %v4709_v19 = vpop.f32.mrb[35].mxu1 }
 0x2a3   :  { %v2610_v25 = vadd.f32 1.0, %v2546_v4  ;;  %v1972_v5 = vmul.f32 %v4619_v16, %v1908_v54  ;;  %v4692_v9 = vmul.f32 %v2602_v10, %v4518_v31  ;;  %v1963_v12 = vmul.f32 %v4523_v58, %v1899_v32  ;;  %5922 = vst [vmem:[#allocation57_spill] sm:$0xff] %v4709_v19 }
 0x2a4   :  { %v4689_v62 = vpop.eup %3287  ;;  %v1461_v49 = vmul.f32 1.0614054, %v4678_v20  ;;  %v1406_v50 = vmul.f32 1.0614054, %v4680_v55  ;;  %3293 = vrcp.f32 %v1215_v17  ;;  %v2540_v16 = vsel %vm2412_vm10, %v2476_v2, %v2348_v24 }
 0x2a5   :  { %5920 = vst [vmem:[#allocation31_spill] sm:$0xff] %v4692_v9  ;;  %v4697_v52 = vmul.f32 %v2610_v25, %v1010_v60  ;;  %v2292_v30 = vmul.f32 %v3286_v36, %v1972_v5  ;;  %v1408_v46 = vmul.f32 1.0614054, %v4689_v62  ;;  %v3290_v56 = vpop.eup %3289  ;;  %v4703_v41 = vmul.f32 0.5, %v4441_v7 }
 0x2a6   :  { %v2035_v31 = vsub.f32 0.0, %v4558_v14  ;;  %v4707_v58 = vmul.f32 0.70710677, %v4685_v22  ;;  %v1901_v60 = vadd.f32 0.2548296, %v1837_v15  ;;  %v1587_v10 = vmul.f32 %v4658_v6, %v1523_v39 }
 0x2a7   :  { %5921 = vst [vmem:[#allocation56_spill] sm:$0xff] %v4697_v52  ;;  %v2356_v37 = vsub.f32 1.0, %v2292_v30  ;;  %v4715_v18 = vmul.f32 %v2595_v23, %v4502_v61  ;;  %v1525_v24 = vadd.f32 -1.4531521, %v1461_v49  ;;  %v1470_v7 = vadd.f32 -1.4531521, %v1406_v50 }
 0x2a8   :  { %v4718_v32 = vand.u32 2147483647, %v4707_v58  ;;  %v4721_v11 = vmul.f32 %v2597_v3, %v4515_v21  ;;  %v2283_v54 = vmul.f32 %v3290_v56, %v1963_v12  ;;  %v1472_v2 = vadd.f32 -1.4531521, %v1408_v46  ;;  %v5925_v30 = vld [vmem:[#allocation6_spill] sm:$0xff] }
 0x2a9   :  { %5923 = vst [vmem:[#allocation58_spill] sm:$0xff] %v4715_v18  ;;  %v2484_v17 = vsub.f32 0.0, %v2356_v37  ;;  %v2604_v4 = vadd.f32 1.0, %v2540_v16  ;;  %vm2420_vm12 = vcmp.lt.f32.partialorder %v4521_v34, 0.0  ;;  %v2037_v27 = vsub.f32 0.0, %v4582_v47 }
 0x2aa   :  { %5924 = vst [vmem:[#allocation59_spill] sm:$0xff] %v4721_v11  ;;  %v1153_v36 = vmul.f32 0.3275911, %v4718_v32  ;;  %v1965_v61 = vmul.f32 %v4566_v57, %v1901_v60  ;;  %v1012_v23 = vmul.f32 0.5, %v4507_v13  ;;  %v1651_v25 = vadd.f32 1.4214138, %v1587_v10 }
 0x2ab   :  { %v2548_v15 = vsel %vm2420_vm12, %v2484_v17, %v2356_v37  ;;  %v3292_v5 = vpop.eup %3291  ;;  %vm2411_vm13 = vcmp.lt.f32.partialorder %v4401_v29, 0.0  ;;  %v2099_v3 = vmul.f32 %v2035_v31, %v4558_v14  ;;  %v1589_v39 = vmul.f32 %v4678_v20, %v1525_v24  ;;  %v5926_v57 = vld [vmem:[#allocation34_spill] sm:$0xff]  ;;  %v4746_v31 = vpop.f32.mrb[36].mxu0 }
 0x2ac   :  { %v2612_v21 = vadd.f32 1.0, %v2548_v15  ;;  %v1534_v34 = vmul.f32 %v4680_v55, %v1470_v7  ;;  %v2347_v12 = vsub.f32 1.0, %v2283_v54  ;;  %v1536_v49 = vmul.f32 %v4689_v62, %v1472_v2  ;;  %5929 = vst [vmem:[#allocation60_spill] sm:$0xff] %v4746_v31  ;;  %v4767_v15 = vpop.f32.mrb[36].mxu1  ;;  %v5932_v29 = vld [vmem:[#allocation38_spill] sm:$0xff] }
 0x2ad   :  { %v1217_v50 = vadd.f32 1.0, %v1153_v36  ;;  %v4735_v46 = vadd.f32 %v5926_v57, %v5925_v30  ;;  %v4738_v13 = vmul.f32 %v2604_v4, %v4551_v44  ;;  %v4743_v16 = vmul.f32 0.5, %v4527_v33 }
 0x2ae   :  { %v4740_v56 = vmul.f32 %v2612_v21, %v1012_v23  ;;  %v2101_v14 = vmul.f32 %v2037_v27, %v4582_v47  ;;  %v4748_v60 = vpop.eup %3293  ;;  %v2285_v37 = vmul.f32 %v3292_v5, %v1965_v61  ;;  %v1715_v10 = vmul.f32 %v4658_v6, %v1651_v25  ;;  %v5930_v61 = vld [vmem:[#allocation37_spill] sm:$0xff] }
 0x2af   :  { %5927 = vst [vmem:[#allocation6_spill] sm:$0xff] %v4738_v13  ;;  %v4752_v24 = vmul.f32 0.5, %v4546_v38  ;;  %3295 = vrcp.f32 %v1217_v50  ;;  %v2220_v7 = vmul.f32 1.442695, %v2099_v3  ;;  %v1653_v54 = vadd.f32 1.4214138, %v1589_v39 }
 0x2b0   :  { %5928 = vst [vmem:[#allocation34_spill] sm:$0xff] %v4740_v56  ;;  %v1598_v33 = vadd.f32 1.4214138, %v1534_v34  ;;  %v2475_v17 = vsub.f32 0.0, %v2347_v12  ;;  %v1982_v47 = vsub.f32 0.0, %v4607_v42  ;;  %vm2413_vm14 = vcmp.lt.f32.partialorder %v4463_v63, 0.0 }
 0x2b1   :  { %v1600_v2 = vadd.f32 1.4214138, %v1536_v49  ;;  %v4758_v4 = vmul.f32 0.70710677, %v4735_v46  ;;  %v2224_v27 = vmul.f32 1.442695, %v2101_v14  ;;  %v4765_v23 = vadd.f32 %v5930_v61, %v5925_v30 }
 0x2b2   :  { %v1984_v38 = vsub.f32 0.0, %v4630_v51  ;;  %v1407_v36 = vmul.f32 1.0614054, %v4748_v60  ;;  %5931 = vst [vmem:[#allocation37_spill] sm:$0xff] %v4767_v15  ;;  %v2349_v25 = vsub.f32 1.0, %v2285_v37  ;;  %v4770_v21 = vmul.f32 0.5, %v4577_v43 }
 0x2b3   :  { %v1779_v5 = vadd.f32 -0.28449672, %v1715_v10  ;;  %v4773_v3 = vand.u32 2147483647, %v4758_v4  ;;  %v1717_v39 = vmul.f32 %v4678_v20, %v1653_v54  ;;  %v1662_v34 = vmul.f32 %v4680_v55, %v1598_v33  ;;  %v4801_v13 = vpop.f32.mrb[37].mxu0 }
 0x2b4   :  { %v4778_v49 = vmul.f32 0.5, %v4602_v26  ;;  %v4781_v50 = vmul.f32 0.70710677, %v4765_v23  ;;  %v2539_v57 = vsel %vm2411_vm13, %v2475_v17, %v2347_v12  ;;  %v2046_v14 = vmul.f32 %v1982_v47, %v4607_v42  ;;  %5933 = vst [vmem:[#allocation38_spill] sm:$0xff] %v4801_v13 }
 0x2b5   :  { %v1664_v43 = vmul.f32 %v4689_v62, %v1600_v2  ;;  %v1158_v37 = vmul.f32 0.3275911, %v4773_v3  ;;  %v2048_v10 = vmul.f32 %v1984_v38, %v4630_v51  ;;  %v1471_v54 = vadd.f32 -1.4531521, %v1407_v36 }
 0x2b6   :  { %v1983_v33 = vsub.f32 0.0, %v4656_v48  ;;  %v4791_v26 = vand.u32 2147483647, %v4781_v50  ;;  %v2477_v61 = vsub.f32 0.0, %v2349_v25  ;;  %v1843_v44 = vmul.f32 %v4658_v6, %v1779_v5 }
 0x2b7   :  { %v1222_v8 = vadd.f32 1.0, %v1158_v37  ;;  %v4796_v12 = vadd.f32 %v5932_v29, %v5925_v30  ;;  %3297 = vpow2.f32 %v2220_v7  ;;  %v1781_v42 = vadd.f32 -0.28449672, %v1717_v39 }
 0x2b8   :  { %v1726_v17 = vadd.f32 -0.28449672, %v1662_v34  ;;  %v1160_v47 = vmul.f32 0.3275911, %v4791_v26  ;;  %v2603_v2 = vadd.f32 1.0, %v2539_v57  ;;  %v1535_v5 = vmul.f32 %v4748_v60, %v1471_v54 }
 0x2b9   :  { %v4799_v51 = vpop.eup %3295  ;;  %v2114_v38 = vmul.f32 1.442695, %v2046_v14  ;;  %v1728_v36 = vadd.f32 -0.28449672, %v1664_v43  ;;  %3299 = vrcp.f32 %v1222_v8  ;;  %v2118_v56 = vmul.f32 1.442695, %v2048_v10 }
 0x2ba   :  { %v2047_v37 = vmul.f32 %v1983_v33, %v4656_v48  ;;  %v1224_v29 = vadd.f32 1.0, %v1160_v47  ;;  %v2541_v7 = vsel %vm2413_vm14, %v2477_v61, %v2349_v25  ;;  %v1907_v39 = vadd.f32 0.2548296, %v1843_v44  ;;  %v4820_v44 = vpop.f32.mrb[37].mxu1 }
 0x2bb   :  { %3301 = vpow2.f32 %v2224_v27  ;;  %v4808_v34 = vmul.f32 0.70710677, %v4796_v12  ;;  %v1845_v57 = vmul.f32 %v4678_v20, %v1781_v42  ;;  %v1790_v8 = vmul.f32 %v4680_v55, %v1726_v17  ;;  %5935 = vst [vmem:[#allocation62_spill] sm:$0xff] %v4820_v44 }
 0x2bc   :  { %v1409_v14 = vmul.f32 1.0614054, %v4799_v51  ;;  %3303 = vrcp.f32 %v1224_v29  ;;  %v4814_v43 = vmul.f32 %v2603_v2, %v4572_v35  ;;  %v1792_v48 = vmul.f32 %v4689_v62, %v1728_v36  ;;  %v5936_v35 = vld [vmem:[#allocation41_spill] sm:$0xff]  ;;  %v5938_v36 = vld [vmem:[#allocation7_spill] sm:$0xff] }
 0x2bd   :  { %3305 = vpow2.f32 %v2114_v38  ;;  %v4818_v63 = vand.u32 2147483647, %v4808_v34  ;;  %v2605_v27 = vadd.f32 1.0, %v2541_v7  ;;  %v1599_v25 = vadd.f32 1.4214138, %v1535_v5  ;;  %v5937_v38 = vld [vmem:[#allocation11_spill] sm:$0xff] }
 0x2be   :  { %5934 = vst [vmem:[#allocation61_spill] sm:$0xff] %v4814_v43  ;;  %3307 = vpow2.f32 %v2118_v56  ;;  %v2116_v10 = vmul.f32 1.442695, %v2047_v37  ;;  %v1971_v54 = vmul.f32 %v4658_v6, %v1907_v39  ;;  %v1990_v33 = vsub.f32 0.0, %v4773_v3 }
 0x2bf   :  { %v1159_v61 = vmul.f32 0.3275911, %v4818_v63  ;;  %v4827_v42 = vadd.f32 %v5936_v35, %v5925_v30  ;;  %v1909_v17 = vadd.f32 0.2548296, %v1845_v57  ;;  %v1854_v47 = vadd.f32 0.2548296, %v1790_v8 }
 0x2c0   :  { %v1473_v2 = vadd.f32 -1.4531521, %v1409_v14  ;;  %v4831_v29 = vadd.f32 %v5938_v36, %v5937_v38  ;;  %v1856_v56 = vadd.f32 0.2548296, %v1792_v48  ;;  %v4834_v5 = vmul.f32 0.5, %v4636_v53 }
 0x2c1   :  { %v1223_v6 = vadd.f32 1.0, %v1159_v61  ;;  %v4837_v37 = vmul.f32 0.70710677, %v4827_v42  ;;  %v3298_v7 = vpop.eup %3297  ;;  %v4840_v39 = vmul.f32 %v2605_v27, %v4703_v41  ;;  %v1663_v30 = vmul.f32 %v4748_v60, %v1599_v25 }
 0x2c2   :  { %v1992_v57 = vsub.f32 0.0, %v4791_v26  ;;  %v4845_v8 = vmul.f32 0.70710677, %v4831_v29  ;;  %v4849_v48 = vmul.f32 %v3298_v7, %v1971_v54  ;;  %v2054_v53 = vmul.f32 %v1990_v33, %v4773_v3 }
 0x2c3   :  { %5939 = vst [vmem:[#allocation41_spill] sm:$0xff] %v4840_v39  ;;  %v4847_v14 = vpop.eup %3299  ;;  %3309 = vrcp.f32 %v1223_v6  ;;  %v4853_v61 = vand.u32 2147483647, %v4837_v37  ;;  %v1973_v41 = vmul.f32 %v4678_v20, %v1909_v17  ;;  %v1537_v27 = vmul.f32 %v4799_v51, %v1473_v2 }
 0x2c4   :  { %v1414_v25 = vmul.f32 1.0614054, %v4847_v14  ;;  %v4859_v35 = vand.u32 2147483647, %v4845_v8  ;;  %v1918_v9 = vmul.f32 %v4680_v55, %v1854_v47  ;;  %v1920_v54 = vmul.f32 %v4689_v62, %v1856_v56 }
 0x2c5   :  { %v3302_v36 = vpop.eup %3301  ;;  %3311 = vpow2.f32 %v2116_v10  ;;  %v1161_v3 = vmul.f32 0.3275911, %v4853_v61  ;;  %v1727_v6 = vadd.f32 -0.28449672, %v1663_v30  ;;  %v2056_v20 = vmul.f32 %v1992_v57, %v4791_v26 }
 0x2c6   :  { %v4864_v33 = vpop.eup %3303  ;;  %v1478_v7 = vadd.f32 -1.4531521, %v1414_v25  ;;  %v1166_v17 = vmul.f32 0.3275911, %v4859_v35  ;;  %v2355_v52 = vsub.f32 1.0, %v4849_v48  ;;  %v1985_v39 = vsub.f32 0.0, %v4718_v32 }
 0x2c7   :  { %v3306_v2 = vpop.eup %3305  ;;  %v2130_v43 = vmul.f32 1.442695, %v2054_v53  ;;  %v1416_v55 = vmul.f32 1.0614054, %v4864_v33  ;;  %vm2419_vm15 = vcmp.lt.f32.partialorder %v4539_v0, 0.0  ;;  %v4872_v10 = vmul.f32 %v3302_v36, %v1973_v41  ;;  %v5940_v41 = vld [vmem:[#allocation8_spill] sm:$0xff] }
 0x2c8   :  { %v3308_v62 = vpop.eup %3307  ;;  %v1601_v47 = vadd.f32 1.4214138, %v1537_v27  ;;  %v1542_v56 = vmul.f32 %v4847_v14, %v1478_v7  ;;  %v1230_v30 = vadd.f32 1.0, %v1166_v17  ;;  %v4875_v26 = vmul.f32 %v3306_v2, %v1918_v9  ;;  %v5941_v36 = vld [vmem:[#allocation10_spill] sm:$0xff]  ;;  %v5942_v17 = vld [vmem:[#allocation19_spill] sm:$0xff] }
 0x2c9   :  { %v4877_v57 = vmul.f32 %v3308_v62, %v1920_v54  ;;  %v1480_v25 = vadd.f32 -1.4531521, %v1416_v55  ;;  %v1225_v48 = vadd.f32 1.0, %v1161_v3  ;;  %v1791_v11 = vmul.f32 %v4748_v60, %v1727_v6 }
 0x2ca   :  { %v1606_v53 = vadd.f32 1.4214138, %v1542_v56  ;;  %v2134_v40 = vmul.f32 1.442695, %v2056_v20  ;;  %3313 = vrcp.f32 %v1230_v30  ;;  %v4883_v27 = vadd.f32 %v5940_v41, %v5937_v38  ;;  %v5943_v56 = vld [vmem:[#allocation5_spill] sm:$0xff] }
 0x2cb   :  { %3315 = vpow2.f32 %v2130_v43  ;;  %v1544_v18 = vmul.f32 %v4864_v33, %v1480_v25  ;;  %v4887_v9 = vadd.f32 %v5941_v36, %v5937_v38  ;;  %v2483_v54 = vsub.f32 0.0, %v2355_v52  ;;  %v4917_v36 = vpop.f32.mrb[38].mxu1 }
 0x2cc   :  { %v1665_v7 = vmul.f32 %v4799_v51, %v1601_v47  ;;  %v2049_v3 = vmul.f32 %v1985_v39, %v4718_v32  ;;  %v1670_v6 = vmul.f32 %v4847_v14, %v1606_v53  ;;  %v2357_v43 = vsub.f32 1.0, %v4872_v10  ;;  %v5944_v47 = vld [vmem:[#allocation25_spill] sm:$0xff]  ;;  %v4910_v53 = vpop.f32.mrb[38].mxu0  ;;  %5946 = vst [vmem:[#allocation7_spill] sm:$0xff] %v4917_v36 }
 0x2cd   :  { %v4892_v20 = vpop.eup %3309  ;;  %vm2421_vm0 = vcmp.lt.f32.partialorder %v5942_v17, 0.0  ;;  %v1608_v2 = vadd.f32 1.4214138, %v1544_v18  ;;  %3317 = vrcp.f32 %v1225_v48  ;;  %v4897_v55 = vmul.f32 0.70710677, %v4883_v27  ;;  %5945 = vst [vmem:[#allocation11_spill] sm:$0xff] %v4910_v53 }
 0x2ce   :  { %v2302_v62 = vsub.f32 1.0, %v4875_v26  ;;  %vm2366_vm1 = vcmp.lt.f32.partialorder %v5943_v56, 0.0  ;;  %vm2368_vm2 = vcmp.lt.f32.partialorder %v5944_v47, 0.0  ;;  %v1855_v32 = vadd.f32 0.2548296, %v1791_v11 }
 0x2cf   :  { %v1734_v39 = vadd.f32 -0.28449672, %v1670_v6  ;;  %3319 = vpow2.f32 %v2134_v40  ;;  %v3312_v30 = vpop.eup %3311  ;;  %v2304_v25 = vsub.f32 1.0, %v4877_v57  ;;  %v1672_v10 = vmul.f32 %v4864_v33, %v1608_v2 }
 0x2d0   :  { %v4905_v18 = vand.u32 2147483647, %v4897_v55  ;;  %v4908_v48 = vmul.f32 0.70710677, %v4887_v9  ;;  %v1729_v26 = vadd.f32 -0.28449672, %v1665_v7  ;;  %v2547_v57 = vsel %vm2419_vm15, %v2483_v54, %v2355_v52 }
 0x2d1   :  { %v4913_v41 = vmul.f32 0.5, %v4735_v46  ;;  %v1798_v11 = vmul.f32 %v4847_v14, %v1734_v39  ;;  %v1415_v40 = vmul.f32 1.0614054, %v4892_v20  ;;  %v2120_v6 = vmul.f32 1.442695, %v2049_v3  ;;  %v5947_v3 = vld [vmem:[#allocation12_spill] sm:$0xff] }
 0x2d2   :  { %v1736_v2 = vadd.f32 -0.28449672, %v1672_v10  ;;  %v1168_v1 = vmul.f32 0.3275911, %v4905_v18  ;;  %v2485_v44 = vsub.f32 0.0, %v2357_v43  ;;  %v2430_v13 = vsub.f32 0.0, %v2302_v62 }
 0x2d3   :  { %v1862_v53 = vadd.f32 0.2548296, %v1798_v11  ;;  %v4923_v7 = vand.u32 2147483647, %v4908_v48  ;;  %v2432_v46 = vsub.f32 0.0, %v2304_v25  ;;  %v1919_v39 = vmul.f32 %v4748_v60, %v1855_v32 }
 0x2d4   :  { %v1800_v15 = vmul.f32 %v4864_v33, %v1736_v2  ;;  %v1232_v31 = vadd.f32 1.0, %v1168_v1  ;;  %v4927_v36 = vpop.eup %3313  ;;  %v1793_v0 = vmul.f32 %v4799_v51, %v1729_v26  ;;  %v1479_v54 = vadd.f32 -1.4531521, %v1415_v40  ;;  %v4950_v40 = vpop.f32.mrb[39].mxu0 }
 0x2d5   :  { %v1926_v52 = vmul.f32 %v4847_v14, %v1862_v53  ;;  %v4933_v10 = vadd.f32 %v5947_v3, %v5937_v38  ;;  %v3316_v11 = vpop.eup %3315  ;;  %v1422_v45 = vmul.f32 1.0614054, %v4927_v36  ;;  %v1167_v60 = vmul.f32 0.3275911, %v4923_v7 }
 0x2d6   :  { %v1864_v19 = vadd.f32 0.2548296, %v1800_v15  ;;  %3321 = vrcp.f32 %v1232_v31  ;;  %v4937_v32 = vadd.f32 1.0, %v2547_v57  ;;  %v2549_v1 = vsel %vm2421_vm0, %v2485_v44, %v2357_v43 }
 0x2d7   :  { %3323 = vpow2.f32 %v2120_v6  ;;  %v2246_v26 = vmul.f32 %v3316_v11, %v1926_v52  ;;  %v4941_v14 = vpop.eup %3317  ;;  %v2494_v38 = vsel %vm2366_vm1, %v2430_v13, %v2302_v62  ;;  %v2496_v15 = vsel %vm2368_vm2, %v2432_v46, %v2304_v25 }
 0x2d8   :  { %v4947_v53 = vmul.f32 %v3312_v30, %v1919_v39  ;;  %v1928_v31 = vmul.f32 %v4864_v33, %v1864_v19  ;;  %v1857_v2 = vadd.f32 0.2548296, %v1793_v0  ;;  %v1543_v44 = vmul.f32 %v4892_v20, %v1479_v54  ;;  %v4966_v54 = vpop.f32.mrb[39].mxu1 }
 0x2d9   :  { %v3320_v57 = vpop.eup %3319  ;;  %v2310_v17 = vsub.f32 1.0, %v2246_v26  ;;  %v4954_v43 = vmul.f32 0.70710677, %v4933_v10  ;;  %vm2374_vm3 = vcmp.lt.f32.partialorder %v4758_v4, 0.0  ;;  %v1486_v62 = vadd.f32 -1.4531521, %v1422_v45 }
 0x2da   :  { %v2248_v13 = vmul.f32 %v3320_v57, %v1928_v31  ;;  %v1231_v56 = vadd.f32 1.0, %v1167_v60  ;;  %v2558_v47 = vadd.f32 1.0, %v2494_v38  ;;  %v2560_v30 = vadd.f32 1.0, %v2496_v15 }
 0x2db   :  { %v2438_v25 = vsub.f32 0.0, %v2310_v17  ;;  %v1417_v19 = vmul.f32 1.0614054, %v4941_v14  ;;  %v2303_v33 = vsub.f32 1.0, %v4947_v53  ;;  %v968_v6 = vmul.f32 0.5, %v4765_v23 }
 0x2dc   :  { %v2312_v46 = vsub.f32 1.0, %v2248_v13  ;;  %v1991_v39 = vsub.f32 0.0, %v4818_v63  ;;  %vm2367_vm4 = vcmp.lt.f32.partialorder %v4645_v28, 0.0  ;;  %v1921_v0 = vmul.f32 %v4799_v51, %v1857_v2 }
 0x2dd   :  { %v2502_v4 = vsel %vm2374_vm3, %v2438_v25, %v2310_v17  ;;  %v1607_v52 = vadd.f32 1.4214138, %v1543_v44  ;;  %v4964_v45 = vand.u32 2147483647, %v4954_v43  ;;  %v1550_v60 = vmul.f32 %v4927_v36, %v1486_v62 }
 0x2de   :  { %v2566_v3 = vadd.f32 1.0, %v2502_v4  ;;  %v2440_v11 = vsub.f32 0.0, %v2312_v46  ;;  %3325 = vrcp.f32 %v1231_v56  ;;  %v4970_v23 = vmul.f32 %v2558_v47, %v4770_v21  ;;  %v5951_v56 = vld [vmem:[#allocation24_spill] sm:$0xff] }
 0x2df   :  { %v4973_v26 = vmul.f32 %v2560_v30, %v4778_v49  ;;  %vm2376_vm5 = vcmp.lt.f32.partialorder %v4781_v50, 0.0  ;;  %v1481_v51 = vadd.f32 -1.4531521, %v1417_v19  ;;  %v2431_v15 = vsub.f32 0.0, %v2303_v33  ;;  %v5952_v47 = vld [vmem:[#allocation28_spill] sm:$0xff] }
 0x2e0   :  { %5948 = vst [vmem:[#allocation8_spill] sm:$0xff] %v4970_v23  ;;  %v4976_v38 = vpop.eup %3321  ;;  %v4979_v53 = vmul.f32 %v2566_v3, %v4913_v41  ;;  %v2504_v31 = vsel %vm2376_vm5, %v2440_v11, %v2312_v46  ;;  %v2055_v57 = vmul.f32 %v1991_v39, %v4818_v63  ;;  %v1671_v21 = vmul.f32 %v4892_v20, %v1607_v52  ;;  %v5954_v11 = vld [vmem:[#allocation30_spill] sm:$0xff] }
 0x2e1   :  { %5949 = vst [vmem:[#allocation10_spill] sm:$0xff] %v4973_v26  ;;  %v3324_v2 = vpop.eup %3323  ;;  %v2568_v17 = vadd.f32 1.0, %v2504_v31  ;;  %v1424_v44 = vmul.f32 1.0614054, %v4976_v38  ;;  %v1169_v49 = vmul.f32 0.3275911, %v4964_v45  ;;  %v4989_v41 = vadd.f32 %v5952_v47, %v5951_v56 }
 0x2e2   :  { %5950 = vst [vmem:[#allocation19_spill] sm:$0xff] %v4979_v53  ;;  %v2241_v13 = vmul.f32 %v3324_v2, %v1921_v0  ;;  %v1614_v62 = vadd.f32 1.4214138, %v1550_v60  ;;  %v1545_v63 = vmul.f32 %v4941_v14, %v1481_v51  ;;  %v1993_v25 = vsub.f32 0.0, %v4853_v61 }
 0x2e3   :  { %v4991_v30 = vmul.f32 %v2568_v17, %v968_v6  ;;  %v1998_v19 = vsub.f32 0.0, %v4859_v35  ;;  %v2613_v46 = vadd.f32 1.0, %v2549_v1  ;;  %v4997_v39 = vmul.f32 0.5, %v4685_v22 }
 0x2e4   :  { %v2132_v0 = vmul.f32 1.442695, %v2055_v57  ;;  %v1488_v4 = vadd.f32 -1.4531521, %v1424_v44  ;;  %vm2369_vm6 = vcmp.lt.f32.partialorder %v4707_v58, 0.0  ;;  %v1233_v6 = vadd.f32 1.0, %v1169_v49 }
 0x2e5   :  { %5953 = vst [vmem:[#allocation5_spill] sm:$0xff] %v4991_v30  ;;  %v1735_v3 = vadd.f32 -0.28449672, %v1671_v21  ;;  %v5004_v60 = vadd.f32 %v5954_v11, %v5951_v56  ;;  %v2495_v51 = vsel %vm2367_vm4, %v2431_v15, %v2303_v33  ;;  %v2305_v1 = vsub.f32 1.0, %v2241_v13 }
 0x2e6   :  { %v1678_v22 = vmul.f32 %v4927_v36, %v1614_v62  ;;  %v5010_v31 = vmul.f32 0.70710677, %v4989_v41  ;;  %v5014_v57 = vmul.f32 %v4937_v32, %v4743_v16  ;;  %v1609_v2 = vadd.f32 1.4214138, %v1545_v63 }
 0x2e7   :  { %v2057_v17 = vmul.f32 %v1993_v25, %v4853_v61  ;;  %v2062_v21 = vmul.f32 %v1998_v19, %v4859_v35  ;;  %v5021_v28 = vmul.f32 %v2613_v46, %v4752_v24  ;;  %3327 = vpow2.f32 %v2132_v0 }
 0x2e8   :  { %v5018_v44 = vpop.eup %3325  ;;  %v1552_v33 = vmul.f32 %v4976_v38, %v1488_v4  ;;  %v5025_v15 = vand.u32 2147483647, %v5010_v31  ;;  %v2559_v49 = vadd.f32 1.0, %v2495_v51  ;;  %v1799_v16 = vmul.f32 %v4892_v20, %v1735_v3 }
 0x2e9   :  { %3329 = vrcp.f32 %v1233_v6  ;;  %v5029_v32 = vmul.f32 0.70710677, %v5004_v60  ;;  %v2433_v61 = vsub.f32 0.0, %v2305_v1  ;;  %v1742_v35 = vadd.f32 -0.28449672, %v1678_v22 }
 0x2ea   :  { %v2000_v13 = vsub.f32 0.0, %v4905_v18  ;;  %v1174_v24 = vmul.f32 0.3275911, %v5025_v15  ;;  %v1673_v62 = vmul.f32 %v4941_v14, %v1609_v2  ;;  %v2136_v47 = vmul.f32 1.442695, %v2057_v17 }
 0x2eb   :  { %v2146_v63 = vmul.f32 1.442695, %v2062_v21  ;;  %v1423_v25 = vmul.f32 1.0614054, %v5018_v44  ;;  %v5036_v19 = vmul.f32 0.5, %v4796_v12  ;;  %v5042_v3 = vmul.f32 %v2559_v49, %v4834_v5 }
 0x2ec   :  { %v1616_v46 = vadd.f32 1.4214138, %v1552_v33  ;;  %v1238_v0 = vadd.f32 1.0, %v1174_v24  ;;  %v5039_v4 = vand.u32 2147483647, %v5029_v32  ;;  %v5045_v11 = vmul.f32 0.5, %v4827_v42 }
 0x2ed   :  { %5955 = vst [vmem:[#allocation25_spill] sm:$0xff] %v5042_v3  ;;  %v1863_v6 = vadd.f32 0.2548296, %v1799_v16  ;;  %v5048_v51 = vmul.f32 0.5, %v4831_v29  ;;  %v2497_v22 = vsel %vm2369_vm6, %v2433_v61, %v2305_v1  ;;  %v1806_v12 = vmul.f32 %v4927_v36, %v1742_v35  ;;  %v5956_v24 = vld [vmem:[#allocation32_spill] sm:$0xff] }
 0x2ee   :  { %v2064_v2 = vmul.f32 %v2000_v13, %v4905_v18  ;;  %3331 = vrcp.f32 %v1238_v0  ;;  %v1737_v17 = vadd.f32 -0.28449672, %v1673_v62  ;;  %v1487_v21 = vadd.f32 -1.4531521, %v1423_v25 }
 0x2ef   :  { %3333 = vpow2.f32 %v2146_v63  ;;  %v1999_v5 = vsub.f32 0.0, %v4923_v7  ;;  %v5056_v42 = vmul.f32 0.5, %v4883_v27  ;;  %v1680_v29 = vmul.f32 %v4976_v38, %v1616_v46 }
 0x2f0   :  { %3335 = vpow2.f32 %v2136_v47  ;;  %v1176_v33 = vmul.f32 0.3275911, %v5039_v4  ;;  %v2561_v58 = vadd.f32 1.0, %v2497_v22  ;;  %v1927_v1 = vmul.f32 %v4892_v20, %v1863_v6 }
 0x2f1   :  { %v5062_v49 = vmul.f32 0.5, %v4887_v9  ;;  %v2001_v18 = vsub.f32 0.0, %v4964_v45  ;;  %v3328_v16 = vpop.eup %3327  ;;  %v1870_v61 = vadd.f32 0.2548296, %v1806_v12  ;;  %v2150_v35 = vmul.f32 1.442695, %v2064_v2 }
 0x2f2   :  { %v1240_v13 = vadd.f32 1.0, %v1176_v33  ;;  %v5067_v27 = vadd.f32 %v5956_v24, %v5951_v56  ;;  %v1801_v47 = vmul.f32 %v4941_v14, %v1737_v17  ;;  %v1551_v63 = vmul.f32 %v5018_v44, %v1487_v21  ;;  %v5957_v9 = vld [vmem:[#allocation33_spill] sm:$0xff] }
 0x2f3   :  { %v5069_v62 = vpop.eup %3329  ;;  %v2063_v20 = vmul.f32 %v1999_v5, %v4923_v7  ;;  %v5076_v25 = vadd.f32 %v5957_v9, %v5951_v56  ;;  %v1744_v46 = vadd.f32 -0.28449672, %v1680_v29  ;;  %v2006_v0 = vsub.f32 0.0, %v5025_v15  ;;  %v5959_v9 = vld [vmem:[#allocation29_spill] sm:$0xff] }
 0x2f4   :  { %3337 = vrcp.f32 %v1240_v13  ;;  %v5080_v6 = vmul.f32 0.70710677, %v5067_v27  ;;  %v5083_v22 = vmul.f32 %v2561_v58, %v4997_v39  ;;  %v2247_v12 = vmul.f32 %v3328_v16, %v1927_v1 }
 0x2f5   :  { %v5086_v2 = vmul.f32 0.5, %v4933_v10  ;;  %v2065_v7 = vmul.f32 %v2001_v18, %v4964_v45  ;;  %v1934_v17 = vmul.f32 %v4927_v36, %v1870_v61  ;;  %v1425_v56 = vmul.f32 1.0614054, %v5069_v62 }
 0x2f6   :  { %5958 = vst [vmem:[#allocation12_spill] sm:$0xff] %v5083_v22  ;;  %v5092_v21 = vand.u32 2147483647, %v5080_v6  ;;  %v5095_v5 = vmul.f32 0.70710677, %v5076_v25  ;;  %3339 = vpow2.f32 %v2150_v35  ;;  %vm2375_vm7 = vcmp.lt.f32.partialorder %v4808_v34, 0.0 }
 0x2f7   :  { %v1865_v29 = vadd.f32 0.2548296, %v1801_v47  ;;  %v1615_v39 = vadd.f32 1.4214138, %v1551_v63  ;;  %v2148_v33 = vmul.f32 1.442695, %v2063_v20  ;;  %v1808_v10 = vmul.f32 %v4976_v38, %v1744_v46 }
 0x2f8   :  { %v5097_v58 = vpop.eup %3331  ;;  %v2070_v36 = vmul.f32 %v2006_v0, %v5025_v15  ;;  %v1175_v45 = vmul.f32 0.3275911, %v5092_v21  ;;  %v5104_v1 = vand.u32 2147483647, %v5095_v5  ;;  %v2311_v16 = vsub.f32 1.0, %v2247_v12  ;;  %v5960_v46 = vld [vmem:[#allocation51_spill] sm:$0xff] }
 0x2f9   :  { %v3334_v18 = vpop.eup %3333  ;;  %v2152_v61 = vmul.f32 1.442695, %v2065_v7  ;;  %v1430_v35 = vmul.f32 1.0614054, %v5097_v58  ;;  %v2008_v13 = vsub.f32 0.0, %v5039_v4  ;;  %v5110_v52 = vadd.f32 %v5960_v46, %v5959_v9  ;;  %v5963_v22 = vld [vmem:[#allocation18_spill] sm:$0xff] }
 0x2fa   :  { %v3336_v24 = vpop.eup %3335  ;;  %v2254_v47 = vmul.f32 %v3334_v18, %v1934_v17  ;;  %v1489_v63 = vadd.f32 -1.4531521, %v1425_v56  ;;  %v1239_v20 = vadd.f32 1.0, %v1175_v45  ;;  %3341 = vpow2.f32 %v2148_v33 }
 0x2fb   :  { %v5113_v15 = vmul.f32 0.5, %v4989_v41  ;;  %v1494_v0 = vadd.f32 -1.4531521, %v1430_v35  ;;  %v1177_v12 = vmul.f32 0.3275911, %v5104_v1  ;;  %v1679_v50 = vmul.f32 %v5018_v44, %v1615_v39 }
 0x2fc   :  { %v1872_v7 = vadd.f32 0.2548296, %v1808_v10  ;;  %v2162_v26 = vmul.f32 1.442695, %v2070_v36  ;;  %3343 = vrcp.f32 %v1239_v20  ;;  %v2439_v30 = vsub.f32 0.0, %v2311_v16 }
 0x2fd   :  { %v1929_v17 = vmul.f32 %v4941_v14, %v1865_v29  ;;  %vm2382_vm8 = vcmp.lt.f32.partialorder %v4845_v8, 0.0  ;;  %v1558_v56 = vmul.f32 %v5097_v58, %v1494_v0  ;;  %v2072_v33 = vmul.f32 %v2008_v13, %v5039_v4  ;;  %v5961_v14 = vld [vmem:[#allocation53_spill] sm:$0xff] }
 0x2fe   :  { %v5121_v45 = vpop.eup %3337  ;;  %v2318_v41 = vsub.f32 1.0, %v2254_v47  ;;  %v1553_v18 = vmul.f32 %v5069_v62, %v1489_v63  ;;  %3345 = vpow2.f32 %v2152_v61  ;;  %v5125_v10 = vmul.f32 0.70710677, %v5110_v52 }
 0x2ff   :  { %v1622_v39 = vadd.f32 1.4214138, %v1558_v56  ;;  %v1432_v36 = vmul.f32 1.0614054, %v5121_v45  ;;  %v1241_v35 = vadd.f32 1.0, %v1177_v12  ;;  %v5130_v29 = vadd.f32 %v5961_v14, %v5959_v9 }
 0x300   :  { %v1936_v20 = vmul.f32 %v4976_v38, %v1872_v7  ;;  %v1743_v4 = vadd.f32 -0.28449672, %v1679_v50  ;;  %3347 = vpow2.f32 %v2162_v26  ;;  %v5134_v13 = vand.u32 2147483647, %v5125_v10  ;;  %v3340_v47 = vpop.eup %3339 }
 0x301   :  { %v2503_v61 = vsel %vm2375_vm7, %v2439_v30, %v2311_v16  ;;  %v1686_v63 = vmul.f32 %v5097_v58, %v1622_v39  ;;  %v1496_v46 = vadd.f32 -1.4531521, %v1432_v36  ;;  %v2166_v0 = vmul.f32 1.442695, %v2072_v33  ;;  %v5962_v16 = vld [vmem:[#allocation17_spill] sm:$0xff] }
 0x302   :  { %v2249_v12 = vmul.f32 %v3336_v24, %v1929_v17  ;;  %v2446_v56 = vsub.f32 0.0, %v2318_v41  ;;  %v1617_v23 = vadd.f32 1.4214138, %v1553_v18  ;;  %v1182_v14 = vmul.f32 0.3275911, %v5134_v13 }
 0x303   :  { %v1750_v53 = vadd.f32 -0.28449672, %v1686_v63  ;;  %v1560_v38 = vmul.f32 %v5121_v45, %v1496_v46  ;;  %3349 = vrcp.f32 %v1241_v35  ;;  %v5142_v26 = vmul.f32 0.70710677, %v5130_v29 }
 0x304   :  { %v2256_v50 = vmul.f32 %v3340_v47, %v1936_v20  ;;  %v1807_v34 = vmul.f32 %v5018_v44, %v1743_v4  ;;  %v1246_v30 = vadd.f32 1.0, %v1182_v14  ;;  %v5147_v7 = vadd.f32 %v5962_v16, %v5959_v9  ;;  %v3342_v24 = vpop.eup %3341 }
 0x305   :  { %vm2377_vm9 = vcmp.lt.f32.partialorder %v4837_v37, 0.0  ;;  %v1814_v17 = vmul.f32 %v5097_v58, %v1750_v53  ;;  %v1624_v33 = vadd.f32 1.4214138, %v1560_v38  ;;  %3351 = vpow2.f32 %v2166_v0 }
 0x306   :  { %v5152_v18 = vand.u32 2147483647, %v5142_v26  ;;  %v5154_v39 = vpop.eup %3343  ;;  %v2313_v36 = vsub.f32 1.0, %v2249_v12  ;;  %v2510_v35 = vsel %vm2382_vm8, %v2446_v56, %v2318_v41  ;;  %v5159_v20 = vmul.f32 0.5, %v5004_v60 }
 0x307   :  { %3353 = vrcp.f32 %v1246_v30  ;;  %vm2384_vm10 = vcmp.lt.f32.partialorder %v4897_v55, 0.0  ;;  %v1681_v4 = vmul.f32 %v5069_v62, %v1617_v23  ;;  %v1878_v53 = vadd.f32 0.2548296, %v1814_v17 }
 0x308   :  { %v1688_v47 = vmul.f32 %v5121_v45, %v1624_v33  ;;  %v1184_v63 = vmul.f32 0.3275911, %v5152_v18  ;;  %v5165_v46 = vpop.eup %3345  ;;  %v2567_v0 = vadd.f32 1.0, %v2503_v61  ;;  %v2320_v12 = vsub.f32 1.0, %v2256_v50 }
 0x309   :  { %v1431_v8 = vmul.f32 1.0614054, %v5154_v39  ;;  %v5169_v41 = vmul.f32 0.70710677, %v5147_v7  ;;  %v1871_v60 = vadd.f32 0.2548296, %v1807_v34  ;;  %v1942_v56 = vmul.f32 %v5097_v58, %v1878_v53 }
 0x30a   :  { %v1752_v14 = vadd.f32 -0.28449672, %v1688_v47  ;;  %v1248_v38 = vadd.f32 1.0, %v1184_v63  ;;  %v3348_v23 = vpop.eup %3347  ;;  %v2441_v30 = vsub.f32 0.0, %v2313_v36  ;;  %v2574_v16 = vadd.f32 1.0, %v2510_v35 }
 0x30b   :  { %vm2390_vm11 = vcmp.lt.f32.partialorder %v5010_v31, 0.0  ;;  %v5174_v17 = vand.u32 2147483647, %v5169_v41  ;;  %v1745_v61 = vadd.f32 -0.28449672, %v1681_v4  ;;  %v2262_v50 = vmul.f32 %v3348_v23, %v1942_v56 }
 0x30c   :  { %v1816_v33 = vmul.f32 %v5121_v45, %v1752_v14  ;;  %v5179_v3 = vadd.f32 %v5963_v22, %v5959_v9  ;;  %v2448_v34 = vsub.f32 0.0, %v2320_v12  ;;  %v1495_v58 = vadd.f32 -1.4531521, %v1431_v8 }
 0x30d   :  { %3355 = vrcp.f32 %v1248_v38  ;;  %v1183_v53 = vmul.f32 0.3275911, %v5174_v17  ;;  %v5182_v47 = vpop.eup %3349  ;;  %v5185_v35 = vmul.f32 %v2567_v0, %v5036_v19  ;;  %v1935_v63 = vmul.f32 %v5018_v44, %v1871_v60 }
 0x30e   :  { %v2326_v4 = vsub.f32 1.0, %v2262_v50  ;;  %v1880_v56 = vadd.f32 0.2548296, %v1816_v33  ;;  %v5190_v14 = vsel %vm2377_vm9, %v2441_v30, %v2313_v36  ;;  %v5193_v22 = vmul.f32 %v2574_v16, %v5048_v51 }
 0x30f   :  { %5964 = vst [vmem:[#allocation24_spill] sm:$0xff] %v5185_v35  ;;  %vm2392_vm12 = vcmp.lt.f32.partialorder %v5029_v32, 0.0  ;;  %v1247_v9 = vadd.f32 1.0, %v1183_v53  ;;  %v3352_v8 = vpop.eup %3351  ;;  %v1809_v38 = vmul.f32 %v5069_v62, %v1745_v61  ;;  %v5199_v44 = vmul.f32 0.70710677, %v5179_v3 }
 0x310   :  { %5965 = vst [vmem:[#allocation28_spill] sm:$0xff] %v5193_v22  ;;  %v2454_v23 = vsub.f32 0.0, %v2326_v4  ;;  %v1944_v19 = vmul.f32 %v5121_v45, %v1880_v56  ;;  %v2512_v37 = vsel %vm2384_vm10, %v2448_v34, %v2320_v12  ;;  %v1559_v51 = vmul.f32 %v5154_v39, %v1495_v58 }
 0x311   :  { %v5201_v0 = vpop.eup %3353  ;;  %v1433_v36 = vmul.f32 1.0614054, %v5182_v47  ;;  %3357 = vrcp.f32 %v1247_v9  ;;  %v2255_v60 = vmul.f32 %v3342_v24, %v1935_v63  ;;  %v2007_v50 = vsub.f32 0.0, %v5092_v21 }
 0x312   :  { %v2518_v30 = vsel %vm2390_vm11, %v2454_v23, %v2326_v4  ;;  %v2264_v16 = vmul.f32 %v3352_v8, %v1944_v19  ;;  %v1438_v45 = vmul.f32 1.0614054, %v5201_v0  ;;  %v2014_v33 = vsub.f32 0.0, %v5134_v13  ;;  %v5966_v23 = vld [vmem:[#allocation44_spill] sm:$0xff]  ;;  %v5967_v19 = vld [vmem:[#allocation26_spill] sm:$0xff] }
 0x313   :  { %v2582_v61 = vadd.f32 1.0, %v2518_v30  ;;  %v5213_v55 = vand.u32 2147483647, %v5199_v44  ;;  %v2576_v12 = vadd.f32 1.0, %v2512_v37  ;;  %v1873_v34 = vadd.f32 0.2548296, %v1809_v38 }
 0x314   :  { %v2328_v58 = vsub.f32 1.0, %v2264_v16  ;;  %v1502_v53 = vadd.f32 -1.4531521, %v1438_v45  ;;  %vm2383_vm13 = vcmp.lt.f32.partialorder %v4908_v48, 0.0  ;;  %v1623_v24 = vadd.f32 1.4214138, %v1559_v51 }
 0x315   :  { %v5217_v31 = vmul.f32 %v2582_v61, %v5113_v15  ;;  %v1497_v63 = vadd.f32 -1.4531521, %v1433_v36  ;;  %v1185_v4 = vmul.f32 0.3275911, %v5213_v55  ;;  %v2319_v56 = vsub.f32 1.0, %v2255_v60 }
 0x316   :  { %v2456_v9 = vsub.f32 0.0, %v2328_v58  ;;  %v1566_v8 = vmul.f32 %v5201_v0, %v1502_v53  ;;  %v5223_v30 = vadd.f32 %v5967_v19, %v5966_v23  ;;  %v2071_v15 = vmul.f32 %v2007_v50, %v5092_v21 }
 0x317   :  { %v5225_v38 = vpop.eup %3355  ;;  %v2078_v51 = vmul.f32 %v2014_v33, %v5134_v13  ;;  %v1249_v36 = vadd.f32 1.0, %v1185_v4  ;;  %v1937_v16 = vmul.f32 %v5069_v62, %v1873_v34  ;;  %v5236_v53 = vmul.f32 %v2576_v12, %v5056_v42 }
 0x318   :  { %v2520_v60 = vsel %vm2392_vm12, %v2456_v9, %v2328_v58  ;;  %v1630_v45 = vadd.f32 1.4214138, %v1566_v8  ;;  %v1440_v61 = vmul.f32 1.0614054, %v5225_v38  ;;  %v1687_v35 = vmul.f32 %v5154_v39, %v1623_v24 }
 0x319   :  { %5968 = vst [vmem:[#allocation30_spill] sm:$0xff] %v5236_v53  ;;  %v2584_v19 = vadd.f32 1.0, %v2520_v60  ;;  %v1561_v37 = vmul.f32 %v5182_v47, %v1497_v63  ;;  %v2447_v21 = vsub.f32 0.0, %v2319_v56  ;;  %v5242_v62 = vmul.f32 0.70710677, %v5223_v30 }
 0x31a   :  { %v1694_v13 = vmul.f32 %v5201_v0, %v1630_v45  ;;  %v1504_v50 = vadd.f32 -1.4531521, %v1440_v61  ;;  %v2164_v34 = vmul.f32 1.442695, %v2071_v15  ;;  %v2178_v42 = vmul.f32 1.442695, %v2078_v51 }
 0x31b   :  { %v5244_v32 = vpop.eup %3357  ;;  %v5247_v33 = vmul.f32 %v2584_v19, %v5159_v20  ;;  %3359 = vrcp.f32 %v1249_v36  ;;  %v2257_v12 = vmul.f32 %v5165_v46, %v1937_v16  ;;  %v2009_v58 = vsub.f32 0.0, %v5104_v1 }
 0x31c   :  { %v1758_v24 = vadd.f32 -0.28449672, %v1694_v13  ;;  %v1568_v63 = vmul.f32 %v5225_v38, %v1504_v50  ;;  %v1751_v9 = vadd.f32 -0.28449672, %v1687_v35  ;;  %v1625_v8 = vadd.f32 1.4214138, %v1561_v37 }
 0x31d   :  { %5969 = vst [vmem:[#allocation32_spill] sm:$0xff] %v5247_v33  ;;  %v5255_v60 = vand.u32 2147483647, %v5242_v62  ;;  %v2511_v20 = vsel %vm2383_vm13, %v2447_v21, %v2319_v56  ;;  %v1439_v46 = vmul.f32 1.0614054, %v5244_v32  ;;  %v5263_v51 = vadd.f32 %v4642_v59, %v5966_v23 }
 0x31e   :  { %v1822_v15 = vmul.f32 %v5201_v0, %v1758_v24  ;;  %v2569_v36 = vadd.f32 1.0, %v5190_v14  ;;  %vm2385_vm14 = vcmp.lt.f32.partialorder %v4954_v43, 0.0  ;;  %3361 = vpow2.f32 %v2178_v42 }
 0x31f   :  { %v1632_v35 = vadd.f32 1.4214138, %v1568_v63  ;;  %v1190_v37 = vmul.f32 0.3275911, %v5255_v60  ;;  %v2321_v16 = vsub.f32 1.0, %v2257_v12  ;;  %v5269_v48 = vmul.f32 0.5, %v5067_v27 }
 0x320   :  { %v2073_v56 = vmul.f32 %v2009_v58, %v5104_v1  ;;  %v2016_v45 = vsub.f32 0.0, %v5152_v18  ;;  %v2575_v61 = vadd.f32 1.0, %v2511_v20  ;;  %v1815_v59 = vmul.f32 %v5154_v39, %v1751_v9 }
 0x321   :  { %v1689_v19 = vmul.f32 %v5182_v47, %v1625_v8  ;;  %v1254_v14 = vadd.f32 1.0, %v1190_v37  ;;  %3363 = vpow2.f32 %v2164_v34  ;;  %v1886_v21 = vadd.f32 0.2548296, %v1822_v15 }
 0x322   :  { %v1503_v13 = vadd.f32 -1.4531521, %v1439_v46  ;;  %v5276_v50 = vmul.f32 0.70710677, %v5263_v51  ;;  %v5279_v42 = vmul.f32 0.5, %v5076_v25  ;;  %v1696_v27 = vmul.f32 %v5225_v38, %v1632_v35 }
 0x323   :  { %v2015_v1 = vsub.f32 0.0, %v5174_v17  ;;  %3365 = vrcp.f32 %v1254_v14  ;;  %v2449_v12 = vsub.f32 0.0, %v2321_v16  ;;  %v2168_v58 = vmul.f32 1.442695, %v2073_v56 }
 0x324   :  { %v5284_v24 = vmul.f32 0.5, %v5110_v52  ;;  %v2080_v34 = vmul.f32 %v2016_v45, %v5152_v18  ;;  %v5290_v9 = vmul.f32 %v2569_v36, %v5045_v11  ;;  %v1879_v8 = vadd.f32 0.2548296, %v1815_v59  ;;  %v5970_v11 = vld [vmem:[#allocation55_spill] sm:$0xff] }
 0x325   :  { %v5287_v63 = vpop.eup %3359  ;;  %v1753_v25 = vadd.f32 -0.28449672, %v1689_v19  ;;  %v1128_v20 = vand.u32 2147483647, %v5276_v50  ;;  %v5294_v15 = vmul.f32 %v2575_v61, %v5062_v49  ;;  %v1950_v46 = vmul.f32 %v5201_v0, %v1886_v21 }
 0x326   :  { %v5298_v35 = vmul.f32 0.5, %v5130_v29  ;;  %v1567_v52 = vmul.f32 %v5244_v32, %v1503_v13  ;;  %v1760_v18 = vadd.f32 -0.28449672, %v1696_v27  ;;  %v2079_v37 = vmul.f32 %v2015_v1, %v5174_v17 }
 0x327   :  { %v1192_v56 = vmul.f32 0.3275911, %v1128_v20  ;;  %v5304_v36 = vadd.f32 %v5970_v11, %v5966_v23  ;;  %v2513_v45 = vsel %vm2385_vm14, %v2449_v12, %v2321_v16  ;;  %3367 = vpow2.f32 %v2168_v58 }
 0x328   :  { %v2182_v49 = vmul.f32 1.442695, %v2080_v34  ;;  %v1441_v0 = vmul.f32 1.0614054, %v5287_v63  ;;  %v3362_v61 = vpop.eup %3361  ;;  %v1943_v29 = vmul.f32 %v5154_v39, %v1879_v8  ;;  %v1817_v59 = vmul.f32 %v5182_v47, %v1753_v25 }
 0x329   :  { %v2022_v19 = vsub.f32 0.0, %v5255_v60  ;;  %v1256_v17 = vadd.f32 1.0, %v1192_v56  ;;  %v2270_v14 = vmul.f32 %v3362_v61, %v1950_v46  ;;  %v5313_v21 = vmul.f32 0.5, %v5147_v7 }
 0x32a   :  { %v1631_v13 = vadd.f32 1.4214138, %v1567_v52  ;;  %v5316_v43 = vmul.f32 0.70710677, %v5304_v36  ;;  %v5318_v16 = vadd.f32 1.0, %v2513_v45  ;;  %v1824_v27 = vmul.f32 %v5225_v38, %v1760_v18  ;;  %v5971_v52 = vld [vmem:[#allocation57_spill] sm:$0xff] }
 0x32b   :  { %v2180_v1 = vmul.f32 1.442695, %v2079_v37  ;;  %3369 = vrcp.f32 %v1256_v17  ;;  %v3364_v39 = vpop.eup %3363  ;;  %v1505_v12 = vadd.f32 -1.4531521, %v1441_v0  ;;  %v2017_v58 = vsub.f32 0.0, %v5213_v55 }
 0x32c   :  { %3371 = vpow2.f32 %v2182_v49  ;;  %v5323_v34 = vand.u32 2147483647, %v5316_v43  ;;  %v2263_v8 = vmul.f32 %v3364_v39, %v1943_v29  ;;  %v1881_v25 = vadd.f32 0.2548296, %v1817_v59 }
 0x32d   :  { %v5325_v7 = vpop.eup %3365  ;;  %vm2398_vm15 = vcmp.lt.f32.partialorder %v5125_v10, 0.0  ;;  %v2086_v46 = vmul.f32 %v2022_v19, %v5255_v60  ;;  %v5331_v18 = vadd.f32 %v5971_v52, %v5966_v23  ;;  %v2334_v37 = vsub.f32 1.0, %v2270_v14  ;;  %v5974_v10 = vld [vmem:[#allocation37_spill] sm:$0xff] }
 0x32e   :  { %v1695_v56 = vmul.f32 %v5244_v32, %v1631_v13  ;;  %v1446_v11 = vmul.f32 1.0614054, %v5325_v7  ;;  %v1191_v45 = vmul.f32 0.3275911, %v5323_v34  ;;  %v1888_v49 = vadd.f32 0.2548296, %v1824_v27 }
 0x32f   :  { %3373 = vpow2.f32 %v2180_v1  ;;  %v2024_v0 = vsub.f32 0.0, %v1128_v20  ;;  %v5337_v61 = vmul.f32 0.70710677, %v5331_v18  ;;  %vm2391_vm0 = vcmp.lt.f32.partialorder %v5080_v6, 0.0 }
 0x330   :  { %v1569_v60 = vmul.f32 %v5287_v63, %v1505_v12  ;;  %v2081_v23 = vmul.f32 %v2017_v58, %v5213_v55  ;;  %v1510_v29 = vadd.f32 -1.4531521, %v1446_v11  ;;  %v1255_v59 = vadd.f32 1.0, %v1191_v45  ;;  %v5973_v11 = vld [vmem:[#allocation60_spill] sm:$0xff] }
 0x331   :  { %v2327_v19 = vsub.f32 1.0, %v2263_v8  ;;  %v1945_v17 = vmul.f32 %v5182_v47, %v1881_v25  ;;  %v2194_v14 = vmul.f32 1.442695, %v2086_v46  ;;  %v5344_v13 = vand.u32 2147483647, %v5337_v61  ;;  %v3368_v27 = vpop.eup %3367  ;;  %v5972_v46 = vld [vmem:[#allocation46_spill] sm:$0xff] }
 0x332   :  { %v2462_v1 = vsub.f32 0.0, %v2334_v37  ;;  %v1759_v39 = vadd.f32 -0.28449672, %v1695_v56  ;;  %v1574_v52 = vmul.f32 %v5325_v7, %v1510_v29  ;;  %3375 = vrcp.f32 %v1255_v59 }
 0x333   :  { %v1952_v4 = vmul.f32 %v5225_v38, %v1888_v49  ;;  %v5349_v12 = vmul.f32 0.5, %v5223_v30  ;;  %v2088_v55 = vmul.f32 %v2024_v0, %v1128_v20  ;;  %v1193_v58 = vmul.f32 0.3275911, %v5344_v13 }
 0x334   :  { %v1633_v8 = vadd.f32 1.4214138, %v1569_v60  ;;  %v2184_v47 = vmul.f32 1.442695, %v2081_v23  ;;  %v1638_v25 = vadd.f32 1.4214138, %v1574_v52  ;;  %v5354_v45 = vadd.f32 %v5973_v11, %v5972_v46 }
 0x335   :  { %v5356_v53 = vpop.eup %3369  ;;  %v2455_v56 = vsub.f32 0.0, %v2327_v19  ;;  %v5358_v29 = vmul.f32 %v3368_v27, %v1945_v17  ;;  %3377 = vpow2.f32 %v2194_v14  ;;  %v1257_v38 = vadd.f32 1.0, %v1193_v58 }
 0x336   :  { %v3372_v49 = vpop.eup %3371  ;;  %v2526_v30 = vsel %vm2398_vm15, %v2462_v1, %v2334_v37  ;;  %v1823_v20 = vmul.f32 %v5244_v32, %v1759_v39  ;;  %v1702_v0 = vmul.f32 %v5325_v7, %v1638_v25  ;;  %v1448_v60 = vmul.f32 1.0614054, %v5356_v53 }
 0x337   :  { %v5365_v23 = vmul.f32 %v3372_v49, %v1952_v4  ;;  %v2198_v59 = vmul.f32 1.442695, %v2088_v55  ;;  %3379 = vrcp.f32 %v1257_v38  ;;  %v5368_v52 = vmul.f32 0.70710677, %v5354_v45 }
 0x338   :  { %v1697_v17 = vmul.f32 %v5287_v63, %v1633_v8  ;;  %v1766_v14 = vadd.f32 -0.28449672, %v1702_v0  ;;  %v1512_v27 = vadd.f32 -1.4531521, %v1448_v60  ;;  %v5373_v37 = vadd.f32 %v5974_v10, %v5972_v46 }
 0x339   :  { %v3374_v1 = vpop.eup %3373  ;;  %v5377_v39 = vsel %vm2391_vm0, %v2455_v56, %v2327_v19  ;;  %3381 = vpow2.f32 %v2184_v47  ;;  %v5380_v4 = vmul.f32 0.5, %v5263_v51  ;;  %v5383_v55 = vand.u32 2147483647, %v5368_v52 }
 0x33a   :  { %5975 = vst [vmem:[#allocation33_spill] sm:$0xff] %v5373_v37  ;;  %v1887_v8 = vadd.f32 0.2548296, %v1823_v20  ;;  %v1830_v25 = vmul.f32 %v5325_v7, %v1766_v14  ;;  %v1576_v11 = vmul.f32 %v5356_v53, %v1512_v27  ;;  %v2590_v38 = vadd.f32 1.0, %v2526_v30 }
 0x33b   :  { %v2336_v49 = vsub.f32 1.0, %v5365_v23  ;;  %v1198_v6 = vmul.f32 0.3275911, %v5383_v55  ;;  %v5391_v19 = vmul.f32 0.70710677, %v5373_v37  ;;  %vm2400_vm1 = vcmp.lt.f32.partialorder %v5142_v26, 0.0 }
 0x33c   :  { %v5393_v51 = vpop.eup %3375  ;;  %v1761_v47 = vadd.f32 -0.28449672, %v1697_v17  ;;  %v1894_v56 = vadd.f32 0.2548296, %v1830_v25  ;;  %v1640_v0 = vadd.f32 1.4214138, %v1576_v11  ;;  %3383 = vpow2.f32 %v2198_v59 }
 0x33d   :  { %5976 = vst [vmem:[#allocation29_spill] sm:$0xff] %v5391_v19  ;;  %vm2406_vm2 = vcmp.lt.f32.partialorder %v5242_v62, 0.0  ;;  %v1447_v20 = vmul.f32 1.0614054, %v5393_v51  ;;  %v2023_v30 = vsub.f32 0.0, %v5323_v34  ;;  %v1262_v60 = vadd.f32 1.0, %v1198_v6 }
 0x33e   :  { %v5977_v23 = vld [vmem:[#allocation38_spill] sm:$0xff]  ;;  %v1951_v27 = vmul.f32 %v5244_v32, %v1887_v8  ;;  %v1958_v10 = vmul.f32 %v5325_v7, %v1894_v56  ;;  %v1704_v17 = vmul.f32 %v5356_v53, %v1640_v0  ;;  %v5407_v25 = vand.u32 2147483647, %v5391_v19 }
 0x33f   :  { %v5401_v14 = vadd.f32 %v5977_v23, %v5972_v46  ;;  %v3378_v59 = vpop.eup %3377  ;;  %v5410_v11 = vmul.f32 %v2590_v38, %v5284_v24  ;;  %v1511_v58 = vadd.f32 -1.4531521, %v1447_v20  ;;  %v2025_v6 = vsub.f32 0.0, %v5344_v13 }
 0x340   :  { %3385 = vrcp.f32 %v1262_v60  ;;  %v2464_v37 = vsub.f32 0.0, %v2336_v49  ;;  %v2278_v23 = vmul.f32 %v3378_v59, %v1958_v10  ;;  %v1768_v33 = vadd.f32 -0.28449672, %v1704_v17 }
 0x341   :  { %5978 = vst [vmem:[#allocation51_spill] sm:$0xff] %v5401_v14  ;;  %v1200_v32 = vmul.f32 0.3275911, %v5407_v25  ;;  %v5414_v8 = vpop.eup %3379  ;;  %v1825_v7 = vmul.f32 %v5287_v63, %v1761_v47  ;;  %v1575_v56 = vmul.f32 %v5393_v51, %v1511_v58  ;;  %v2087_v0 = vmul.f32 %v2023_v30, %v5323_v34  ;;  %v5980_v58 = vld [vmem:[#allocation62_spill] sm:$0xff] }
 0x342   :  { %v5420_v24 = vmul.f32 0.70710677, %v5401_v14  ;;  %v2342_v38 = vsub.f32 1.0, %v2278_v23  ;;  %v1832_v20 = vmul.f32 %v5356_v53, %v1768_v33  ;;  %v1449_v60 = vmul.f32 1.0614054, %v5414_v8 }
 0x343   :  { %v1264_v10 = vadd.f32 1.0, %v1200_v32  ;;  %v5424_v17 = vpop.eup %3381  ;;  %v1639_v59 = vadd.f32 1.4214138, %v1575_v56  ;;  %v2089_v19 = vmul.f32 %v2025_v6, %v5344_v13  ;;  %v5432_v34 = vadd.f32 %v5980_v58, %v5972_v46 }
 0x344   :  { %5979 = vst [vmem:[#allocation53_spill] sm:$0xff] %v5420_v24  ;;  %v5428_v47 = vand.u32 2147483647, %v5420_v24  ;;  %v2470_v30 = vsub.f32 0.0, %v2342_v38  ;;  %v1896_v14 = vadd.f32 0.2548296, %v1832_v20  ;;  %v2528_v33 = vsel %vm2400_vm1, %v2464_v37, %v2336_v49 }
 0x345   :  { %v1513_v23 = vadd.f32 -1.4531521, %v1449_v60  ;;  %3387 = vrcp.f32 %v1264_v10  ;;  %v5436_v32 = vmul.f32 %v3374_v1, %v1951_v27  ;;  %vm2408_vm3 = vcmp.lt.f32.partialorder %v5276_v50, 0.0 }
 0x346   :  { %v1703_v13 = vmul.f32 %v5393_v51, %v1639_v59  ;;  %v1199_v6 = vmul.f32 0.3275911, %v5428_v47  ;;  %v3384_v56 = vpop.eup %3383  ;;  %v2534_v46 = vsel %vm2406_vm2, %v2470_v30, %v2342_v38  ;;  %v1960_v58 = vmul.f32 %v5356_v53, %v1896_v14  ;;  %v5981_v14 = vld [vmem:[#allocation35_spill] sm:$0xff] }
 0x347   :  { %v2196_v20 = vmul.f32 1.442695, %v2087_v0  ;;  %v1577_v60 = vmul.f32 %v5414_v8, %v1513_v23  ;;  %v2598_v10 = vadd.f32 1.0, %v2534_v46  ;;  %v2200_v37 = vmul.f32 1.442695, %v2089_v19  ;;  %v5982_v0 = vld [vmem:[#allocation45_spill] sm:$0xff] }
 0x348   :  { %v1767_v26 = vadd.f32 -0.28449672, %v1703_v13  ;;  %v1263_v1 = vadd.f32 1.0, %v1199_v6  ;;  %v1889_v49 = vadd.f32 0.2548296, %v1825_v7  ;;  %v2280_v27 = vmul.f32 %v3384_v56, %v1960_v58 }
 0x349   :  { %v1641_v24 = vadd.f32 1.4214138, %v1577_v60  ;;  %v5446_v59 = vmul.f32 0.70710677, %v5432_v34  ;;  %v5451_v62 = vmul.f32 %v2598_v10, %v5349_v12  ;;  %v3096_v38 = vpack.c.bf16 %v5982_v0, %v5981_v14 }
 0x34a   :  { %v5448_v22 = vpop.eup %3385  ;;  %v1831_v53 = vmul.f32 %v5393_v51, %v1767_v26  ;;  %3389 = vrcp.f32 %v1263_v1  ;;  %v2344_v30 = vsub.f32 1.0, %v2280_v27  ;;  %vm2393_vm4 = vcmp.lt.f32.partialorder %v5095_v5, 0.0  ;;  %v5986_v1 = vld [vmem:[#allocation36_spill] sm:$0xff] }
 0x34b   :  { %3391 = vpow2.f32 %v2196_v20  ;;  %v1705_v19 = vmul.f32 %v5414_v8, %v1641_v24  ;;  %v1454_v7 = vmul.f32 1.0614054, %v5448_v22  ;;  %v2592_v23 = vadd.f32 1.0, %v2528_v33  ;;  %3097 = vmatprep.subr.bf16.mxu0 %v3096_v38  ;;  %v5983_v20 = vld [vmem:[#allocation21_spill] sm:$0xff]  ;;  %v5984_v24 = vld [vmem:[#allocation20_spill] sm:$0xff]  ;;  %v5988_v38 = vld [vmem:[#allocation14_spill] sm:$0xff] }
 0x34c   :  { %3393 = vpow2.f32 %v2200_v37  ;;  %v5462_v12 = vand.u32 2147483647, %v5446_v59  ;;  %v1953_v6 = vmul.f32 %v5287_v63, %v1889_v49  ;;  %v2472_v56 = vsub.f32 0.0, %v2344_v30  ;;  %v5987_v37 = vld [vmem:[#allocation9_spill] sm:$0xff] }
 0x34d   :  { %v1769_v46 = vadd.f32 -0.28449672, %v1705_v19  ;;  %v1518_v58 = vadd.f32 -1.4531521, %v1454_v7  ;;  %v5985_v60 = vpack.c.bf16 %v5983_v20, %v5984_v24  ;;  %v1895_v10 = vadd.f32 0.2548296, %v1831_v53 }
 0x34e   :  { %v2030_v33 = vsub.f32 0.0, %v5383_v55  ;;  %v1201_v26 = vmul.f32 0.3275911, %v5462_v12  ;;  %v3112_v27 = vpack.c.bf16 %v5987_v37, %v5986_v1  ;;  %v2536_v63 = vsel %vm2408_vm3, %v2472_v56, %v2344_v30  ;;  %v5989_v19 = vld [vmem:[#allocation11_spill] sm:$0xff] }
 0x34f   :  { %3099 = vmatpush1.bf16.msra.mxu0 %v5985_v60  ;;  %v5472_v14 = vpop.eup %3387  ;;  %v1833_v49 = vmul.f32 %v5414_v8, %v1769_v46  ;;  %v1582_v0 = vmul.f32 %v5448_v22, %v1518_v58  ;;  %v5480_v7 = vadd.f32 %v5989_v19, %v5988_v38  ;;  %v5990_v53 = vsub.f32 1.0, %v5358_v29  ;;  %v5991_v46 = vld [vmem:[#allocation23_spill] sm:$0xff]  ;;  %v5992_v58 = vld [vmem:[#allocation22_spill] sm:$0xff] }
 0x350   :  { %v2335_v24 = vsub.f32 1.0, %v5436_v32  ;;  %v2600_v60 = vadd.f32 1.0, %v2536_v63  ;;  %v1265_v1 = vadd.f32 1.0, %v1201_v26  ;;  %3113 = vmatprep.subr.bf16.mxu1 %v3112_v27  ;;  %v5486_v37 = vmul.f32 %v2592_v23, %v5298_v35 }
 0x351   :  { %v2457_v20 = vsub.f32 0.0, %v5990_v53  ;;  %v1897_v50 = vadd.f32 0.2548296, %v1833_v49  ;;  %v1646_v30 = vadd.f32 1.4214138, %v1582_v0  ;;  %v5993_v13 = vpack.c.bf16 %v5991_v46, %v5992_v58  ;;  %v5995_v0 = vld [vmem:[#allocation7_spill] sm:$0xff] }
 0x352   :  { %v1456_v56 = vmul.f32 1.0614054, %v5472_v14  ;;  %v2273_v19 = vmul.f32 %v5424_v17, %v1953_v6  ;;  %v5494_v53 = vmul.f32 %v2600_v60, %v5380_v4  ;;  %v2094_v32 = vmul.f32 %v2030_v33, %v5383_v55 }
 0x353   :  { %3115 = vmatpush1.bf16.msra.mxu1 %v5993_v13  ;;  %3395 = vrcp.f32 %v1265_v1  ;;  %v1959_v26 = vmul.f32 %v5393_v51, %v1895_v10  ;;  %v1961_v35 = vmul.f32 %v5414_v8, %v1897_v50  ;;  %v1710_v23 = vmul.f32 %v5448_v22, %v1646_v30 }
 0x354   :  { %v5501_v27 = vmul.f32 0.70710677, %v5480_v7  ;;  %v5503_v63 = vpop.eup %3389  ;;  %v5507_v17 = vmul.f32 %v5318_v16, %v5086_v2  ;;  %v2583_v4 = vadd.f32 1.0, %v5377_v39  ;;  %vm2399_vm5 = vcmp.lt.f32.partialorder %v5169_v41, 0.0 }
 0x355   :  { %v3154_v55 = vpack.c.bf16 %v5494_v53, %v5486_v37  ;;  %v3392_v51 = vpop.eup %3391  ;;  %v5994_v8 = vsub.f32 1.0, %v5358_v29  ;;  %v5518_v6 = vmul.f32 0.5, %v5179_v3  ;;  %v1520_v10 = vadd.f32 -1.4531521, %v1456_v56 }
 0x356   :  { %v1455_v2 = vmul.f32 1.0614054, %v5503_v63  ;;  %v3394_v16 = vpop.eup %3393  ;;  %v2463_v33 = vsub.f32 0.0, %v2335_v24  ;;  %v2337_v39 = vsub.f32 1.0, %v2273_v19  ;;  %v5522_v49 = vand.u32 2147483647, %v5501_v27 }
 0x357   :  { %v2521_v13 = vsel %vm2393_vm4, %v2457_v20, %v5994_v8  ;;  %v5526_v60 = vadd.f32 %v5995_v0, %v5988_v38  ;;  %v2279_v29 = vmul.f32 %v3392_v51, %v1959_v26  ;;  %v2281_v1 = vmul.f32 %v3394_v16, %v1961_v35 }
 0x358   :  { %v1774_v5 = vadd.f32 -0.28449672, %v1710_v23  ;;  %v2210_v20 = vmul.f32 1.442695, %v2094_v32  ;;  %v5529_v3 = vmul.f32 %v2583_v4, %v5269_v48  ;;  %vm2401_vm6 = vcmp.lt.f32.partialorder %v5199_v44, 0.0 }
 0x359   :  { %v1519_v50 = vadd.f32 -1.4531521, %v1455_v2  ;;  %v1206_v30 = vmul.f32 0.3275911, %v5522_v49  ;;  %v2585_v56 = vadd.f32 1.0, %v2521_v13  ;;  %v5534_v46 = vmul.f32 0.5, %v5304_v36 }
 0x35a   :  { %v1584_v58 = vmul.f32 %v5472_v14, %v1520_v10  ;;  %v2032_v19 = vsub.f32 0.0, %v5407_v25  ;;  %v2527_v26 = vsel %vm2399_vm5, %v2463_v33, %v2335_v24  ;;  %v2465_v32 = vsub.f32 0.0, %v2337_v39 }
 0x35b   :  { %v1270_v35 = vadd.f32 1.0, %v1206_v30  ;;  %v5541_v48 = vmul.f32 0.70710677, %v5526_v60  ;;  %v2343_v23 = vsub.f32 1.0, %v2279_v29  ;;  %v2345_v4 = vsub.f32 1.0, %v2281_v1 }
 0x35c   :  { %v1838_v51 = vmul.f32 %v5448_v22, %v1774_v5  ;;  %3397 = vpow2.f32 %v2210_v20  ;;  %vm2407_vm7 = vcmp.lt.f32.partialorder %v5316_v43, 0.0  ;;  %v1583_v36 = vmul.f32 %v5503_v63, %v1519_v50 }
 0x35d   :  { %v5544_v8 = vpop.eup %3395  ;;  %3399 = vrcp.f32 %v1270_v35  ;;  %v5550_v41 = vadd.f32 %v4950_v40, %v5988_v38  ;;  %v1648_v24 = vadd.f32 1.4214138, %v1584_v58  ;;  %v2096_v13 = vmul.f32 %v2032_v19, %v5407_v25 }
 0x35e   :  { %v2031_v10 = vsub.f32 0.0, %v5428_v47  ;;  %v5555_v2 = vand.u32 2147483647, %v5541_v48  ;;  %v2591_v16 = vadd.f32 1.0, %v2527_v26  ;;  %v2529_v33 = vsel %vm2401_vm6, %v2465_v32, %v2337_v39 }
 0x35f   :  { %v1001_v0 = vmul.f32 0.5, %v5331_v18  ;;  %vm2409_vm8 = vcmp.lt.f32.partialorder %v5337_v61, 0.0  ;;  %v2471_v29 = vsub.f32 0.0, %v2343_v23  ;;  %v2473_v1 = vsub.f32 0.0, %v2345_v4 }
 0x360   :  { %v1902_v40 = vadd.f32 0.2548296, %v1838_v51  ;;  %v1457_v5 = vmul.f32 1.0614054, %v5544_v8  ;;  %v5563_v25 = vmul.f32 %v2585_v56, %v5279_v42  ;;  %v1647_v20 = vadd.f32 1.4214138, %v1583_v36 }
 0x361   :  { %v1208_v50 = vmul.f32 0.3275911, %v5555_v2  ;;  %v5567_v30 = vmul.f32 0.70710677, %v5550_v41  ;;  %v2593_v44 = vadd.f32 1.0, %v2529_v33  ;;  %v1712_v39 = vmul.f32 %v5472_v14, %v1648_v24 }
 0x362   :  { %v2214_v18 = vmul.f32 1.442695, %v2096_v13  ;;  %v2095_v58 = vmul.f32 %v2031_v10, %v5428_v47  ;;  %v2033_v19 = vsub.f32 0.0, %v5462_v12  ;;  %v2038_v26 = vsub.f32 0.0, %v5522_v49 }
 0x363   :  { %v1272_v32 = vadd.f32 1.0, %v1208_v50  ;;  %v5574_v42 = vand.u32 2147483647, %v5567_v30  ;;  %v5577_v56 = vmul.f32 %v2591_v16, %v5313_v21  ;;  %v2535_v35 = vsel %vm2407_vm7, %v2471_v29, %v2343_v23 }
 0x364   :  { %v2537_v51 = vsel %vm2409_vm8, %v2473_v1, %v2345_v4  ;;  %v1521_v36 = vadd.f32 -1.4531521, %v1457_v5  ;;  %v1966_v47 = vmul.f32 %v5448_v22, %v1902_v40  ;;  %v1711_v24 = vmul.f32 %v5503_v63, %v1647_v20 }
 0x365   :  { %3401 = vrcp.f32 %v1272_v32  ;;  %v1207_v13 = vmul.f32 0.3275911, %v5574_v42  ;;  %v5587_v33 = vmul.f32 %v2593_v44, %v5518_v6  ;;  %v1776_v21 = vadd.f32 -0.28449672, %v1712_v39 }
 0x366   :  { %v3398_v10 = vpop.eup %3397  ;;  %3403 = vpow2.f32 %v2214_v18  ;;  %v2212_v16 = vmul.f32 1.442695, %v2095_v58  ;;  %v2097_v61 = vmul.f32 %v2033_v19, %v5462_v12  ;;  %v2102_v23 = vmul.f32 %v2038_v26, %v5522_v49  ;;  %v5996_v18 = vld [vmem:[#allocation13_spill] sm:$0xff]  ;;  %v5997_v58 = vld [vmem:[#allocation50_spill] sm:$0xff] }
 0x367   :  { %v5589_v43 = vpop.eup %3399  ;;  %v1271_v4 = vadd.f32 1.0, %v1207_v13  ;;  %v5595_v22 = vadd.f32 %v4966_v54, %v5988_v38  ;;  %v2599_v29 = vadd.f32 1.0, %v2535_v35  ;;  %v2601_v1 = vadd.f32 1.0, %v2537_v51  ;;  %v5998_v13 = vld [vmem:[#allocation49_spill] sm:$0xff] }
 0x368   :  { %v1585_v40 = vmul.f32 %v5544_v8, %v1521_v36  ;;  %v1462_v6 = vmul.f32 1.0614054, %v5589_v43  ;;  %v5599_v5 = vmul.f32 %v3398_v10, %v1966_v47  ;;  %v1775_v20 = vadd.f32 -0.28449672, %v1711_v24  ;;  %v5999_v10 = vld [vmem:[#allocation52_spill] sm:$0xff] }
 0x369   :  { %3405 = vrcp.f32 %v1271_v4  ;;  %v5602_v50 = vmul.f32 0.70710677, %v5595_v22  ;;  %v1840_v12 = vmul.f32 %v5472_v14, %v1776_v21  ;;  %v2040_v54 = vsub.f32 0.0, %v5555_v2 }
 0x36a   :  { %3407 = vpow2.f32 %v2212_v16  ;;  %v1526_v49 = vadd.f32 -1.4531521, %v1462_v6  ;;  %v5606_v38 = vmul.f32 1.442695, %v2097_v61  ;;  %v2226_v44 = vmul.f32 1.442695, %v2102_v23 }
 0x36b   :  { %v5609_v39 = vand.u32 2147483647, %v5602_v50  ;;  %v3100_v19 = vpack.c.bf16 %v5997_v58, %v5996_v18  ;;  %v5614_v26 = vmul.f32 %v2599_v29, %v5534_v46  ;;  %v5616_v32 = vmul.f32 %v2601_v1, %v1001_v0  ;;  %v6000_v23 = vld [vmem:[#allocation40_spill] sm:$0xff]  ;;  %v6001_v0 = vld [vmem:[#allocation39_spill] sm:$0xff]  ;;  %v6004_v1 = vld [vmem:[#allocation58_spill] sm:$0xff] }
 0x36c   :  { %v1649_v35 = vadd.f32 1.4214138, %v1585_v40  ;;  %v1590_v51 = vmul.f32 %v5589_v43, %v1526_v49  ;;  %v2350_v36 = vsub.f32 1.0, %v5599_v5  ;;  %v1839_v47 = vmul.f32 %v5503_v63, %v1775_v20  ;;  %v6003_v29 = vld [vmem:[#allocation27_spill] sm:$0xff]  ;;  %v6005_v18 = vld [vmem:[#allocation54_spill] sm:$0xff] }
 0x36d   :  { %v1209_v24 = vmul.f32 0.3275911, %v5609_v39  ;;  %3101 = vmatprep.subr.bf16.mxu0 %v3100_v19  ;;  %v3116_v21 = vpack.c.bf16 %v5999_v10, %v5998_v13  ;;  %v1904_v16 = vadd.f32 0.2548296, %v1840_v12  ;;  %v2104_v46 = vmul.f32 %v2040_v54, %v5555_v2  ;;  %v6006_v58 = vld [vmem:[#allocation59_spill] sm:$0xff]  ;;  %v6008_v10 = vld [vmem:[#allocation42_spill] sm:$0xff] }
 0x36e   :  { %v1654_v61 = vadd.f32 1.4214138, %v1590_v51  ;;  %v6002_v4 = vpack.c.bf16 %v6000_v23, %v6001_v0  ;;  %v3104_v40 = vpack.c.bf16 %v6004_v1, %v6003_v29  ;;  %3409 = vpow2.f32 %v2226_v44  ;;  %v6007_v13 = vld [vmem:[#allocation43_spill] sm:$0xff]  ;;  %v6010_v44 = vld [vmem:[#allocation61_spill] sm:$0xff] }
 0x36f   :  { %v5630_v6 = vpop.eup %3401  ;;  %v2039_v20 = vsub.f32 0.0, %v5574_v42  ;;  %v1273_v49 = vadd.f32 1.0, %v1209_v24  ;;  %3117 = vmatprep.subr.bf16.mxu1 %v3116_v21  ;;  %v3120_v12 = vpack.c.bf16 %v6006_v58, %v6005_v18  ;;  %v1713_v2 = vmul.f32 %v5544_v8, %v1649_v35  ;;  %v6012_v58 = vld [vmem:[#allocation15_spill] sm:$0xff] }
 0x370   :  { %3103 = vmatpush1.bf16.msra.mxu0 %v6002_v4  ;;  %v3404_v19 = vpop.eup %3403  ;;  %v1718_v54 = vmul.f32 %v5589_v43, %v1654_v61  ;;  %v1464_v51 = vmul.f32 1.0614054, %v5630_v6  ;;  %v6009_v23 = vpack.c.bf16 %v6007_v13, %v6008_v10  ;;  %v3108_v0 = vpack.c.bf16 %v5014_v57, %v6010_v44  ;;  %v6011_v4 = vld [vmem:[#allocation41_spill] sm:$0xff]  ;;  %v6013_v13 = vld [vmem:[#allocation47_spill] sm:$0xff] }
 0x371   :  { %3105 = vmatprep.subr.bf16.mxu0 %v3104_v40  ;;  %v2478_v24 = vsub.f32 0.0, %v2350_v36  ;;  %v1903_v21 = vadd.f32 0.2548296, %v1839_v47  ;;  %3411 = vrcp.f32 %v1273_v49  ;;  %v3124_v35 = vpack.c.bf16 %v5021_v28, %v6011_v4  ;;  %v6015_v47 = vld [vmem:[#allocation25_spill] sm:$0xff]  ;;  %v6016_v49 = vld [vmem:[#allocation24_spill] sm:$0xff] }
 0x372   :  { %3119 = vmatpush1.bf16.msra.mxu1 %v6009_v23  ;;  %v1968_v61 = vmul.f32 %v5472_v14, %v1904_v16  ;;  %v1782_v29 = vadd.f32 -0.28449672, %v1718_v54  ;;  %v1528_v1 = vadd.f32 -1.4531521, %v1464_v51  ;;  %v2230_v18 = vmul.f32 1.442695, %v2104_v46 }
 0x373   :  { %3121 = vmatprep.subr.bf16.mxu1 %v3120_v12  ;;  %v6014_v40 = vpack.c.bf16 %v6012_v58, %v6013_v13  ;;  %v5651_v10 = vpop.eup %3405  ;;  %v2103_v57 = vmul.f32 %v2039_v20, %v5574_v42  ;;  %v3128_v12 = vpack.c.bf16 %v6016_v49, %v6015_v47  ;;  %v6017_v23 = vld [vmem:[#allocation12_spill] sm:$0xff]  ;;  %v3132_v14 = vpack.c.bf16 %v5529_v3, %v5294_v15  ;;  %v6022_v13 = vld [vmem:[#allocation31_spill] sm:$0xff] }
 0x374   :  { %v3144_v28 = vpack.c.bf16 %v5290_v9, %v6017_v23  ;;  %v3408_v16 = vpop.eup %3407  ;;  %v1777_v46 = vadd.f32 -0.28449672, %v1713_v2  ;;  %v1846_v54 = vmul.f32 %v5589_v43, %v1782_v29  ;;  %v1592_v51 = vmul.f32 %v5630_v6, %v1528_v1  ;;  %v6018_v4 = vld [vmem:[#allocation48_spill] sm:$0xff]  ;;  %v5669_v9 = vld [vmem:[%s5765_s6] sm:$0x3]  ;;  %s2977_s6 = sld [smem:[#allocation2]] }
 0x375   :  { %3107 = vmatpush1.bf16.msra.mxu0 %v6014_v40  ;;  %v1463_v44 = vmul.f32 1.0614054, %v5651_v10  ;;  %v6019_v42 = vld [vmem:[#allocation16_spill] sm:$0xff]  ;;  %vm2689_vm9 = vcmask 523264   ;;  %v3148_v15 = vpack.c.bf16 %v5563_v25, %v5507_v17  ;;  %v3136_v3 = vpack.c.bf16 %v5614_v26, %v5577_v56 }
 0x376   :  { %3109 = vmatprep.subr.bf16.mxu0 %v3108_v0  ;;  %v6020_v20 = vpack.c.bf16 %v6018_v4, %v6019_v42  ;;  %v3152_v2 = vpack.c.bf16 %v5616_v32, %v5587_v33  ;;  %v5677_v0 = vmul.f32 %v3404_v19, %v1968_v61  ;;  %v1910_v29 = vadd.f32 0.2548296, %v1846_v54  ;;  %v6021_v58 = vld [vmem:[#allocation56_spill] sm:$0xff]  ;;  %v6024_v19 = vld [vmem:[#allocation34_spill] sm:$0xff] }
 0x377   :  { %v1656_v1 = vadd.f32 1.4214138, %v1592_v51  ;;  %v6023_v40 = vpack.c.bf16 %v6021_v58, %v6022_v13  ;;  %v1967_v47 = vmul.f32 %v5503_v63, %v1903_v21  ;;  %3413 = vpow2.f32 %v2230_v18  ;;  %v6025_v61 = vld [vmem:[#allocation6_spill] sm:$0xff]  ;;  %v6028_v51 = vld [vmem:[#allocation8_spill] sm:$0xff] }
 0x378   :  { %3123 = vmatpush1.bf16.msra.mxu1 %v6020_v20  ;;  %v2228_v49 = vmul.f32 1.442695, %v2103_v57  ;;  %v2041_v17 = vsub.f32 0.0, %v5609_v39  ;;  %v1974_v25 = vmul.f32 %v5589_v43, %v1910_v29  ;;  %v6026_v23 = vpack.c.bf16 %v6024_v19, %v6025_v61  ;;  %v3410_v54 = vpop.eup %3409  ;;  %v6031_v20 = vld [vmem:[#allocation5_spill] sm:$0xff]  ;;  %v6032_v29 = vld [vmem:[#allocation10_spill] sm:$0xff]  ;;  %v6034_v58 = vld [vmem:[#allocation28_spill] sm:$0xff] }
 0x379   :  { %3125 = vmatprep.subr.bf16.mxu1 %v3124_v35  ;;  %v1527_v35 = vadd.f32 -1.4531521, %v1463_v44  ;;  %3111 = vmatpush1.bf16.msra.mxu0 %v6023_v40  ;;  %v1720_v56 = vmul.f32 %v5630_v6, %v1656_v1  ;;  %vm2414_vm10 = vcmp.lt.f32.partialorder %v5368_v52, 0.0  ;;  %v1841_v63 = vmul.f32 %v5544_v8, %v1777_v46 }
 0x37a   :  { %3129 = vmatprep.subr.bf16.mxu0 %v3128_v12  ;;  %3415 = vpow2.f32 %v5606_v38  ;;  %v2542_v43 = vsel %vm2414_vm10, %v2478_v24, %v2350_v36  ;;  %v2294_v21 = vmul.f32 %v3410_v54, %v1974_v25  ;;  %v6027_v12 = vld [vmem:[#allocation19_spill] sm:$0xff]  ;;  %v6030_v4 = vmov 0.0  }
 0x37b   :  { %v1591_v26 = vmul.f32 %v5651_v10, %v1527_v35  ;;  %v1784_v18 = vadd.f32 -0.28449672, %v1720_v56  ;;  %v6029_v44 = vpack.c.bf16 %v6027_v12, %v6028_v51  ;;  %v5701_v52 = vpop.eup %3411  ;;  %v2352_v38 = vsub.f32 1.0, %v5677_v0 }
 0x37c   :  { %3127 = vmatpush1.bf16.msra.mxu1 %v6026_v23  ;;  %3056 = vmatmul.mubr.msk.f32.vlgmr.msra.gmra.mrb[40].mxu0 %vm2689_vm9, %v5669_v9  ;;  %v2287_v46 = vmul.f32 %v3408_v16, %v1967_v47  ;;  %3417 = vpow2.f32 %v2228_v49  ;;  %v2358_v5 = vsub.f32 1.0, %v2294_v21  ;;  %v1465_v42 = vmul.f32 1.0614054, %v5701_v52 }
 0x37d   :  { %3145 = vmatprep.subr.bf16.mxu1 %v3144_v28  ;;  %v1655_v57 = vadd.f32 1.4214138, %v1591_v26  ;;  %3131 = vmatpush1.bf16.msra.mxu0 %v6029_v44  ;;  %v2105_v28 = vmul.f32 %v2041_v17, %v5609_v39  ;;  %v1848_v36 = vmul.f32 %v5630_v6, %v1784_v18  ;;  %v6033_v1 = vpack.c.bf16 %v6031_v20, %v6032_v29  ;;  %v6036_v26 = vld [vmem:[#allocation32_spill] sm:$0xff] }
 0x37e   :  { %2899 = vmatprep.mubr.f32.mxu0 %v6030_v4  ;;  %3133 = vmatprep.subr.bf16.mxu0 %v3132_v14  ;;  %v1006_v16 = vmul.f32 0.5, %v5354_v45  ;;  %v1905_v39 = vadd.f32 0.2548296, %v1841_v63  ;;  %vm2422_vm11 = vcmp.lt.f32.partialorder %v5501_v27, 0.0  ;;  %v2486_v14 = vsub.f32 0.0, %v2358_v5  ;;  %v6037_v27 = vld [vmem:[#allocation30_spill] sm:$0xff] }
 0x37f   :  { %3057 = vmatmul.mubr.msk.f32.vlgmr.msra.gmra.mrb[40].mxu1 %vm2689_vm9, %v5669_v9  ;;  %v1719_v24 = vmul.f32 %v5651_v10, %v1655_v57  ;;  %v1912_v0 = vadd.f32 0.2548296, %v1848_v36  ;;  %v6035_v13 = vpack.c.bf16 %v5217_v31, %v6034_v58  ;;  %v2606_v40 = vadd.f32 1.0, %v2542_v43  ;;  %v6042_v36 = vld [vmem:[#allocation33_spill] sm:$0xff] }
 0x380   :  { %3147 = vmatpush1.bf16.msra.mxu1 %v6033_v1  ;;  %2970 = vmatprep.mubr.f32.mxu1 %v6030_v4  ;;  %v2480_v47 = vsub.f32 0.0, %v2352_v38  ;;  %v2351_v49 = vsub.f32 1.0, %v2287_v46  ;;  %v1529_v17 = vadd.f32 -1.4531521, %v1465_v42  ;;  %v2550_v25 = vsel %vm2422_vm11, %v2486_v14, %v2358_v5 }
 0x381   :  { %3149 = vmatprep.subr.bf16.mxu1 %v3148_v15  ;;  %v1783_v35 = vadd.f32 -0.28449672, %v1719_v24  ;;  %3135 = vmatpush1.bf16.msra.mxu0 %v6035_v13  ;;  %v1976_v56 = vmul.f32 %v5630_v6, %v1912_v0  ;;  %v2232_v15 = vmul.f32 1.442695, %v2105_v28  ;;  %v6038_v19 = vpack.c.bf16 %v6036_v26, %v6037_v27  ;;  %v3414_v61 = vpop.eup %3413  ;;  %v6039_v6 = vld [vmem:[#allocation29_spill] sm:$0xff] }
 0x382   :  { %3137 = vmatprep.subr.bf16.mxu0 %v3136_v3  ;;  %v1969_v23 = vmul.f32 %v5544_v8, %v1905_v39  ;;  %v1014_v31 = vmul.f32 0.5, %v5480_v7  ;;  %v2614_v54 = vadd.f32 1.0, %v2550_v25  ;;  %v1593_v63 = vmul.f32 %v5701_v52, %v1529_v17 }
 0x383   :  { %v1847_v45 = vmul.f32 %v5651_v10, %v1783_v35  ;;  %vm2416_vm12 = vcmp.lt.f32.partialorder %v6039_v6, 0.0  ;;  %v2296_v3 = vmul.f32 %v3414_v61, %v1976_v56  ;;  %v6040_v21 = vpack.c.bf16 %v5451_v62, %v5410_v11 }
 0x384   :  { %3151 = vmatpush1.bf16.msra.mxu1 %v6038_v19  ;;  %v3416_v18 = vpop.eup %3415  ;;  %v2670_v57 = vmul.f32 %v2606_v40, %v1006_v16  ;;  %v2544_v8 = vsel %vm2416_vm12, %v2480_v47, %v2352_v38  ;;  %v2678_v12 = vmul.f32 %v2614_v54, %v1014_v31  ;;  %v1657_v7 = vadd.f32 1.4214138, %v1593_v63  ;;  %v6041_v38 = vld [vmem:[#allocation53_spill] sm:$0xff] }
 0x385   :  { %3153 = vmatprep.subr.bf16.mxu1 %v3152_v2  ;;  %v1911_v43 = vadd.f32 0.2548296, %v1847_v45  ;;  %3139 = vmatpush1.bf16.msra.mxu0 %v6040_v21  ;;  %v2479_v51 = vsub.f32 0.0, %v2351_v49  ;;  %v2360_v44 = vsub.f32 1.0, %v2296_v3  ;;  %3419 = vpow2.f32 %v2232_v15 }
 0x386   :  { %v3418_v33 = vpop.eup %3417  ;;  %v2289_v32 = vmul.f32 %v3416_v18, %v1969_v23  ;;  %v3142_v2 = vpack.c.bf16 %v2678_v12, %v2670_v57  ;;  %v1721_v11 = vmul.f32 %v5701_v52, %v1657_v7  ;;  %v2608_v28 = vadd.f32 1.0, %v2544_v8 }
 0x387   :  { %v1975_v4 = vmul.f32 %v5651_v10, %v1911_v43  ;;  %v2488_v62 = vsub.f32 0.0, %v2360_v44  ;;  %vm2415_vm13 = vcmp.lt.f32.partialorder %v6041_v38, 0.0  ;;  %vm2424_vm14 = vcmp.lt.f32.partialorder %v5541_v48, 0.0  ;;  %v6043_v48 = vld [vmem:[#allocation51_spill] sm:$0xff] }
 0x388   :  { %3155 = vmatpush1.bf16.msra.mxu1 %v3154_v55  ;;  %v1785_v5 = vadd.f32 -0.28449672, %v1721_v11  ;;  %v1008_v10 = vmul.f32 0.5, %v6042_v36  ;;  %v2543_v24 = vsel %vm2415_vm13, %v2479_v51, %v2351_v49  ;;  %v2353_v37 = vsub.f32 1.0, %v2289_v32 }
 0x389   :  { %v2295_v46 = vmul.f32 %v3418_v33, %v1975_v4  ;;  %v2552_v42 = vsel %vm2424_vm14, %v2488_v62, %v2360_v44  ;;  %v1016_v53 = vmul.f32 0.5, %v5526_v60  ;;  %vm2423_vm15 = vcmp.lt.f32.partialorder %v5567_v30, 0.0 }
 0x38a   :  { %v2616_v55 = vadd.f32 1.0, %v2552_v42  ;;  %v1849_v29 = vmul.f32 %v5701_v52, %v1785_v5  ;;  %v2672_v16 = vmul.f32 %v2608_v28, %v1008_v10  ;;  %v2607_v39 = vadd.f32 1.0, %v2543_v24 }
 0x38b   :  { %v2359_v20 = vsub.f32 1.0, %v2295_v46  ;;  %v1007_v35 = vmul.f32 0.5, %v6043_v48  ;;  %v1015_v58 = vmul.f32 0.5, %v5550_v41  ;;  %v2481_v40 = vsub.f32 0.0, %v2353_v37 }
 0x38c   :  { %v2680_v14 = vmul.f32 %v2616_v55, %v1016_v53  ;;  %v1913_v0 = vadd.f32 0.2548296, %v1849_v29  ;;  %vm2417_vm0 = vcmp.lt.f32.partialorder %v5446_v59, 0.0  ;;  %vm2425_vm1 = vcmp.lt.f32.partialorder %v5602_v50, 0.0  ;;  %v2687_v50 = vpop.permute.xlu0 %2686 }
 0x38d   :  { %v2487_v1 = vsub.f32 0.0, %v2359_v20  ;;  %v2671_v25 = vmul.f32 %v2607_v39, %v1007_v35  ;;  %v2545_v30 = vsel %vm2417_vm0, %v2481_v40, %v2353_v37  ;;  %v1009_v61 = vmul.f32 0.5, %v5432_v34 }
 0x38e   :  { %v3158_v47 = vpack.c.bf16 %v2680_v14, %v2672_v16  ;;  %v1977_v60 = vmul.f32 %v5701_v52, %v1913_v0  ;;  %v2609_v19 = vadd.f32 1.0, %v2545_v30  ;;  %v1017_v52 = vmul.f32 0.5, %v5595_v22 }
 0x38f   :  { %v2551_v13 = vsel %vm2423_vm15, %v2487_v1, %v2359_v20  ;;  %v3420_v17 = vpop.eup %3419  ;;  %v2978_v6 = vstv %s2977_s6  ;;  %v2982_v43 = vstv %s3060_s18  ;;  %v2988_v32 = vstv %s3061_s19 }
 0x390   :  { %v2615_v49 = vadd.f32 1.0, %v2551_v13  ;;  %v2297_v45 = vmul.f32 %v3420_v17, %v1977_v60  ;;  %v2673_v31 = vmul.f32 %v2609_v19, %v1009_v61  ;;  %v2994_v10 = vstv %s3062_s20 }
 0x392   :  { %v2679_v56 = vmul.f32 %v2615_v49, %v1015_v58  ;;  %v2361_v15 = vsub.f32 1.0, %v2297_v45 }
 0x394   :  { %v3140_v26 = vpack.c.bf16 %v2679_v56, %v2671_v25  ;;  %v2489_v27 = vsub.f32 0.0, %v2361_v15 }
 0x396   :  { %3141 = vmatprep.subr.bf16.mxu0 %v3140_v26  ;;  %v2553_v41 = vsel %vm2425_vm1, %v2489_v27, %v2361_v15 }
 0x397   :  { %3143 = vmatpush1.bf16.msra.mxu0 %v3142_v2  ;;  %v2617_v23 = vadd.f32 1.0, %v2553_v41 }
 0x399   :  { %v2681_v59 = vmul.f32 %v2617_v23, %v1017_v52 }
 0x39a   :  { %3058 = vmatmul.mubr.msk.f32.vlgmr.msra.gmra.mrb[42].mxu0 %vm2689_vm9, %v5669_v9 }
 0x39b   :  { %v3156_v54 = vpack.c.bf16 %v2681_v59, %v2673_v31 }
 0x39d   :  { %3157 = vmatprep.subr.bf16.mxu1 %v3156_v54 }
 0x39e   :  { %3159 = vmatpush1.bf16.msra.mxu1 %v3158_v47 }
 0x3a1   :  { %3059 = vmatmul.mubr.msk.f32.vlgmr.msra.gmra.mrb[42].mxu1 %vm2689_vm9, %v5669_v9 }
 0x44f   :  { %v2759_v63 = vpop.f32.mrb[40].mxu0 }
 0x450   :  { %v2760_v34 = vadd.f32 %v2759_v63, %v2687_v50  ;;  %v2761_v3 = vpop.f32.mrb[41].mxu0 }
 0x451   :  { %v2762_v21 = vadd.f32 %v2761_v3, %v2687_v50 }
 0x452   :  { %v2830_v22 = vpop.f32.mrb[40].mxu1  ;;  %v2979_v18 = vmul.f32 %v2978_v6, %v2760_v34 }
 0x453   :  { %v2831_v57 = vadd.f32 %v2830_v22, %v2687_v50  ;;  %v2832_v8 = vpop.f32.mrb[41].mxu1  ;;  %v2980_v12 = vmul.f32 %v2978_v6, %v2762_v21 }
 0x454   :  { %v2833_v7 = vadd.f32 %v2832_v8, %v2687_v50 }
 0x455   :  { %v2983_v51 = vmul.f32 %v2982_v43, %v2831_v57 }
 0x456   :  { %v2984_v44 = vmul.f32 %v2982_v43, %v2833_v7 }
 0x457   :  { %v2985_v4 = vadd.f32 %v2983_v51, %v2979_v18 }
 0x458   :  { %v2986_v33 = vadd.f32 %v2984_v44, %v2980_v12 }
 0x46d   :  { %v2901_v9 = vpop.f32.mrb[42].mxu0 }
 0x46e   :  { %v2902_v2 = vadd.f32 %v2901_v9, %v2687_v50  ;;  %v2903_v11 = vpop.f32.mrb[43].mxu0 }
 0x46f   :  { %v2904_v62 = vadd.f32 %v2903_v11, %v2687_v50 }
 0x470   :  { %v2989_v46 = vmul.f32 %v2988_v32, %v2902_v2 }
 0x471   :  { %v2990_v28 = vmul.f32 %v2988_v32, %v2904_v62 }
 0x472   :  { %v2991_v38 = vadd.f32 %v2989_v46, %v2985_v4 }
 0x473   :  { %v2992_v5 = vadd.f32 %v2990_v28, %v2986_v33 }
 0x474   :  { %v2972_v36 = vpop.f32.mrb[42].mxu1 }
 0x475   :  { %v2973_v24 = vadd.f32 %v2972_v36, %v2687_v50  ;;  %v2974_v42 = vpop.f32.mrb[43].mxu1 }
 0x476   :  { %v2975_v20 = vadd.f32 %v2974_v42, %v2687_v50 }
 0x477   :  { %v2995_v37 = vmul.f32 %v2994_v10, %v2973_v24 }
 0x478   :  { %v2996_v53 = vmul.f32 %v2994_v10, %v2975_v20 }
 0x479   :  { %v2997_v55 = vadd.f32 %v2995_v37, %v2991_v38 }
 0x47a   :  { %v2998_v29 = vadd.f32 %v2996_v53, %v2992_v5 }
 0x47c   :  { %v3001_v1 = vcombine.low %v2997_v55, %v2998_v29 }
 0x47e   :  { %3063 = vst.sshfl [vmem:[%s5768_s9] sm:$0x33 pattern:$0x76325410] %v3001_v1 }
 0x47f   :  { %3015 = vsyncpa [#allocation3], 1 }

</bundles_post_ra>
